<compile_context>
chip_gen: v7x
topology: tpu7x:2x2x1
jax: 0.10.0
libtpu: 0.0.40
codegen_flags: <defaults>
</compile_context>

<pallas_src>
import jax
import jax.numpy as jnp
from jax import lax
from jax.experimental import pallas as pl
from jax.experimental.pallas import tpu as pltpu


# ---------------------------------------------------------------------------
# Pallas kernel
# ---------------------------------------------------------------------------
def meta_layer_kernel(
    # tiled per-edge inputs
    row_ref, colr_ref, colc_ref, ea_ref,
    # resident graph-level inputs
    x_ref, u_ref, batchr_ref, batchc_ref, inv_deg_ref, inv_bsz_ref,
    # edge model (concat-free split weights)
    ew1_srcu, ew1_dst, ew1_ea, eb1, ew2, eb2,
    # node_mlp_1 (split weights, u-rows zero-padded)
    n1w1_x, n1w1_e, n1b1, n1w2, n1b2,
    # node_mlp_2 (split weights)
    n2w1_x, n2w1_a, n2w1_u, n2b1, n2w2, n2b2,
    # global model (split weights)
    gw1_u, gw1_x, gb1, gw2, gb2,
    # outputs
    x_out, ea_out, u_out,
    # scratch (persist across grid steps)
    sums_acc, un_f32, xun_bf, iota_en_scr, iota_ne_scr,
):
    f32 = jnp.float32
    bf16 = jnp.bfloat16
    i = pl.program_id(0)
    nsteps = pl.num_programs(0)

    N = x_ref.shape[0]
    B = u_ref.shape[0]
    TE = ea_ref.shape[0]

    def mxu(a, b):
        return jnp.dot(a, b, preferred_element_type=f32)

    # ---- one-time init: zero accumulator, hoist iotas, build node slab ------
    @pl.when(i == 0)
    def _init():
        sums_acc[...] = jnp.zeros_like(sums_acc)
        # grid-invariant node-index iotas, built once and reused every tile.
        iota_en_scr[...] = lax.broadcasted_iota(jnp.int32, (TE, N), 1)  # [e,n]=n
        iota_ne_scr[...] = lax.broadcasted_iota(jnp.int32, (N, TE), 0)  # [n,e]=n
        # exact f32 one-hot gather: u_node = u[batch]   (N, Fu)
        g_nb = (lax.broadcasted_iota(jnp.int32, (N, B), 1)
                == batchr_ref[...]).astype(f32)                         # [n,b]=(b==batch[n])
        un = mxu(g_nb, u_ref[...])
        un_f32[...] = un
        # bf16 node slab [x | u[batch]] used by the per-tile edge gathers
        xun_bf[...] = jnp.concatenate([x_ref[...], un], axis=1).astype(bf16)

    # ---- per-edge-tile work --------------------------------------------------
    row = row_ref[...]            # (TE, 1) int32  (edge source indices)
    colr = colr_ref[...]          # (TE, 1) int32  (edge target, gather layout)
    colc = colc_ref[...]          # (1, TE) int32  (edge target, scatter layout)
    ea = ea_ref[...]              # (TE, Fe) bf16

    iota_en = iota_en_scr[...]                 # (TE, N), value = node index n
    g_row = (iota_en == row).astype(bf16)      # (TE, N): [e,n] = (n == row[e])
    g_col = (iota_en == colr).astype(bf16)     # (TE, N): [e,n] = (n == col[e])
    # scatter matrix (N, TE): [n,e] = (n == col[e]) — node iota on dim 0,
    # built directly transposed (no XLU transpose in front of the MXU).
    g_sct = (iota_ne_scr[...] == colc).astype(bf16)

    slab = xun_bf[...]                         # (N, Fx+Fu) bf16
    xu_row = mxu(g_row, slab)                  # (TE, Fx+Fu) == [x|u[batch]][row]
    xu_col = mxu(g_col, slab)                  # (TE, Fx+Fu) == [x|u[batch]][col]

    # edge model: cat([src, dst, edge_attr, u[batch[row]]]) -> MLP, done
    # concat-free via split weights (u-rows of ew1_dst are zero).
    eh = jnp.maximum(
        mxu(xu_row, ew1_srcu[...]) + mxu(xu_col, ew1_dst[...])
        + mxu(ea, ew1_ea[...]) + eb1[...], 0.0)
    ea_new = mxu(eh, ew2[...]) + eb2[...]      # (TE, Fe_out) lane-padded
    ea_out[...] = ea_new

    # node_mlp_1: cat([x[row], ea_new]) -> MLP (u-rows of n1w1_x are zero)
    nh1 = jnp.maximum(
        mxu(xu_row, n1w1_x[...]) + mxu(ea_new, n1w1_e[...]) + n1b1[...], 0.0)
    m1 = mxu(nh1, n1w2[...]) + n1b2[...]       # (TE, H1_out) lane-padded

    # scatter-sum into the node accumulator (bf16 operands, f32 accumulate)
    sums_acc[...] += mxu(g_sct, m1.astype(bf16))

    # ---- finalize: node_mlp_2 + global model ---------------------------------
    @pl.when(i == nsteps - 1)
    def _finalize():
        x = x_ref[...]
        un = un_f32[...]
        agg = sums_acc[...] * inv_deg_ref[...]          # scatter_mean
        nh2 = jnp.maximum(
            mxu(x, n2w1_x[...]) + mxu(agg, n2w1_a[...])
            + mxu(un, n2w1_u[...]) + n2b1[...], 0.0)
        x_new = mxu(nh2, n2w2[...]) + n2b2[...]         # (N, Fx_out) lane-padded
        x_out[...] = x_new

        # scatter_mean(x_new, batch): (B, N) one-hot with GRAPH iota on dim 0
        g_gb = (lax.broadcasted_iota(jnp.int32, (B, N), 0)
                == batchc_ref[...]).astype(f32)         # [b,n] = (b == batch[n])
        x_mean = mxu(g_gb, x_new) * inv_bsz_ref[...]
        gh = jnp.maximum(
            mxu(u_ref[...], gw1_u[...]) + mxu(x_mean, gw1_x[...]) + gb1[...],
            0.0)
        u_out[...] = mxu(gh, gw2[...]) + gb2[...]       # (B, Fu_out) lane-padded


PARAM_ORDER = [
    "ew1", "eb1", "ew2", "eb2",
    "n1w1", "n1b1", "n1w2", "n1b2",
    "n2w1", "n2b1", "n2w2", "n2b2",
    "gw1", "gb1", "gw2", "gb2",
]


# ---------------------------------------------------------------------------
# Wrapper
# ---------------------------------------------------------------------------
def my_meta_layer(x, edge_index, edge_attr, u, batch, params, *,
                  edge_tile=256, pad_edge_lanes=True):
    """Pallas-backed MyMetaLayer.forward -> (x_new, edge_attr_new, u_new).

    pad_edge_lanes: lane-pad the streamed ea_out blocks to 128 (unmasked full
    stores).  Set False on v5e / clearly HBM-bound cases, where the 16x write
    inflation of the only per-tile streamed output costs more than the masked
    stores it removes.
    """
    f32 = jnp.float32
    bf16 = jnp.bfloat16
    x = x.astype(f32)
    u = u.astype(f32)
    N, Fx = x.shape
    E, Fe = edge_attr.shape
    B, Fu = u.shape
    H = params["ew1"].shape[1]
    H1 = params["n1w2"].shape[1]

    def _ru(v, m):
        return ((v + m - 1) // m) * m

    LANE = 128
    Fe_out = _ru(Fe, LANE) if pad_edge_lanes else Fe
    H1_out = _ru(H1, LANE)       # VMEM accumulator only -> always lane-dense
    Fx_out = _ru(Fx, LANE)       # written once (finalize) -> lane-dense
    Fu_out = _ru(Fu, LANE)       # written once (finalize) -> lane-dense

    def pad_cols(w, to):
        return w if w.shape[1] == to else jnp.pad(w, ((0, 0), (0, to - w.shape[1])))

    def pad_rows(w, to):
        return w if w.shape[0] == to else jnp.pad(w, ((0, to - w.shape[0]), (0, 0)))

    # ---- pad edges to a multiple of the lane-aligned tile --------------------
    TE = edge_tile
    E_pad = _ru(E, TE)
    pad = E_pad - E
    row = edge_index[0].astype(jnp.int32)
    col = edge_index[1].astype(jnp.int32)
    # padded edges use node index N (matches no one-hot row -> contribute 0)
    row_p = jnp.concatenate([row, jnp.full((pad,), N, jnp.int32)])
    col_p = jnp.concatenate([col, jnp.full((pad,), N, jnp.int32)])
    ea_p = jnp.concatenate([edge_attr.astype(bf16), jnp.zeros((pad, Fe), bf16)], 0)
    row_r = row_p.reshape(E_pad, 1)       # (TE,1)-tiled layout for gathers
    col_r = col_p.reshape(E_pad, 1)
    col_c = col_p.reshape(1, E_pad)       # lane-dense layout for the scatter

    batch_i = batch.astype(jnp.int32)
    batch_r = batch_i.reshape(N, 1)
    batch_c = batch_i.reshape(1, N)

    # ---- degree / graph-size reciprocals precomputed outside the kernel ------
    deg = jnp.zeros((N,), f32).at[col].add(1.0)
    inv_deg = (1.0 / jnp.maximum(deg, 1.0)).reshape(N, 1)
    bsz = jnp.zeros((B,), f32).at[batch_i].add(1.0)
    inv_bsz = (1.0 / jnp.maximum(bsz, 1.0)).reshape(B, 1)

    # ---- concat-free weight splits + lane padding (static, done once) --------
    ew1, n1w1, n2w1, gw1 = (params[k] for k in ("ew1", "n1w1", "n2w1", "gw1"))
    zFu = jnp.zeros((Fu, H), f32)
    ew1_srcu = jnp.concatenate([ew1[:Fx], ew1[2 * Fx + Fe:]], axis=0)   # (Fx+Fu, H)
    ew1_dst = jnp.concatenate([ew1[Fx:2 * Fx], zFu], axis=0)            # (Fx+Fu, H)
    ew1_ea = ew1[2 * Fx:2 * Fx + Fe].astype(bf16)                       # bf16 like streamed ea
    eb1 = params["eb1"]
    ew2 = pad_cols(params["ew2"], Fe_out)
    eb2 = pad_cols(params["eb2"], Fe_out)

    n1w1_x = jnp.concatenate([n1w1[:Fx], zFu], axis=0)                  # (Fx+Fu, H)
    n1w1_e = pad_rows(n1w1[Fx:], Fe_out)                                # consume padded ea_new
    n1b1 = params["n1b1"]
    n1w2 = pad_cols(params["n1w2"], H1_out)
    n1b2 = pad_cols(params["n1b2"], H1_out)

    n2w1_x = n2w1[:Fx]
    n2w1_a = pad_rows(n2w1[Fx:Fx + H1], H1_out)                         # consume padded agg
    n2w1_u = n2w1[Fx + H1:]
    n2b1 = params["n2b1"]
    n2w2 = pad_cols(params["n2w2"], Fx_out)
    n2b2 = pad_cols(params["n2b2"], Fx_out)

    gw1_u = gw1[:Fu]
    gw1_x = pad_rows(gw1[Fu:], Fx_out)                                  # consume padded x_new
    gb1 = params["gb1"]
    gw2 = pad_cols(params["gw2"], Fu_out)
    gb2 = pad_cols(params["gb2"], Fu_out)

    weights = [
        ew1_srcu, ew1_dst, ew1_ea, eb1, ew2, eb2,
        n1w1_x, n1w1_e, n1b1, n1w2, n1b2,
        n2w1_x, n2w1_a, n2w1_u, n2b1, n2w2, n2b2,
        gw1_u, gw1_x, gb1, gw2, gb2,
    ]

    def full_spec(a):   # resident (fetched once, constant block index)
        # TODO(synk): add pipeline_mode=pl.Buffered(1) here once needed — the
        # block index never changes so double-buffering these ~22 residents is
        # wasted VMEM; negligible at these sizes, real headroom on v7x (64 MiB).
        return pl.BlockSpec(a.shape, lambda i: (0, 0))

    in_specs = [
        pl.BlockSpec((TE, 1), lambda i: (i, 0)),      # row (gather layout)
        pl.BlockSpec((TE, 1), lambda i: (i, 0)),      # col (gather layout)
        pl.BlockSpec((1, TE), lambda i: (0, i)),      # col (scatter layout)
        pl.BlockSpec((TE, Fe), lambda i: (i, 0)),     # edge_attr tile (bf16)
        full_spec(x), full_spec(u),
        full_spec(batch_r), full_spec(batch_c),
        full_spec(inv_deg), full_spec(inv_bsz),
    ] + [full_spec(w) for w in weights]

    out_specs = (
        pl.BlockSpec((N, Fx_out), lambda i: (0, 0)),      # x_out   (resident)
        pl.BlockSpec((TE, Fe_out), lambda i: (i, 0)),     # ea_out  (per-tile)
        pl.BlockSpec((B, Fu_out), lambda i: (0, 0)),      # u_out   (resident)
    )

    out_shape = (
        jax.ShapeDtypeStruct((N, Fx_out), f32),
        jax.ShapeDtypeStruct((E_pad, Fe_out), f32),
        jax.ShapeDtypeStruct((B, Fu_out), f32),
    )

    scratch_shapes = [
        pltpu.VMEM((N, H1_out), f32),             # scatter-sum accumulator (lane-dense)
        pltpu.VMEM((N, Fu), f32),                 # u[batch], exact f32
        pltpu.VMEM((N, Fx + Fu), bf16),           # bf16 node slab [x | u[batch]]
        pltpu.VMEM((TE, N), jnp.int32),           # hoisted gather-layout iota
        pltpu.VMEM((N, TE), jnp.int32),           # hoisted scatter-layout iota
    ]

    # VMEM budget: residents + double-buffered edge tiles + scratch, 2x margin,
    # capped generation-aware (~85% of queried VMEM; fallback 48 MiB which is
    # also valid on v7x's 64 MiB VMEM).
    def nbytes(a):
        return a.size * a.dtype.itemsize
    resident = sum(nbytes(a) for a in
                   [x, u, batch_r, batch_c, inv_deg, inv_bsz] + list(weights))
    tiled = 2 * (2 * TE * 4 + TE * 4 + TE * Fe * 2 + TE * Fe_out * 4)
    scratch = (N * H1_out * 4 + N * Fu * 4 + N * (Fx + Fu) * 2
               + TE * N * 4 + N * TE * 4)
    out_res = N * Fx_out * 4 + B * Fu_out * 4
    need = 2 * (resident + tiled + scratch + out_res) + (8 << 20)
    try:
        cap = int(0.85 * pltpu.get_tpu_info().vmem_capacity_bytes)
    except Exception:
        cap = 48 << 20
    cap = max(cap, 32 << 20)
    vmem_limit = int(min(max(need, 16 << 20), cap))

    x_new, ea_new, u_new = pl.pallas_call(
        meta_layer_kernel,
        out_shape=out_shape,
        grid=(E_pad // TE,),
        in_specs=in_specs,
        out_specs=out_specs,
        scratch_shapes=scratch_shapes,
        compiler_params=pltpu.CompilerParams(
            # the single edge axis accumulates into the scatter scratch and the
            # resident x/u outputs -> "arbitrary"
            dimension_semantics=("arbitrary",),
            vmem_limit_bytes=vmem_limit,
        ),
    )(row_r, col_r, col_c, ea_p, x, u, batch_r, batch_c, inv_deg, inv_bsz,
      *weights)

    return x_new[:, :Fx], ea_new[:E, :Fe], u_new[:, :Fu]


# ---------------------------------------------------------------------------
# Pure-JAX reference (mirrors the PyTorch docstring Edge/Node/Global models)
# ---------------------------------------------------------------------------
def reference(x, edge_index, edge_attr, u, batch, p):
    row, col = edge_index[0], edge_index[1]
    e_in = jnp.concatenate([x[row], x[col], edge_attr, u[batch[row]]], 1)
    ea_new = jnp.maximum(e_in @ p["ew1"] + p["eb1"], 0) @ p["ew2"] + p["eb2"]

    n_in1 = jnp.concatenate([x[row], ea_new], 1)
    m1 = jnp.maximum(n_in1 @ p["n1w1"] + p["n1b1"], 0) @ p["n1w2"] + p["n1b2"]
    N = x.shape[0]
    sums = jnp.zeros((N, m1.shape[1]), jnp.float32).at[col].add(m1)
    counts = jnp.zeros((N, 1), jnp.float32).at[col].add(1.0)
    agg = sums / jnp.maximum(counts, 1.0)
    n_in2 = jnp.concatenate([x, agg, u[batch]], 1)
    x_new = jnp.maximum(n_in2 @ p["n2w1"] + p["n2b1"], 0) @ p["n2w2"] + p["n2b2"]

    B = u.shape[0]
    gs = jnp.zeros((B, x_new.shape[1]), jnp.float32).at[batch].add(x_new)
    gc = jnp.zeros((B, 1), jnp.float32).at[batch].add(1.0)
    x_mean = gs / jnp.maximum(gc, 1.0)
    g_in = jnp.concatenate([u, x_mean], 1)
    u_new = jnp.maximum(g_in @ p["gw1"] + p["gb1"], 0) @ p["gw2"] + p["gb2"]
    return x_new, ea_new, u_new


# ---------------------------------------------------------------------------
# Deterministic parameter construction
# ---------------------------------------------------------------------------
def make_params(key, Fx, Fe, Fu, H, H1):
    shapes = {
        "ew1": (2 * Fx + Fe + Fu, H), "eb1": (1, H),
        "ew2": (H, Fe),               "eb2": (1, Fe),
        "n1w1": (Fx + Fe, H),         "n1b1": (1, H),
        "n1w2": (H, H1),              "n1b2": (1, H1),
        "n2w1": (Fx + H1 + Fu, H),    "n2b1": (1, H),
        "n2w2": (H, Fx),              "n2b2": (1, Fx),
        "gw1": (Fu + Fx, H),          "gb1": (1, H),
        "gw2": (H, Fu),               "gb2": (1, Fu),
    }
    params = {}
    for name in PARAM_ORDER:
        key, sub = jax.random.split(key)
        params[name] = 0.1 * jax.random.normal(sub, shapes[name], jnp.float32)
    return params


if __name__ == "__main__":
    # Small graph: exercises >1 edge tile (TE=256) plus edge padding (E=600).
    N, E, B = 64, 600, 4
    Fx, Fe, Fu, H, H1 = 8, 8, 8, 32, 16

    key = jax.random.PRNGKey(0)
    k_x, k_e, k_u, k_row, k_col, k_p = jax.random.split(key, 6)

    x = jax.random.normal(k_x, (N, Fx), jnp.float32)
    edge_attr = jax.random.normal(k_e, (E, Fe), jnp.float32)
    u = jax.random.normal(k_u, (B, Fu), jnp.float32)
    row = jax.random.randint(k_row, (E,), 0, N, jnp.int32)
    col = jax.random.randint(k_col, (E,), 0, N, jnp.int32)
    edge_index = jnp.stack([row, col], axis=0)                 # [2, E]
    batch = jnp.minimum(jnp.arange(N, dtype=jnp.int32) // (N // B), B - 1)

    params = make_params(k_p, Fx, Fe, Fu, H, H1)

    # TODO(synk): `queries` / `num_props` args of MyMetaLayer.forward are passed
    # through to a custom node_model; the canonical docstring node model ignores
    # them, so they are omitted here.

    x_new, ea_new, u_new = jax.block_until_ready(
        my_meta_layer(x, edge_index, edge_attr, u, batch, params)
    )

    x_ref, ea_ref, u_ref = reference(x, edge_index, edge_attr, u, batch, params)
    # bf16 operands on the one-hot gather/scatter matmuls and the streamed
    # edge_attr round x/u/ea/m1 once (~2^-9 relative) -> compare at 2e-2.
    assert jnp.allclose(x_new, x_ref, rtol=2e-2, atol=2e-2), "node output mismatch"
    assert jnp.allclose(ea_new, ea_ref, rtol=2e-2, atol=2e-2), "edge output mismatch"
    assert jnp.allclose(u_new, u_ref, rtol=2e-2, atol=2e-2), "global output mismatch"

    print("KERNEL_OK")
</pallas_src>

<mosaic_0001>
module attributes {stable_mosaic.version = 11 : i64} {
  func.func @meta_layer_kernel(%arg0: i32, %arg1: memref<256x1xi32, #tpu.memory_space<vmem>>, %arg2: memref<256x1xi32, #tpu.memory_space<vmem>>, %arg3: memref<1x256xi32, #tpu.memory_space<vmem>>, %arg4: memref<256x8xbf16, #tpu.memory_space<vmem>>, %arg5: memref<64x8xf32, #tpu.memory_space<vmem>>, %arg6: memref<4x8xf32, #tpu.memory_space<vmem>>, %arg7: memref<64x1xi32, #tpu.memory_space<vmem>>, %arg8: memref<1x64xi32, #tpu.memory_space<vmem>>, %arg9: memref<64x1xf32, #tpu.memory_space<vmem>>, %arg10: memref<4x1xf32, #tpu.memory_space<vmem>>, %arg11: memref<16x32xf32, #tpu.memory_space<vmem>>, %arg12: memref<16x32xf32, #tpu.memory_space<vmem>>, %arg13: memref<8x32xbf16, #tpu.memory_space<vmem>>, %arg14: memref<1x32xf32, #tpu.memory_space<vmem>>, %arg15: memref<32x128xf32, #tpu.memory_space<vmem>>, %arg16: memref<1x128xf32, #tpu.memory_space<vmem>>, %arg17: memref<16x32xf32, #tpu.memory_space<vmem>>, %arg18: memref<128x32xf32, #tpu.memory_space<vmem>>, %arg19: memref<1x32xf32, #tpu.memory_space<vmem>>, %arg20: memref<32x128xf32, #tpu.memory_space<vmem>>, %arg21: memref<1x128xf32, #tpu.memory_space<vmem>>, %arg22: memref<8x32xf32, #tpu.memory_space<vmem>>, %arg23: memref<128x32xf32, #tpu.memory_space<vmem>>, %arg24: memref<8x32xf32, #tpu.memory_space<vmem>>, %arg25: memref<1x32xf32, #tpu.memory_space<vmem>>, %arg26: memref<32x128xf32, #tpu.memory_space<vmem>>, %arg27: memref<1x128xf32, #tpu.memory_space<vmem>>, %arg28: memref<8x32xf32, #tpu.memory_space<vmem>>, %arg29: memref<128x32xf32, #tpu.memory_space<vmem>>, %arg30: memref<1x32xf32, #tpu.memory_space<vmem>>, %arg31: memref<32x128xf32, #tpu.memory_space<vmem>>, %arg32: memref<1x128xf32, #tpu.memory_space<vmem>>, %arg33: memref<64x128xf32, #tpu.memory_space<vmem>>, %arg34: memref<256x128xf32, #tpu.memory_space<vmem>>, %arg35: memref<4x128xf32, #tpu.memory_space<vmem>>, %arg36: memref<64x128xf32, #tpu.memory_space<vmem>>, %arg37: memref<64x8xf32, #tpu.memory_space<vmem>>, %arg38: memref<64x16xbf16, #tpu.memory_space<vmem>>, %arg39: memref<256x64xi32, #tpu.memory_space<vmem>>, %arg40: memref<64x256xi32, #tpu.memory_space<vmem>>) attributes {dimension_semantics = [#tpu.dimension_semantics<arbitrary>], iteration_bounds = array<i64: 3>, scalar_prefetch = 0 : i64, scratch_operands = 5 : i64, tpu.core_type = #tpu.core_type<tc>, window_params = [{transform_indices = @transform_0, window_bounds = array<i64: 256, 1>}, {transform_indices = @transform_1, window_bounds = array<i64: 256, 1>}, {transform_indices = @transform_2, window_bounds = array<i64: 1, 256>}, {transform_indices = @transform_3, window_bounds = array<i64: 256, 8>}, {pipeline_mode = #tpu.pipeline_mode<synchronous>, transform_indices = @transform_4, window_bounds = array<i64: 64, 8>}, {pipeline_mode = #tpu.pipeline_mode<synchronous>, transform_indices = @transform_5, window_bounds = array<i64: 4, 8>}, {pipeline_mode = #tpu.pipeline_mode<synchronous>, transform_indices = @transform_6, window_bounds = array<i64: 64, 1>}, {pipeline_mode = #tpu.pipeline_mode<synchronous>, transform_indices = @transform_7, window_bounds = array<i64: 1, 64>}, {pipeline_mode = #tpu.pipeline_mode<synchronous>, transform_indices = @transform_8, window_bounds = array<i64: 64, 1>}, {pipeline_mode = #tpu.pipeline_mode<synchronous>, transform_indices = @transform_9, window_bounds = array<i64: 4, 1>}, {pipeline_mode = #tpu.pipeline_mode<synchronous>, transform_indices = @transform_10, window_bounds = array<i64: 16, 32>}, {pipeline_mode = #tpu.pipeline_mode<synchronous>, transform_indices = @transform_11, window_bounds = array<i64: 16, 32>}, {pipeline_mode = #tpu.pipeline_mode<synchronous>, transform_indices = @transform_12, window_bounds = array<i64: 8, 32>}, {pipeline_mode = #tpu.pipeline_mode<synchronous>, transform_indices = @transform_13, window_bounds = array<i64: 1, 32>}, {pipeline_mode = #tpu.pipeline_mode<synchronous>, transform_indices = @transform_14, window_bounds = array<i64: 32, 128>}, {pipeline_mode = #tpu.pipeline_mode<synchronous>, transform_indices = @transform_15, window_bounds = array<i64: 1, 128>}, {pipeline_mode = #tpu.pipeline_mode<synchronous>, transform_indices = @transform_16, window_bounds = array<i64: 16, 32>}, {pipeline_mode = #tpu.pipeline_mode<synchronous>, transform_indices = @transform_17, window_bounds = array<i64: 128, 32>}, {pipeline_mode = #tpu.pipeline_mode<synchronous>, transform_indices = @transform_18, window_bounds = array<i64: 1, 32>}, {pipeline_mode = #tpu.pipeline_mode<synchronous>, transform_indices = @transform_19, window_bounds = array<i64: 32, 128>}, {pipeline_mode = #tpu.pipeline_mode<synchronous>, transform_indices = @transform_20, window_bounds = array<i64: 1, 128>}, {pipeline_mode = #tpu.pipeline_mode<synchronous>, transform_indices = @transform_21, window_bounds = array<i64: 8, 32>}, {pipeline_mode = #tpu.pipeline_mode<synchronous>, transform_indices = @transform_22, window_bounds = array<i64: 128, 32>}, {pipeline_mode = #tpu.pipeline_mode<synchronous>, transform_indices = @transform_23, window_bounds = array<i64: 8, 32>}, {pipeline_mode = #tpu.pipeline_mode<synchronous>, transform_indices = @transform_24, window_bounds = array<i64: 1, 32>}, {pipeline_mode = #tpu.pipeline_mode<synchronous>, transform_indices = @transform_25, window_bounds = array<i64: 32, 128>}, {pipeline_mode = #tpu.pipeline_mode<synchronous>, transform_indices = @transform_26, window_bounds = array<i64: 1, 128>}, {pipeline_mode = #tpu.pipeline_mode<synchronous>, transform_indices = @transform_27, window_bounds = array<i64: 8, 32>}, {pipeline_mode = #tpu.pipeline_mode<synchronous>, transform_indices = @transform_28, window_bounds = array<i64: 128, 32>}, {pipeline_mode = #tpu.pipeline_mode<synchronous>, transform_indices = @transform_29, window_bounds = array<i64: 1, 32>}, {pipeline_mode = #tpu.pipeline_mode<synchronous>, transform_indices = @transform_30, window_bounds = array<i64: 32, 128>}, {pipeline_mode = #tpu.pipeline_mode<synchronous>, transform_indices = @transform_31, window_bounds = array<i64: 1, 128>}, {pipeline_mode = #tpu.pipeline_mode<synchronous>, transform_indices = @transform_32, window_bounds = array<i64: 64, 128>}, {transform_indices = @transform_33, window_bounds = array<i64: 256, 128>}, {pipeline_mode = #tpu.pipeline_mode<synchronous>, transform_indices = @transform_34, window_bounds = array<i64: 4, 128>}]} {
    %c0_i32 = arith.constant 0 : i32
    %0 = arith.cmpi eq, %arg0, %c0_i32 : i32
    %1 = arith.extui %0 : i1 to i32
    %c0_i32_0 = arith.constant 0 : i32
    %2 = arith.cmpi ne, %1, %c0_i32_0 : i32
    scf.if %2 {
      %cst_54 = arith.constant 0.000000e+00 : f32
      %69 = vector.broadcast %cst_54 : f32 to vector<64x128xf32>
      %c0_55 = arith.constant 0 : index
      %c0_56 = arith.constant 0 : index
      %70 = vector.load %arg36[%c0_55, %c0_56] : memref<64x128xf32, #tpu.memory_space<vmem>>, vector<64x128xf32>
      tpu.vector_store %arg36[%c0_55, %c0_56], %69 {strides = array<i32>} : memref<64x128xf32, #tpu.memory_space<vmem>>, vector<64x128xf32>,
      %71 = tpu.iota {dimensions = array<i32: 1>} : vector<256x64xi32>
      %c0_57 = arith.constant 0 : index
      %c0_58 = arith.constant 0 : index
      %72 = vector.load %arg39[%c0_57, %c0_58] : memref<256x64xi32, #tpu.memory_space<vmem>>, vector<256x64xi32>
      tpu.vector_store %arg39[%c0_57, %c0_58], %71 {strides = array<i32>} : memref<256x64xi32, #tpu.memory_space<vmem>>, vector<256x64xi32>,
      %73 = tpu.iota {dimensions = array<i32: 0>} : vector<64x256xi32>
      %c0_59 = arith.constant 0 : index
      %c0_60 = arith.constant 0 : index
      %74 = vector.load %arg40[%c0_59, %c0_60] : memref<64x256xi32, #tpu.memory_space<vmem>>, vector<64x256xi32>
      tpu.vector_store %arg40[%c0_59, %c0_60], %73 {strides = array<i32>} : memref<64x256xi32, #tpu.memory_space<vmem>>, vector<64x256xi32>,
      %75 = tpu.iota {dimensions = array<i32: 1>} : vector<64x4xi32>
      %c0_61 = arith.constant 0 : index
      %c0_62 = arith.constant 0 : index
      %76 = vector.load %arg7[%c0_61, %c0_62] : memref<64x1xi32, #tpu.memory_space<vmem>>, vector<64x1xi32>
      %77 = vector.broadcast %76 : vector<64x1xi32> to vector<64x4xi32>
      %78 = arith.cmpi eq, %75, %77 : vector<64x4xi32>
      %79 = arith.extui %78 : vector<64x4xi1> to vector<64x4xi32>
      %80 = arith.sitofp %79 : vector<64x4xi32> to vector<64x4xf32>
      %c0_63 = arith.constant 0 : index
      %c0_64 = arith.constant 0 : index
      %81 = vector.load %arg6[%c0_63, %c0_64] : memref<4x8xf32, #tpu.memory_space<vmem>>, vector<4x8xf32>
      %cst_65 = arith.constant dense<0.000000e+00> : vector<64x8xf32>
      %82 = tpu.matmul %80, %81, %cst_65 {dimension_numbers = #tpu.dot_dimension_numbers<[1], [0], [0], [1], [0, 0, 1, 1], [], []>} : vector<64x4xf32>, vector<4x8xf32>, vector<64x8xf32> -> vector<64x8xf32>
      %c0_66 = arith.constant 0 : index
      %c0_67 = arith.constant 0 : index
      %83 = vector.load %arg37[%c0_66, %c0_67] : memref<64x8xf32, #tpu.memory_space<vmem>>, vector<64x8xf32>
      tpu.vector_store %arg37[%c0_66, %c0_67], %82 {strides = array<i32>} : memref<64x8xf32, #tpu.memory_space<vmem>>, vector<64x8xf32>,
      %c0_68 = arith.constant 0 : index
      %c0_69 = arith.constant 0 : index
      %84 = vector.load %arg5[%c0_68, %c0_69] : memref<64x8xf32, #tpu.memory_space<vmem>>, vector<64x8xf32>
      %85 = tpu.concatenate %84, %82 in 1 : vector<64x8xf32>, vector<64x8xf32> -> vector<64x16xf32>
      %86 = arith.truncf %85 : vector<64x16xf32> to vector<64x16xbf16>
      %c0_70 = arith.constant 0 : index
      %c0_71 = arith.constant 0 : index
      %87 = vector.load %arg38[%c0_70, %c0_71] : memref<64x16xbf16, #tpu.memory_space<vmem>>, vector<64x16xbf16>
      tpu.vector_store %arg38[%c0_70, %c0_71], %86 {strides = array<i32>} : memref<64x16xbf16, #tpu.memory_space<vmem>>, vector<64x16xbf16>,
    } else {
    }
    %c0 = arith.constant 0 : index
    %c0_1 = arith.constant 0 : index
    %3 = vector.load %arg1[%c0, %c0_1] : memref<256x1xi32, #tpu.memory_space<vmem>>, vector<256x1xi32>
    %c0_2 = arith.constant 0 : index
    %c0_3 = arith.constant 0 : index
    %4 = vector.load %arg2[%c0_2, %c0_3] : memref<256x1xi32, #tpu.memory_space<vmem>>, vector<256x1xi32>
    %c0_4 = arith.constant 0 : index
    %c0_5 = arith.constant 0 : index
    %5 = vector.load %arg3[%c0_4, %c0_5] : memref<1x256xi32, #tpu.memory_space<vmem>>, vector<1x256xi32>
    %c0_6 = arith.constant 0 : index
    %c0_7 = arith.constant 0 : index
    %6 = vector.load %arg4[%c0_6, %c0_7] : memref<256x8xbf16, #tpu.memory_space<vmem>>, vector<256x8xbf16>
    %c0_8 = arith.constant 0 : index
    %c0_9 = arith.constant 0 : index
    %7 = vector.load %arg39[%c0_8, %c0_9] : memref<256x64xi32, #tpu.memory_space<vmem>>, vector<256x64xi32>
    %8 = vector.broadcast %3 : vector<256x1xi32> to vector<256x64xi32>
    %9 = arith.cmpi eq, %7, %8 : vector<256x64xi32>
    %10 = arith.extui %9 : vector<256x64xi1> to vector<256x64xi32>
    %11 = arith.sitofp %10 : vector<256x64xi32> to vector<256x64xf32>
    %12 = arith.truncf %11 : vector<256x64xf32> to vector<256x64xbf16>
    %13 = vector.broadcast %4 : vector<256x1xi32> to vector<256x64xi32>
    %14 = arith.cmpi eq, %7, %13 : vector<256x64xi32>
    %15 = arith.extui %14 : vector<256x64xi1> to vector<256x64xi32>
    %16 = arith.sitofp %15 : vector<256x64xi32> to vector<256x64xf32>
    %17 = arith.truncf %16 : vector<256x64xf32> to vector<256x64xbf16>
    %c0_10 = arith.constant 0 : index
    %c0_11 = arith.constant 0 : index
    %18 = vector.load %arg40[%c0_10, %c0_11] : memref<64x256xi32, #tpu.memory_space<vmem>>, vector<64x256xi32>
    %19 = vector.broadcast %5 : vector<1x256xi32> to vector<64x256xi32>
    %20 = arith.cmpi eq, %18, %19 : vector<64x256xi32>
    %21 = arith.extui %20 : vector<64x256xi1> to vector<64x256xi32>
    %22 = arith.sitofp %21 : vector<64x256xi32> to vector<64x256xf32>
    %23 = arith.truncf %22 : vector<64x256xf32> to vector<64x256xbf16>
    %c0_12 = arith.constant 0 : index
    %c0_13 = arith.constant 0 : index
    %24 = vector.load %arg38[%c0_12, %c0_13] : memref<64x16xbf16, #tpu.memory_space<vmem>>, vector<64x16xbf16>
    %cst = arith.constant dense<0.000000e+00> : vector<256x16xf32>
    %25 = tpu.matmul %12, %24, %cst {dimension_numbers = #tpu.dot_dimension_numbers<[1], [0], [0], [1], [0, 0, 1, 1], [], []>} : vector<256x64xbf16>, vector<64x16xbf16>, vector<256x16xf32> -> vector<256x16xf32>
    %cst_14 = arith.constant dense<0.000000e+00> : vector<256x16xf32>
    %26 = tpu.matmul %17, %24, %cst_14 {dimension_numbers = #tpu.dot_dimension_numbers<[1], [0], [0], [1], [0, 0, 1, 1], [], []>} : vector<256x64xbf16>, vector<64x16xbf16>, vector<256x16xf32> -> vector<256x16xf32>
    %c0_15 = arith.constant 0 : index
    %c0_16 = arith.constant 0 : index
    %27 = vector.load %arg11[%c0_15, %c0_16] : memref<16x32xf32, #tpu.memory_space<vmem>>, vector<16x32xf32>
    %cst_17 = arith.constant dense<0.000000e+00> : vector<256x32xf32>
    %28 = tpu.matmul %25, %27, %cst_17 {dimension_numbers = #tpu.dot_dimension_numbers<[1], [0], [0], [1], [0, 0, 1, 1], [], []>} : vector<256x16xf32>, vector<16x32xf32>, vector<256x32xf32> -> vector<256x32xf32>
    %c0_18 = arith.constant 0 : index
    %c0_19 = arith.constant 0 : index
    %29 = vector.load %arg12[%c0_18, %c0_19] : memref<16x32xf32, #tpu.memory_space<vmem>>, vector<16x32xf32>
    %cst_20 = arith.constant dense<0.000000e+00> : vector<256x32xf32>
    %30 = tpu.matmul %26, %29, %cst_20 {dimension_numbers = #tpu.dot_dimension_numbers<[1], [0], [0], [1], [0, 0, 1, 1], [], []>} : vector<256x16xf32>, vector<16x32xf32>, vector<256x32xf32> -> vector<256x32xf32>
    %31 = arith.addf %28, %30 : vector<256x32xf32>
    %c0_21 = arith.constant 0 : index
    %c0_22 = arith.constant 0 : index
    %32 = vector.load %arg13[%c0_21, %c0_22] : memref<8x32xbf16, #tpu.memory_space<vmem>>, vector<8x32xbf16>
    %cst_23 = arith.constant dense<0.000000e+00> : vector<256x32xf32>
    %33 = tpu.matmul %6, %32, %cst_23 {dimension_numbers = #tpu.dot_dimension_numbers<[1], [0], [0], [1], [0, 0, 1, 1], [], []>} : vector<256x8xbf16>, vector<8x32xbf16>, vector<256x32xf32> -> vector<256x32xf32>
    %34 = arith.addf %31, %33 : vector<256x32xf32>
    %c0_24 = arith.constant 0 : index
    %c0_25 = arith.constant 0 : index
    %35 = vector.load %arg14[%c0_24, %c0_25] : memref<1x32xf32, #tpu.memory_space<vmem>>, vector<1x32xf32>
    %36 = vector.broadcast %35 : vector<1x32xf32> to vector<256x32xf32>
    %37 = arith.addf %34, %36 : vector<256x32xf32>
    %cst_26 = arith.constant 0.000000e+00 : f32
    %38 = vector.broadcast %cst_26 : f32 to vector<256x32xf32>
    %39 = arith.maximumf %37, %38 : vector<256x32xf32>
    %c0_27 = arith.constant 0 : index
    %c0_28 = arith.constant 0 : index
    %40 = vector.load %arg15[%c0_27, %c0_28] : memref<32x128xf32, #tpu.memory_space<vmem>>, vector<32x128xf32>
    %cst_29 = arith.constant dense<0.000000e+00> : vector<256x128xf32>
    %41 = tpu.matmul %39, %40, %cst_29 {dimension_numbers = #tpu.dot_dimension_numbers<[1], [0], [0], [1], [0, 0, 1, 1], [], []>} : vector<256x32xf32>, vector<32x128xf32>, vector<256x128xf32> -> vector<256x128xf32>
    %c0_30 = arith.constant 0 : index
    %c0_31 = arith.constant 0 : index
    %42 = vector.load %arg16[%c0_30, %c0_31] : memref<1x128xf32, #tpu.memory_space<vmem>>, vector<1x128xf32>
    %43 = vector.broadcast %42 : vector<1x128xf32> to vector<256x128xf32>
    %44 = arith.addf %41, %43 : vector<256x128xf32>
    %c0_32 = arith.constant 0 : index
    %c0_33 = arith.constant 0 : index
    %45 = vector.load %arg34[%c0_32, %c0_33] : memref<256x128xf32, #tpu.memory_space<vmem>>, vector<256x128xf32>
    tpu.vector_store %arg34[%c0_32, %c0_33], %44 {strides = array<i32>} : memref<256x128xf32, #tpu.memory_space<vmem>>, vector<256x128xf32>,
    %c0_34 = arith.constant 0 : index
    %c0_35 = arith.constant 0 : index
    %46 = vector.load %arg17[%c0_34, %c0_35] : memref<16x32xf32, #tpu.memory_space<vmem>>, vector<16x32xf32>
    %cst_36 = arith.constant dense<0.000000e+00> : vector<256x32xf32>
    %47 = tpu.matmul %25, %46, %cst_36 {dimension_numbers = #tpu.dot_dimension_numbers<[1], [0], [0], [1], [0, 0, 1, 1], [], []>} : vector<256x16xf32>, vector<16x32xf32>, vector<256x32xf32> -> vector<256x32xf32>
    %c0_37 = arith.constant 0 : index
    %c0_38 = arith.constant 0 : index
    %48 = vector.load %arg18[%c0_37, %c0_38] : memref<128x32xf32, #tpu.memory_space<vmem>>, vector<128x32xf32>
    %cst_39 = arith.constant dense<0.000000e+00> : vector<256x32xf32>
    %49 = tpu.matmul %44, %48, %cst_39 {dimension_numbers = #tpu.dot_dimension_numbers<[1], [0], [0], [1], [0, 0, 1, 1], [], []>} : vector<256x128xf32>, vector<128x32xf32>, vector<256x32xf32> -> vector<256x32xf32>
    %50 = arith.addf %47, %49 : vector<256x32xf32>
    %c0_40 = arith.constant 0 : index
    %c0_41 = arith.constant 0 : index
    %51 = vector.load %arg19[%c0_40, %c0_41] : memref<1x32xf32, #tpu.memory_space<vmem>>, vector<1x32xf32>
    %52 = vector.broadcast %51 : vector<1x32xf32> to vector<256x32xf32>
    %53 = arith.addf %50, %52 : vector<256x32xf32>
    %cst_42 = arith.constant 0.000000e+00 : f32
    %54 = vector.broadcast %cst_42 : f32 to vector<256x32xf32>
    %55 = arith.maximumf %53, %54 : vector<256x32xf32>
    %c0_43 = arith.constant 0 : index
    %c0_44 = arith.constant 0 : index
    %56 = vector.load %arg20[%c0_43, %c0_44] : memref<32x128xf32, #tpu.memory_space<vmem>>, vector<32x128xf32>
    %cst_45 = arith.constant dense<0.000000e+00> : vector<256x128xf32>
    %57 = tpu.matmul %55, %56, %cst_45 {dimension_numbers = #tpu.dot_dimension_numbers<[1], [0], [0], [1], [0, 0, 1, 1], [], []>} : vector<256x32xf32>, vector<32x128xf32>, vector<256x128xf32> -> vector<256x128xf32>
    %c0_46 = arith.constant 0 : index
    %c0_47 = arith.constant 0 : index
    %58 = vector.load %arg21[%c0_46, %c0_47] : memref<1x128xf32, #tpu.memory_space<vmem>>, vector<1x128xf32>
    %59 = vector.broadcast %58 : vector<1x128xf32> to vector<256x128xf32>
    %60 = arith.addf %57, %59 : vector<256x128xf32>
    %c0_48 = arith.constant 0 : index
    %c0_49 = arith.constant 0 : index
    %61 = vector.load %arg36[%c0_48, %c0_49] : memref<64x128xf32, #tpu.memory_space<vmem>>, vector<64x128xf32>
    %62 = arith.truncf %60 : vector<256x128xf32> to vector<256x128xbf16>
    %cst_50 = arith.constant dense<0.000000e+00> : vector<64x128xf32>
    %63 = tpu.matmul %23, %62, %cst_50 {dimension_numbers = #tpu.dot_dimension_numbers<[1], [0], [0], [1], [0, 0, 1, 1], [], []>} : vector<64x256xbf16>, vector<256x128xbf16>, vector<64x128xf32> -> vector<64x128xf32>
    %64 = arith.addf %61, %63 : vector<64x128xf32>
    %c0_51 = arith.constant 0 : index
    %c0_52 = arith.constant 0 : index
    %65 = vector.load %arg36[%c0_51, %c0_52] : memref<64x128xf32, #tpu.memory_space<vmem>>, vector<64x128xf32>
    tpu.vector_store %arg36[%c0_51, %c0_52], %64 {strides = array<i32>} : memref<64x128xf32, #tpu.memory_space<vmem>>, vector<64x128xf32>,
    %c2_i32 = arith.constant 2 : i32
    %66 = arith.cmpi eq, %arg0, %c2_i32 : i32
    %67 = arith.extui %66 : i1 to i32
    %c0_i32_53 = arith.constant 0 : i32
    %68 = arith.cmpi ne, %67, %c0_i32_53 : i32
    scf.if %68 {
      %c0_54 = arith.constant 0 : index
      %c0_55 = arith.constant 0 : index
      %69 = vector.load %arg5[%c0_54, %c0_55] : memref<64x8xf32, #tpu.memory_space<vmem>>, vector<64x8xf32>
      %c0_56 = arith.constant 0 : index
      %c0_57 = arith.constant 0 : index
      %70 = vector.load %arg37[%c0_56, %c0_57] : memref<64x8xf32, #tpu.memory_space<vmem>>, vector<64x8xf32>
      %c0_58 = arith.constant 0 : index
      %c0_59 = arith.constant 0 : index
      %71 = vector.load %arg36[%c0_58, %c0_59] : memref<64x128xf32, #tpu.memory_space<vmem>>, vector<64x128xf32>
      %c0_60 = arith.constant 0 : index
      %c0_61 = arith.constant 0 : index
      %72 = vector.load %arg9[%c0_60, %c0_61] : memref<64x1xf32, #tpu.memory_space<vmem>>, vector<64x1xf32>
      %73 = vector.broadcast %72 : vector<64x1xf32> to vector<64x128xf32>
      %74 = arith.mulf %71, %73 : vector<64x128xf32>
      %c0_62 = arith.constant 0 : index
      %c0_63 = arith.constant 0 : index
      %75 = vector.load %arg22[%c0_62, %c0_63] : memref<8x32xf32, #tpu.memory_space<vmem>>, vector<8x32xf32>
      %cst_64 = arith.constant dense<0.000000e+00> : vector<64x32xf32>
      %76 = tpu.matmul %69, %75, %cst_64 {dimension_numbers = #tpu.dot_dimension_numbers<[1], [0], [0], [1], [0, 0, 1, 1], [], []>} : vector<64x8xf32>, vector<8x32xf32>, vector<64x32xf32> -> vector<64x32xf32>
      %c0_65 = arith.constant 0 : index
      %c0_66 = arith.constant 0 : index
      %77 = vector.load %arg23[%c0_65, %c0_66] : memref<128x32xf32, #tpu.memory_space<vmem>>, vector<128x32xf32>
      %cst_67 = arith.constant dense<0.000000e+00> : vector<64x32xf32>
      %78 = tpu.matmul %74, %77, %cst_67 {dimension_numbers = #tpu.dot_dimension_numbers<[1], [0], [0], [1], [0, 0, 1, 1], [], []>} : vector<64x128xf32>, vector<128x32xf32>, vector<64x32xf32> -> vector<64x32xf32>
      %79 = arith.addf %76, %78 : vector<64x32xf32>
      %c0_68 = arith.constant 0 : index
      %c0_69 = arith.constant 0 : index
      %80 = vector.load %arg24[%c0_68, %c0_69] : memref<8x32xf32, #tpu.memory_space<vmem>>, vector<8x32xf32>
      %cst_70 = arith.constant dense<0.000000e+00> : vector<64x32xf32>
      %81 = tpu.matmul %70, %80, %cst_70 {dimension_numbers = #tpu.dot_dimension_numbers<[1], [0], [0], [1], [0, 0, 1, 1], [], []>} : vector<64x8xf32>, vector<8x32xf32>, vector<64x32xf32> -> vector<64x32xf32>
      %82 = arith.addf %79, %81 : vector<64x32xf32>
      %c0_71 = arith.constant 0 : index
      %c0_72 = arith.constant 0 : index
      %83 = vector.load %arg25[%c0_71, %c0_72] : memref<1x32xf32, #tpu.memory_space<vmem>>, vector<1x32xf32>
      %84 = vector.broadcast %83 : vector<1x32xf32> to vector<64x32xf32>
      %85 = arith.addf %82, %84 : vector<64x32xf32>
      %cst_73 = arith.constant 0.000000e+00 : f32
      %86 = vector.broadcast %cst_73 : f32 to vector<64x32xf32>
      %87 = arith.maximumf %85, %86 : vector<64x32xf32>
      %c0_74 = arith.constant 0 : index
      %c0_75 = arith.constant 0 : index
      %88 = vector.load %arg26[%c0_74, %c0_75] : memref<32x128xf32, #tpu.memory_space<vmem>>, vector<32x128xf32>
      %cst_76 = arith.constant dense<0.000000e+00> : vector<64x128xf32>
      %89 = tpu.matmul %87, %88, %cst_76 {dimension_numbers = #tpu.dot_dimension_numbers<[1], [0], [0], [1], [0, 0, 1, 1], [], []>} : vector<64x32xf32>, vector<32x128xf32>, vector<64x128xf32> -> vector<64x128xf32>
      %c0_77 = arith.constant 0 : index
      %c0_78 = arith.constant 0 : index
      %90 = vector.load %arg27[%c0_77, %c0_78] : memref<1x128xf32, #tpu.memory_space<vmem>>, vector<1x128xf32>
      %91 = vector.broadcast %90 : vector<1x128xf32> to vector<64x128xf32>
      %92 = arith.addf %89, %91 : vector<64x128xf32>
      %c0_79 = arith.constant 0 : index
      %c0_80 = arith.constant 0 : index
      %93 = vector.load %arg33[%c0_79, %c0_80] : memref<64x128xf32, #tpu.memory_space<vmem>>, vector<64x128xf32>
      tpu.vector_store %arg33[%c0_79, %c0_80], %92 {strides = array<i32>} : memref<64x128xf32, #tpu.memory_space<vmem>>, vector<64x128xf32>,
      %94 = tpu.iota {dimensions = array<i32: 0>} : vector<4x64xi32>
      %c0_81 = arith.constant 0 : index
      %c0_82 = arith.constant 0 : index
      %95 = vector.load %arg8[%c0_81, %c0_82] : memref<1x64xi32, #tpu.memory_space<vmem>>, vector<1x64xi32>
      %96 = vector.broadcast %95 : vector<1x64xi32> to vector<4x64xi32>
      %97 = arith.cmpi eq, %94, %96 : vector<4x64xi32>
      %98 = arith.extui %97 : vector<4x64xi1> to vector<4x64xi32>
      %99 = arith.sitofp %98 : vector<4x64xi32> to vector<4x64xf32>
      %cst_83 = arith.constant dense<0.000000e+00> : vector<4x128xf32>
      %100 = tpu.matmul %99, %92, %cst_83 {dimension_numbers = #tpu.dot_dimension_numbers<[1], [0], [0], [1], [0, 0, 1, 1], [], []>} : vector<4x64xf32>, vector<64x128xf32>, vector<4x128xf32> -> vector<4x128xf32>
      %c0_84 = arith.constant 0 : index
      %c0_85 = arith.constant 0 : index
      %101 = vector.load %arg10[%c0_84, %c0_85] : memref<4x1xf32, #tpu.memory_space<vmem>>, vector<4x1xf32>
      %102 = vector.broadcast %101 : vector<4x1xf32> to vector<4x128xf32>
      %103 = arith.mulf %100, %102 : vector<4x128xf32>
      %c0_86 = arith.constant 0 : index
      %c0_87 = arith.constant 0 : index
      %104 = vector.load %arg6[%c0_86, %c0_87] : memref<4x8xf32, #tpu.memory_space<vmem>>, vector<4x8xf32>
      %c0_88 = arith.constant 0 : index
      %c0_89 = arith.constant 0 : index
      %105 = vector.load %arg28[%c0_88, %c0_89] : memref<8x32xf32, #tpu.memory_space<vmem>>, vector<8x32xf32>
      %cst_90 = arith.constant dense<0.000000e+00> : vector<4x32xf32>
      %106 = tpu.matmul %104, %105, %cst_90 {dimension_numbers = #tpu.dot_dimension_numbers<[1], [0], [0], [1], [0, 0, 1, 1], [], []>} : vector<4x8xf32>, vector<8x32xf32>, vector<4x32xf32> -> vector<4x32xf32>
      %c0_91 = arith.constant 0 : index
      %c0_92 = arith.constant 0 : index
      %107 = vector.load %arg29[%c0_91, %c0_92] : memref<128x32xf32, #tpu.memory_space<vmem>>, vector<128x32xf32>
      %cst_93 = arith.constant dense<0.000000e+00> : vector<4x32xf32>
      %108 = tpu.matmul %103, %107, %cst_93 {dimension_numbers = #tpu.dot_dimension_numbers<[1], [0], [0], [1], [0, 0, 1, 1], [], []>} : vector<4x128xf32>, vector<128x32xf32>, vector<4x32xf32> -> vector<4x32xf32>
      %109 = arith.addf %106, %108 : vector<4x32xf32>
      %c0_94 = arith.constant 0 : index
      %c0_95 = arith.constant 0 : index
      %110 = vector.load %arg30[%c0_94, %c0_95] : memref<1x32xf32, #tpu.memory_space<vmem>>, vector<1x32xf32>
      %111 = vector.broadcast %110 : vector<1x32xf32> to vector<4x32xf32>
      %112 = arith.addf %109, %111 : vector<4x32xf32>
      %cst_96 = arith.constant 0.000000e+00 : f32
      %113 = vector.broadcast %cst_96 : f32 to vector<4x32xf32>
      %114 = arith.maximumf %112, %113 : vector<4x32xf32>
      %c0_97 = arith.constant 0 : index
      %c0_98 = arith.constant 0 : index
      %115 = vector.load %arg31[%c0_97, %c0_98] : memref<32x128xf32, #tpu.memory_space<vmem>>, vector<32x128xf32>
      %cst_99 = arith.constant dense<0.000000e+00> : vector<4x128xf32>
      %116 = tpu.matmul %114, %115, %cst_99 {dimension_numbers = #tpu.dot_dimension_numbers<[1], [0], [0], [1], [0, 0, 1, 1], [], []>} : vector<4x32xf32>, vector<32x128xf32>, vector<4x128xf32> -> vector<4x128xf32>
      %c0_100 = arith.constant 0 : index
      %c0_101 = arith.constant 0 : index
      %117 = vector.load %arg32[%c0_100, %c0_101] : memref<1x128xf32, #tpu.memory_space<vmem>>, vector<1x128xf32>
      %118 = vector.broadcast %117 : vector<1x128xf32> to vector<4x128xf32>
      %119 = arith.addf %116, %118 : vector<4x128xf32>
      %c0_102 = arith.constant 0 : index
      %c0_103 = arith.constant 0 : index
      %120 = vector.load %arg35[%c0_102, %c0_103] : memref<4x128xf32, #tpu.memory_space<vmem>>, vector<4x128xf32>
      tpu.vector_store %arg35[%c0_102, %c0_103], %119 {strides = array<i32>} : memref<4x128xf32, #tpu.memory_space<vmem>>, vector<4x128xf32>,
    } else {
    }
    return
  }
  func.func @transform_0(%arg0: i32) -> (i32, i32) {
    %c0_i32 = arith.constant 0 : i32
    %c0_i32_0 = arith.constant 0 : i32
    return %arg0, %c0_i32 : i32, i32
  }
  func.func @transform_1(%arg0: i32) -> (i32, i32) {
    %c0_i32 = arith.constant 0 : i32
    %c0_i32_0 = arith.constant 0 : i32
    return %arg0, %c0_i32 : i32, i32
  }
  func.func @transform_2(%arg0: i32) -> (i32, i32) {
    %c0_i32 = arith.constant 0 : i32
    %c0_i32_0 = arith.constant 0 : i32
    return %c0_i32, %arg0 : i32, i32
  }
  func.func @transform_3(%arg0: i32) -> (i32, i32) {
    %c0_i32 = arith.constant 0 : i32
    %c0_i32_0 = arith.constant 0 : i32
    return %arg0, %c0_i32 : i32, i32
  }
  func.func @transform_4(%arg0: i32) -> (i32, i32) {
    %c0_i32 = arith.constant 0 : i32
    %c0_i32_0 = arith.constant 0 : i32
    %c0_i32_1 = arith.constant 0 : i32
    return %c0_i32, %c0_i32_0 : i32, i32
  }
  func.func @transform_5(%arg0: i32) -> (i32, i32) {
    %c0_i32 = arith.constant 0 : i32
    %c0_i32_0 = arith.constant 0 : i32
    %c0_i32_1 = arith.constant 0 : i32
    return %c0_i32, %c0_i32_0 : i32, i32
  }
  func.func @transform_6(%arg0: i32) -> (i32, i32) {
    %c0_i32 = arith.constant 0 : i32
    %c0_i32_0 = arith.constant 0 : i32
    %c0_i32_1 = arith.constant 0 : i32
    return %c0_i32, %c0_i32_0 : i32, i32
  }
  func.func @transform_7(%arg0: i32) -> (i32, i32) {
    %c0_i32 = arith.constant 0 : i32
    %c0_i32_0 = arith.constant 0 : i32
    %c0_i32_1 = arith.constant 0 : i32
    return %c0_i32, %c0_i32_0 : i32, i32
  }
  func.func @transform_8(%arg0: i32) -> (i32, i32) {
    %c0_i32 = arith.constant 0 : i32
    %c0_i32_0 = arith.constant 0 : i32
    %c0_i32_1 = arith.constant 0 : i32
    return %c0_i32, %c0_i32_0 : i32, i32
  }
  func.func @transform_9(%arg0: i32) -> (i32, i32) {
    %c0_i32 = arith.constant 0 : i32
    %c0_i32_0 = arith.constant 0 : i32
    %c0_i32_1 = arith.constant 0 : i32
    return %c0_i32, %c0_i32_0 : i32, i32
  }
  func.func @transform_10(%arg0: i32) -> (i32, i32) {
    %c0_i32 = arith.constant 0 : i32
    %c0_i32_0 = arith.constant 0 : i32
    %c0_i32_1 = arith.constant 0 : i32
    return %c0_i32, %c0_i32_0 : i32, i32
  }
  func.func @transform_11(%arg0: i32) -> (i32, i32) {
    %c0_i32 = arith.constant 0 : i32
    %c0_i32_0 = arith.constant 0 : i32
    %c0_i32_1 = arith.constant 0 : i32
    return %c0_i32, %c0_i32_0 : i32, i32
  }
  func.func @transform_12(%arg0: i32) -> (i32, i32) {
    %c0_i32 = arith.constant 0 : i32
    %c0_i32_0 = arith.constant 0 : i32
    %c0_i32_1 = arith.constant 0 : i32
    return %c0_i32, %c0_i32_0 : i32, i32
  }
  func.func @transform_13(%arg0: i32) -> (i32, i32) {
    %c0_i32 = arith.constant 0 : i32
    %c0_i32_0 = arith.constant 0 : i32
    %c0_i32_1 = arith.constant 0 : i32
    return %c0_i32, %c0_i32_0 : i32, i32
  }
  func.func @transform_14(%arg0: i32) -> (i32, i32) {
    %c0_i32 = arith.constant 0 : i32
    %c0_i32_0 = arith.constant 0 : i32
    %c0_i32_1 = arith.constant 0 : i32
    return %c0_i32, %c0_i32_0 : i32, i32
  }
  func.func @transform_15(%arg0: i32) -> (i32, i32) {
    %c0_i32 = arith.constant 0 : i32
    %c0_i32_0 = arith.constant 0 : i32
    %c0_i32_1 = arith.constant 0 : i32
    return %c0_i32, %c0_i32_0 : i32, i32
  }
  func.func @transform_16(%arg0: i32) -> (i32, i32) {
    %c0_i32 = arith.constant 0 : i32
    %c0_i32_0 = arith.constant 0 : i32
    %c0_i32_1 = arith.constant 0 : i32
    return %c0_i32, %c0_i32_0 : i32, i32
  }
  func.func @transform_17(%arg0: i32) -> (i32, i32) {
    %c0_i32 = arith.constant 0 : i32
    %c0_i32_0 = arith.constant 0 : i32
    %c0_i32_1 = arith.constant 0 : i32
    return %c0_i32, %c0_i32_0 : i32, i32
  }
  func.func @transform_18(%arg0: i32) -> (i32, i32) {
    %c0_i32 = arith.constant 0 : i32
    %c0_i32_0 = arith.constant 0 : i32
    %c0_i32_1 = arith.constant 0 : i32
    return %c0_i32, %c0_i32_0 : i32, i32
  }
  func.func @transform_19(%arg0: i32) -> (i32, i32) {
    %c0_i32 = arith.constant 0 : i32
    %c0_i32_0 = arith.constant 0 : i32
    %c0_i32_1 = arith.constant 0 : i32
    return %c0_i32, %c0_i32_0 : i32, i32
  }
  func.func @transform_20(%arg0: i32) -> (i32, i32) {
    %c0_i32 = arith.constant 0 : i32
    %c0_i32_0 = arith.constant 0 : i32
    %c0_i32_1 = arith.constant 0 : i32
    return %c0_i32, %c0_i32_0 : i32, i32
  }
  func.func @transform_21(%arg0: i32) -> (i32, i32) {
    %c0_i32 = arith.constant 0 : i32
    %c0_i32_0 = arith.constant 0 : i32
    %c0_i32_1 = arith.constant 0 : i32
    return %c0_i32, %c0_i32_0 : i32, i32
  }
  func.func @transform_22(%arg0: i32) -> (i32, i32) {
    %c0_i32 = arith.constant 0 : i32
    %c0_i32_0 = arith.constant 0 : i32
    %c0_i32_1 = arith.constant 0 : i32
    return %c0_i32, %c0_i32_0 : i32, i32
  }
  func.func @transform_23(%arg0: i32) -> (i32, i32) {
    %c0_i32 = arith.constant 0 : i32
    %c0_i32_0 = arith.constant 0 : i32
    %c0_i32_1 = arith.constant 0 : i32
    return %c0_i32, %c0_i32_0 : i32, i32
  }
  func.func @transform_24(%arg0: i32) -> (i32, i32) {
    %c0_i32 = arith.constant 0 : i32
    %c0_i32_0 = arith.constant 0 : i32
    %c0_i32_1 = arith.constant 0 : i32
    return %c0_i32, %c0_i32_0 : i32, i32
  }
  func.func @transform_25(%arg0: i32) -> (i32, i32) {
    %c0_i32 = arith.constant 0 : i32
    %c0_i32_0 = arith.constant 0 : i32
    %c0_i32_1 = arith.constant 0 : i32
    return %c0_i32, %c0_i32_0 : i32, i32
  }
  func.func @transform_26(%arg0: i32) -> (i32, i32) {
    %c0_i32 = arith.constant 0 : i32
    %c0_i32_0 = arith.constant 0 : i32
    %c0_i32_1 = arith.constant 0 : i32
    return %c0_i32, %c0_i32_0 : i32, i32
  }
  func.func @transform_27(%arg0: i32) -> (i32, i32) {
    %c0_i32 = arith.constant 0 : i32
    %c0_i32_0 = arith.constant 0 : i32
    %c0_i32_1 = arith.constant 0 : i32
    return %c0_i32, %c0_i32_0 : i32, i32
  }
  func.func @transform_28(%arg0: i32) -> (i32, i32) {
    %c0_i32 = arith.constant 0 : i32
    %c0_i32_0 = arith.constant 0 : i32
    %c0_i32_1 = arith.constant 0 : i32
    return %c0_i32, %c0_i32_0 : i32, i32
  }
  func.func @transform_29(%arg0: i32) -> (i32, i32) {
    %c0_i32 = arith.constant 0 : i32
    %c0_i32_0 = arith.constant 0 : i32
    %c0_i32_1 = arith.constant 0 : i32
    return %c0_i32, %c0_i32_0 : i32, i32
  }
  func.func @transform_30(%arg0: i32) -> (i32, i32) {
    %c0_i32 = arith.constant 0 : i32
    %c0_i32_0 = arith.constant 0 : i32
    %c0_i32_1 = arith.constant 0 : i32
    return %c0_i32, %c0_i32_0 : i32, i32
  }
  func.func @transform_31(%arg0: i32) -> (i32, i32) {
    %c0_i32 = arith.constant 0 : i32
    %c0_i32_0 = arith.constant 0 : i32
    %c0_i32_1 = arith.constant 0 : i32
    return %c0_i32, %c0_i32_0 : i32, i32
  }
  func.func @transform_32(%arg0: i32) -> (i32, i32) {
    %c0_i32 = arith.constant 0 : i32
    %c0_i32_0 = arith.constant 0 : i32
    %c0_i32_1 = arith.constant 0 : i32
    return %c0_i32, %c0_i32_0 : i32, i32
  }
  func.func @transform_33(%arg0: i32) -> (i32, i32) {
    %c0_i32 = arith.constant 0 : i32
    %c0_i32_0 = arith.constant 0 : i32
    return %arg0, %c0_i32 : i32, i32
  }
  func.func @transform_34(%arg0: i32) -> (i32, i32) {
    %c0_i32 = arith.constant 0 : i32
    %c0_i32_0 = arith.constant 0 : i32
    %c0_i32_1 = arith.constant 0 : i32
    return %c0_i32, %c0_i32_0 : i32, i32
  }
}

</mosaic_0001>

<bundles_post_ra>
// kernel: tpu_custom_call.1
= control target key start
LH: loop header
LB: loop body
LE: loop exit
PB: predicated region body
PF: predicated region fallthrough
CT: control target
= control target key end

     0   :  { %s7995_s6 = smov 1   ;;  %s7996_s10 = smov 2   ;;  %s9620_s0 = inlined_call_operand.smem [shape: u32[35], index: -1, kind: input, shape index: {}] }
   0x1   :  { %s8052_s5 = sld [smem:[%s9620_s0]]   ;;  %s7997_s14 = smov 3  }
   0x2   :  { %s8057_s9 = sld [smem:[%s9620_s0 + %s7995_s6]]   ;;  %s7998_s18 = smov 4  }
   0x3   :  { %s8062_s13 = sld [smem:[%s9620_s0 + %s7996_s10]]   ;;  %s7999_s22 = smov 5  }
   0x4   :  { %s8067_s17 = sld [smem:[%s9620_s0 + %s7997_s14]]   ;;  %s8000_s26 = smov 6  }
   0x5   :  { %s8072_s21 = sld [smem:[%s9620_s0 + %s7998_s18]]   ;;  %s8001_s30 = smov 7  }
   0x6   :  { %s8077_s25 = sld [smem:[%s9620_s0 + %s7999_s22]]   ;;  %s8002_s4 = smov 8  }
   0x7   :  { %9653 = sst [smem:[#allocation15_spill]] %s8052_s5  ;;  %s8003_s10 = smov 9  }
   0x8   :  { %9654 = sst [smem:[#allocation16_spill]] %s8057_s9  ;;  %s8004_s15 = smov 10  }
   0x9   :  { %s8082_s29 = sld [smem:[%s9620_s0 + %s8000_s26]]   ;;  %s8005_s20 = smov 11  }
   0xa   :  { %s8087_s3 = sld [smem:[%s9620_s0 + %s8001_s30]]   ;;  %s8006_s26 = smov 12  }
   0xb   :  { %s8092_s8 = sld [smem:[%s9620_s0 + %s8002_s4]]   ;;  %s8007_s1 = smov 13  }
   0xc   :  { %s8097_s14 = sld [smem:[%s9620_s0 + %s8003_s10]]   ;;  %s8008_s7 = smov 14  }
   0xd   :  { %s8102_s19 = sld [smem:[%s9620_s0 + %s8004_s15]]   ;;  %s8009_s15 = smov 15  }
   0xe   :  { %s8107_s24 = sld [smem:[%s9620_s0 + %s8005_s20]]   ;;  %s8010_s22 = smov 16  }
   0xf   :  { %s8112_s30 = sld [smem:[%s9620_s0 + %s8006_s26]]   ;;  %s8011_s28 = smov 17  }
  0x10   :  { %9655 = sst [smem:[#allocation17_spill]] %s8087_s3 }
  0x11   :  { %9656 = sst [smem:[#allocation18_spill]] %s8092_s8 }
  0x12   :  { %9657 = sst [smem:[#allocation19_spill]] %s8097_s14 }
  0x13   :  { %s8117_s6 = sld [smem:[%s9620_s0 + %s8007_s1]]  }
  0x14   :  { %s8122_s12 = sld [smem:[%s9620_s0 + %s8008_s7]]   ;;  %s8012_s7 = smov 18  }
  0x15   :  { %s8127_s20 = sld [smem:[%s9620_s0 + %s8009_s15]]   ;;  %s8013_s15 = smov 19  }
  0x16   :  { %s8132_s27 = sld [smem:[%s9620_s0 + %s8010_s22]]   ;;  %s8014_s22 = smov 20  }
  0x17   :  { %s8137_s4 = sld [smem:[%s9620_s0 + %s8011_s28]]   ;;  %s8015_s28 = smov 21  }
  0x18   :  { %s8142_s3 = sld [smem:[%s9620_s0 + %s8012_s7]]   ;;  %s8016_s7 = smov 22  }
  0x19   :  { %9658 = sst [smem:[#allocation20_spill]] %s8117_s6 }
  0x1a   :  { %s8147_s14 = sld [smem:[%s9620_s0 + %s8013_s15]]   ;;  %s8017_s15 = smov 23  }
  0x1b   :  { %9659 = sst [smem:[#allocation21_spill]] %s8127_s20 }
  0x1c   :  { %s8152_s8 = sld [smem:[%s9620_s0 + %s8014_s22]]   ;;  %s8018_s22 = smov 24  }
  0x1d   :  { %9660 = sst [smem:[#allocation22_spill]] %s8137_s4 }
  0x1e   :  { %9661 = sst [smem:[#allocation23_spill]] %s8142_s3 }
  0x1f   :  { %s8157_s20 = sld [smem:[%s9620_s0 + %s8015_s28]]   ;;  %s8019_s28 = smov 25  }
  0x20   :  { %9662 = sst [smem:[#allocation24_spill]] %s8147_s14 }
  0x21   :  { %s8162_s3 = sld [smem:[%s9620_s0 + %s8016_s7]]   ;;  %s8020_s7 = smov 26  }
  0x22   :  { %9663 = sst [smem:[#allocation25_spill]] %s8152_s8 }
  0x23   :  { %s8167_s14 = sld [smem:[%s9620_s0 + %s8017_s15]]   ;;  %s8021_s15 = smov 27  }
  0x24   :  { %s8172_s8 = sld [smem:[%s9620_s0 + %s8018_s22]]   ;;  %s8022_s22 = smov 28  }
  0x25   :  { %9664 = sst [smem:[#allocation26_spill]] %s8157_s20 }
  0x26   :  { %s8177_s20 = sld [smem:[%s9620_s0 + %s8019_s28]]   ;;  %s8023_s28 = smov 29  }
  0x27   :  { %9665 = sst [smem:[#allocation27_spill]] %s8162_s3 }
  0x28   :  { %s8182_s3 = sld [smem:[%s9620_s0 + %s8020_s7]]   ;;  %s8024_s7 = smov 30  }
  0x29   :  { %9666 = sst [smem:[#allocation28_spill]] %s8167_s14 }
  0x2a   :  { %9667 = sst [smem:[#allocation29_spill]] %s8172_s8 }
  0x2b   :  { %s8187_s14 = sld [smem:[%s9620_s0 + %s8021_s15]]   ;;  %s8025_s15 = smov 31  }
  0x2c   :  { %9668 = sst [smem:[#allocation30_spill]] %s8177_s20 }
  0x2d   :  { %s8192_s8 = sld [smem:[%s9620_s0 + %s8022_s22]]   ;;  %s8026_s22 = smov 32  }
  0x2e   :  { %9669 = sst [smem:[#allocation31_spill]] %s8182_s3 }
  0x2f   :  { %s8197_s20 = sld [smem:[%s9620_s0 + %s8023_s28]]   ;;  %s8027_s28 = smov 33  }
  0x30   :  { %s8202_s3 = sld [smem:[%s9620_s0 + %s8024_s7]]   ;;  %s8028_s7 = smov 34  }
  0x31   :  { %9670 = sst [smem:[#allocation32_spill]] %s8187_s14 }
  0x32   :  { %s8207_s14 = sld [smem:[%s9620_s0 + %s8025_s15]]  }
  0x33   :  { %9671 = sst [smem:[#allocation33_spill]] %s8192_s8 }
  0x34   :  { %s8212_s8 = sld [smem:[%s9620_s0 + %s8026_s22]]  }
  0x35   :  { %9672 = sst [smem:[#allocation34_spill]] %s8197_s20 }
  0x36   :  { %9673 = sst [smem:[#allocation35_spill]] %s8202_s3 }
  0x37   :  { %s8217_s20 = sld [smem:[%s9620_s0 + %s8027_s28]]  }
  0x38   :  { %s8222_s3 = sld [smem:[%s9620_s0 + %s8028_s7]]  }
  0x3e   :  { %9674 = sst [smem:[#allocation36_spill]] %s8222_s3 }
  0x3f   :  { %75 = vsyncpa [#allocation8], 0 }
  0x40   :  { %76 = vsyncpa [#allocation10], 0 }
  0x41   :  { %78 = vsyncpa [#allocation10 + $0x1], 0  ;;  %s8224_s15 = smov 0   ;;  %s8226_s16 = smov 0  }
  0x42   :  { %s8228_s18 = smov 0   ;;  %s8230_s22 = smov 0  }
  0x43 LB: > { %s9675_s4 = sld [smem:[#allocation22_spill]]  ;;  %9676 = sst [smem:[#allocation37_spill]] %s7989_s18  ;;  %s7981_s15 = sphi %s8224_s15, %s9752_s15   ;;  %s7993_s22 = sphi %s8230_s22, %s9749_s22   ;;  %s7989_s18 = sphi %s8228_s18, %s9751_s18   ;;  %s7985_s16 = sphi %s8226_s16, %s9753_s16  }
  0x44   : > { %9677 = sst [smem:[#allocation38_spill]] %s7993_s22  ;;  %s8243_s0 = sadd.s32 4294967295, %s7993_s22  }
  0x45   : > { %s9627_s23 = sadd.s32 4294967294, %s7993_s22   ;;  %s8247_s26 = sadd.s32 1, %s7993_s22  }
  0x46   : > { %9678 = sst [smem:[#allocation39_spill]] %s8247_s26  ;;  %s804_s28 = sadd.s32 1, %s7989_s18 }
  0x47   : > { %s801_s1 = ssub.s32 %s7993_s22, %s8247_s26  ;;  %p814_p0 = scmp.ne.s32.totalorder %s7989_s18, %s7985_s16 }
  0x48   : > { %p802_p1 = scmp.eq.s32.totalorder %s801_s1, 0  ;;  %p9652_p2 = scmp.eq.s32.totalorder %s8243_s0, 2 }
  0x49   : > { %p820_p3 = scmp.ne.s32.totalorder %s7985_s16, %s7981_s15  ;;  %p821_p4 = scmp.eq.s32.totalorder %s9627_s23, 2 }
  0x4a   : > { %s8259_s2 = scalar_select %p802_p1, %s7989_s18, %s804_s28  }
  0x4b   : > { %p8263_p5 = por %p9652_p2, %p814_p0  ;;  %p8267_p6 = por %p821_p4, %p820_p3 }
  0x4c   : > { %9679 = sst [smem:[#allocation40_spill]] %s8259_s2  ;;  %p6049_p7 = scmp.ge.s32.totalorder %s7993_s22, 1 }
  0x4d   : > { %s9681_s10 = scalar_select %p8267_p6, 1, 0 }
  0x4e   : > { %p979_p8 = scmp.lt.s32.totalorder %s7993_s22, 4 }
  0x4f   : > { %9682 = sst [smem:[#allocation41_spill]] %s9681_s10 }
  0x50   : > { %p980_p9 = pnand %p6049_p7, %p979_p8 }
  0x52   : > { %983 = sbr.rel (%p980_p9) target bundleno = 3459 (0xd83), region = 148 }
  0x59   : > { %s9683_s5 = sld [smem:[#allocation15_spill]]  ;;  %s9684_s9 = sld [smem:[#allocation16_spill]] }
  0x5a   : > { %s1074_s11 = sand.u32 1, %s7985_s16   ;;  %s6051_s15 = sshll.u32 %s8243_s0, 5 }
  0x5b   : > { %s6050_s28 = sshll.u32 %s1074_s11, 8  ;;  %p1080_p10 = scmp.lt.s32.totalorder %s6051_s15, 95 }
  0x5c   : > { %s6055_s1 = sshll.u32 %s8243_s0, 1  ;;  %s8289_s3 = scalar_lea.vmem [#allocation9], %s6050_s28 }
  0x5d   : > { %s9755_s15 = smov (!%p1080_p10, %s6051_s15), 95  ;;  %p1092_p11 = scmp.lt.s32.totalorder %s6055_s1, 5 }
  0x5e   : > { %s6052_s23 = sshll.u32 %s9755_s15, 3  ;;  %s6057_s2 = sshll.u32 %s9755_s15, 2 }
  0x5f   : > { %s8277_s18 = scalar_lea.vmem %s9683_s5, %s6052_s23  ;;  %s8280_s26 = scalar_lea.vmem %s9684_s9, %s6052_s23 }
  0x60   : > { %s9757_s1 = smov (!%p1092_p11, %s6055_s1), 5  ;;  %s8285_s10 = scalar_lea.vmem %s8067_s17, %s6057_s2 }
  0x61   : > { %s1094_s22 = scalar_lea.vmem %s8062_s13, %s9757_s1  ;;  %p6058_p12 = scmp.ne.s32.totalorder %s8243_s0, 0 }
  0x62   : > { %v1177_v0 = vld [vmem:[%s8082_s29 + $0x8] sm:$0xff] (!%p6058_p12)  ;;  %v1176_v1 = vld [vmem:[%s8082_s29] sm:$0xff] (!%p6058_p12)  ;;  %v1116_v2 = vlaneseq (!%p6058_p12)  ;;  %v8029_v3 = vmov (!%p6058_p12), 0   ;;  %vm1118_vm0 = vcmask (!%p6058_p12), 523264   ;;  %v8030_v4 = vmov (!%p6058_p12), 0.0   ;;  %v1182_v17 = vld [vmem:[%s8082_s29 + $0x30] sm:$0xff] (!%p6058_p12) }
  0x63   : > { %1107 = sbr.rel (%p6058_p12) target bundleno = 582 (0x246), region = 152  ;;  %7830 = vset.pattern.permute.xlu1 (!%p6058_p12), %v8029_v3  ;;  %7829 = vset.pattern.permute.xlu0 (!%p6058_p12), %v8029_v3  ;;  %1108 = vst [vmem:[#allocation2] sm:$0xff] (!%p6058_p12), %v8030_v4  ;;  %1109 = vst [vmem:[#allocation2 + $0x8] sm:$0xff] (!%p6058_p12), %v8030_v4  ;;  %v1232_v7 = vld [vmem:[%s8077_s25] sm:$0xf] (!%p6058_p12)  ;;  %v1181_v8 = vld [vmem:[%s8082_s29 + $0x28] sm:$0xff] (!%p6058_p12) }
  0x64   : > { %1188 = vperm.xlu1 (!%p6058_p12), %7830, %v1177_v0   ;;  %1185 = vperm.xlu0 (!%p6058_p12), %7829, %v1176_v1   ;;  %1110 = vst [vmem:[#allocation2 + $0x10] sm:$0xff] (!%p6058_p12), %v8030_v4  ;;  %1111 = vst [vmem:[#allocation2 + $0x18] sm:$0xff] (!%p6058_p12), %v8030_v4  ;;  %v8302_v5 = vand.u32 (!%p6058_p12), 127, %v1116_v2  ;;  %v1152_v6 = vshrl.u32 (!%p6058_p12), %v1116_v2, 7  ;;  %v1180_v9 = vld [vmem:[%s8082_s29 + $0x20] sm:$0xff] (!%p6058_p12)  ;;  %vm1258_vm1 = vcmask (!%p6058_p12), 1043456  }
  0x65   : > { %1112 = vst [vmem:[#allocation2 + $0x20] sm:$0xff] (!%p6058_p12), %v8030_v4  ;;  %1113 = vst [vmem:[#allocation2 + $0x28] sm:$0xff] (!%p6058_p12), %v8030_v4  ;;  %6859 = vmatprep.subr.msk.mxu0 (!%p6058_p12), %vm1258_vm1, %v1232_v7  ;;  %7639 = vmatprep.subr.msk.mxu1 (!%p6058_p12), %vm1258_vm1, %v1232_v7  ;;  %v1178_v18 = vld [vmem:[%s8082_s29 + $0x10] sm:$0xff] (!%p6058_p12)  ;;  %v1183_v19 = vld [vmem:[%s8082_s29 + $0x38] sm:$0xff] (!%p6058_p12)  ;;  %vm1233_vm2 = vcmask (!%p6058_p12), 31744   ;;  %vm1367_vm11 = vcmask (!%p6058_p12), 64512  }
  0x66   : > { %1114 = vst [vmem:[#allocation2 + $0x30] sm:$0xff] (!%p6058_p12), %v8030_v4  ;;  %1115 = vst [vmem:[#allocation2 + $0x38] sm:$0xff] (!%p6058_p12), %v8030_v4  ;;  %v1153_v10 = vadd.s32 (!%p6058_p12), 8, %v1152_v6  ;;  %v1154_v11 = vadd.s32 (!%p6058_p12), 16, %v1152_v6  ;;  %v1155_v12 = vadd.s32 (!%p6058_p12), 24, %v1152_v6  ;;  %v1156_v13 = vadd.s32 (!%p6058_p12), 32, %v1152_v6  ;;  %6860 = vmatpush3.msk.msra.mxu0 (!%p6058_p12), %vm1258_vm1, %v1232_v7  ;;  %7640 = vmatpush3.msk.msra.mxu1 (!%p6058_p12), %vm1258_vm1, %v1232_v7 }
  0x67   : > { %1119 = vst.msk [vmem:[#allocation5] sm:$0xff] (!%p6058_p12), %vm1118_vm0, %v8302_v5  ;;  %1120 = vst.msk [vmem:[#allocation5 + $0x8] sm:$0xff] (!%p6058_p12), %vm1118_vm0, %v8302_v5  ;;  %v1157_v14 = vadd.s32 (!%p6058_p12), 40, %v1152_v6  ;;  %v1158_v15 = vadd.s32 (!%p6058_p12), 48, %v1152_v6  ;;  %v1159_v16 = vadd.s32 (!%p6058_p12), 56, %v1152_v6  ;;  %v1179_v20 = vld [vmem:[%s8082_s29 + $0x18] sm:$0xff] (!%p6058_p12) }
  0x68   : > { %1121 = vst.msk [vmem:[#allocation5 + $0x10] sm:$0xff] (!%p6058_p12), %vm1118_vm0, %v8302_v5  ;;  %1122 = vst.msk [vmem:[#allocation5 + $0x18] sm:$0xff] (!%p6058_p12), %vm1118_vm0, %v8302_v5  ;;  %1200 = vperm.xlu1 (!%p6058_p12), %7830, %v1181_v8   ;;  %1197 = vperm.xlu0 (!%p6058_p12), %7829, %v1180_v9   ;;  %s8031_s23 = smov (!%p6058_p12), 8   ;;  %v1376_v49 = vld [vmem:[%s8072_s21] sm:$0xff] (!%p6058_p12)  ;;  %v1377_v50 = vld [vmem:[%s8072_s21 + $0x8] sm:$0xff] (!%p6058_p12)  ;;  %vm1428_vm12 = vcmask (!%p6058_p12), 130048  }
  0x69   : > { %1123 = vst.msk [vmem:[#allocation5 + $0x20] sm:$0xff] (!%p6058_p12), %vm1118_vm0, %v8302_v5  ;;  %1124 = vst.msk [vmem:[#allocation5 + $0x28] sm:$0xff] (!%p6058_p12), %vm1118_vm0, %v8302_v5  ;;  %v1380_v57 = vld [vmem:[%s8072_s21 + $0x20] sm:$0xff] (!%p6058_p12)  ;;  %v1381_v58 = vld [vmem:[%s8072_s21 + $0x28] sm:$0xff] (!%p6058_p12) }
  0x6a   : > { %1125 = vst.msk [vmem:[#allocation5 + $0x30] sm:$0xff] %vm1118_vm0, %v8302_v5  ;;  %1126 = vst.msk [vmem:[#allocation5 + $0x38] sm:$0xff] %vm1118_vm0, %v8302_v5  ;;  %v1378_v1 = vld [vmem:[%s8072_s21 + $0x10] sm:$0xff]  ;;  %v1379_v2 = vld [vmem:[%s8072_s21 + $0x18] sm:$0xff] }
  0x6b   : > { %1127 = vst.msk [vmem:[#allocation5 + $0x40] sm:$0xff] %vm1118_vm0, %v8302_v5  ;;  %1128 = vst.msk [vmem:[#allocation5 + $0x48] sm:$0xff] %vm1118_vm0, %v8302_v5  ;;  %v1382_v9 = vld [vmem:[%s8072_s21 + $0x30] sm:$0xff] }
  0x6c   : > { %1129 = vst.msk [vmem:[#allocation5 + $0x50] sm:$0xff] %vm1118_vm0, %v8302_v5  ;;  %1130 = vst.msk [vmem:[#allocation5 + $0x58] sm:$0xff] %vm1118_vm0, %v8302_v5  ;;  %1203 = vperm.xlu1 %7830, %v1182_v17   ;;  %1191 = vperm.xlu0 %7829, %v1178_v18  }
  0x6d   : > { %1131 = vst.msk [vmem:[#allocation5 + $0x60] sm:$0xff] %vm1118_vm0, %v8302_v5  ;;  %1132 = vst.msk [vmem:[#allocation5 + $0x68] sm:$0xff] %vm1118_vm0, %v8302_v5 }
  0x6e   : > { %1133 = vst.msk [vmem:[#allocation5 + $0x70] sm:$0xff] %vm1118_vm0, %v8302_v5  ;;  %1134 = vst.msk [vmem:[#allocation5 + $0x78] sm:$0xff] %vm1118_vm0, %v8302_v5 }
  0x6f   : > { %1135 = vst.msk [vmem:[#allocation5 + $0x80] sm:$0xff] %vm1118_vm0, %v8302_v5  ;;  %1136 = vst.msk [vmem:[#allocation5 + $0x88] sm:$0xff] %vm1118_vm0, %v8302_v5 }
  0x70   : > { %1137 = vst.msk [vmem:[#allocation5 + $0x90] sm:$0xff] %vm1118_vm0, %v8302_v5  ;;  %1138 = vst.msk [vmem:[#allocation5 + $0x98] sm:$0xff] %vm1118_vm0, %v8302_v5  ;;  %1206 = vperm.xlu1 %7830, %v1183_v19   ;;  %1194 = vperm.xlu0 %7829, %v1179_v20  }
  0x71   : > { %1139 = vst.msk [vmem:[#allocation5 + $0xa0] sm:$0xff] %vm1118_vm0, %v8302_v5  ;;  %1140 = vst.msk [vmem:[#allocation5 + $0xa8] sm:$0xff] %vm1118_vm0, %v8302_v5 }
  0x72   : > { %1141 = vst.msk [vmem:[#allocation5 + $0xb0] sm:$0xff] %vm1118_vm0, %v8302_v5  ;;  %1142 = vst.msk [vmem:[#allocation5 + $0xb8] sm:$0xff] %vm1118_vm0, %v8302_v5 }
  0x73   : > { %1143 = vst.msk [vmem:[#allocation5 + $0xc0] sm:$0xff] %vm1118_vm0, %v8302_v5  ;;  %1144 = vst.msk [vmem:[#allocation5 + $0xc8] sm:$0xff] %vm1118_vm0, %v8302_v5 }
  0x74   : > { %1145 = vst.msk [vmem:[#allocation5 + $0xd0] sm:$0xff] %vm1118_vm0, %v8302_v5  ;;  %1146 = vst.msk [vmem:[#allocation5 + $0xd8] sm:$0xff] %vm1118_vm0, %v8302_v5 }
  0x75   : > { %1147 = vst.msk [vmem:[#allocation5 + $0xe0] sm:$0xff] %vm1118_vm0, %v8302_v5  ;;  %1148 = vst.msk [vmem:[#allocation5 + $0xe8] sm:$0xff] %vm1118_vm0, %v8302_v5 }
  0x76   : > { %1149 = vst.msk [vmem:[#allocation5 + $0xf0] sm:$0xff] %vm1118_vm0, %v8302_v5  ;;  %1150 = vst.msk [vmem:[#allocation5 + $0xf8] sm:$0xff] %vm1118_vm0, %v8302_v5 }
  0x77   : > { %1160 = vst [vmem:[#allocation6] sm:$0xff] %v1152_v6  ;;  %1161 = vst [vmem:[#allocation6 + $0x8] sm:$0xff] %v1152_v6 }
  0x78   : > { %1162 = vst [vmem:[#allocation6 + $0x10] sm:$0xff] %v1153_v10  ;;  %1163 = vst [vmem:[#allocation6 + $0x18] sm:$0xff] %v1153_v10  ;;  %v1383_v10 = vld [vmem:[%s8072_s21 + $0x38] sm:$0xff] }
  0x79   : > { %1164 = vst [vmem:[#allocation6 + $0x20] sm:$0xff] %v1154_v11  ;;  %1165 = vst [vmem:[#allocation6 + $0x28] sm:$0xff] %v1154_v11 }
  0x7a   : > { %1166 = vst [vmem:[#allocation6 + $0x30] sm:$0xff] %v1155_v12  ;;  %1167 = vst [vmem:[#allocation6 + $0x38] sm:$0xff] %v1155_v12 }
  0x7b   : > { %1168 = vst [vmem:[#allocation6 + $0x40] sm:$0xff] %v1156_v13  ;;  %1169 = vst [vmem:[#allocation6 + $0x48] sm:$0xff] %v1156_v13 }
  0x7c   : > { %1170 = vst [vmem:[#allocation6 + $0x50] sm:$0xff] %v1157_v14  ;;  %1171 = vst [vmem:[#allocation6 + $0x58] sm:$0xff] %v1157_v14 }
  0x7d   : > { %1172 = vst [vmem:[#allocation6 + $0x60] sm:$0xff] %v1158_v15  ;;  %1173 = vst [vmem:[#allocation6 + $0x68] sm:$0xff] %v1158_v15 }
  0x7e   : > { %1174 = vst [vmem:[#allocation6 + $0x70] sm:$0xff] %v1159_v16  ;;  %1175 = vst [vmem:[#allocation6 + $0x78] sm:$0xff] %v1159_v16 }
  0xe3   : > { %v1189_v21 = vpop.permute.xlu1 %1188  ;;  %v1186_v22 = vpop.permute.xlu0 %1185 }
  0xe4   : > { %vm1209_vm3 = vcmp.eq.s32.totalorder %v8302_v5, %v1189_v21  ;;  %vm1208_vm4 = vcmp.eq.s32.totalorder %v8302_v5, %v1186_v22 }
  0xe5   : > { %v6060_v23 = vsel %vm1209_vm3, 1.0, %v8030_v4  ;;  %v6059_v24 = vsel %vm1208_vm4, 1.0, %v8030_v4 }
  0xe6   : > { %6861 = vmatprep.mubr.msk.f32.mxu0 %vm1233_vm2, %v6059_v24 }
  0xe7   : > { %v1201_v25 = vpop.permute.xlu1 %1200  ;;  %v1198_v26 = vpop.permute.xlu0 %1197  ;;  %6862 = vmatmul.mubr.msk.f32.vlgmr.msra.gmra.mrb[0].mxu0 %vm1233_vm2, %v6060_v23 }
  0xe8   : > { %vm1213_vm5 = vcmp.eq.s32.totalorder %v8302_v5, %v1201_v25  ;;  %vm1212_vm6 = vcmp.eq.s32.totalorder %v8302_v5, %v1198_v26 }
  0xe9   : > { %v6064_v27 = vsel %vm1213_vm5, 1.0, %v8030_v4  ;;  %v6063_v28 = vsel %vm1212_vm6, 1.0, %v8030_v4 }
  0xea   : > { %6867 = vmatprep.mubr.msk.f32.mxu1 %vm1233_vm2, %v6063_v28 }
  0xeb   : > { %v1204_v29 = vpop.permute.xlu1 %1203  ;;  %v1192_v30 = vpop.permute.xlu0 %1191  ;;  %6868 = vmatmul.mubr.msk.f32.vlgmr.msra.gmra.mrb[0].mxu1 %vm1233_vm2, %v6064_v27 }
  0xec   : > { %vm1214_vm7 = vcmp.eq.s32.totalorder %v8302_v5, %v1204_v29  ;;  %vm1210_vm8 = vcmp.eq.s32.totalorder %v8302_v5, %v1192_v30 }
  0xed   : > { %v6065_v31 = vsel %vm1214_vm7, 1.0, %v8030_v4  ;;  %v6061_v32 = vsel %vm1210_vm8, 1.0, %v8030_v4 }
  0xee   : > { %6864 = vmatprep.mubr.msk.f32.mxu0 %vm1233_vm2, %v6061_v32  ;;  %6870 = vmatprep.mubr.msk.f32.mxu1 %vm1233_vm2, %v6065_v31 }
  0xef   : > { %v1207_v33 = vpop.permute.xlu1 %1206  ;;  %v1195_v34 = vpop.permute.xlu0 %1194 }
  0xf0   : > { %vm1215_vm9 = vcmp.eq.s32.totalorder %v8302_v5, %v1207_v33  ;;  %vm1211_vm10 = vcmp.eq.s32.totalorder %v8302_v5, %v1195_v34 }
  0xf1   : > { %v6066_v35 = vsel %vm1215_vm9, 1.0, %v8030_v4  ;;  %v6062_v36 = vsel %vm1211_vm10, 1.0, %v8030_v4 }
  0xf2   : > { %6865 = vmatmul.mubr.msk.f32.gmra.mrb[2].mxu0 %vm1233_vm2, %v6062_v36  ;;  %6871 = vmatmul.mubr.msk.f32.gmra.mrb[2].mxu1 %vm1233_vm2, %v6066_v35 }
 0x1ba   : > { %v6863_v37 = vpop.f32.mrb[0].mxu0 }
 0x1bb   : > { %1369 = vst.msk [vmem:[#allocation3 + $0x8] sm:$0xff] %vm1367_vm11, %v6863_v37  ;;  %v1328_v38 = vpop.f32.mrb[1].mxu0 }
 0x1bc   : > { %v7831_v39 = vpack.i.bf16 %v6863_v37, %v1328_v38  ;;  %1368 = vst.msk [vmem:[#allocation3] sm:$0xff] %vm1367_vm11, %v1328_v38 }
 0x1be   : > { %v6869_v40 = vpop.f32.mrb[0].mxu1  ;;  %7832 = vrot.lane.b32.xlu0 %v7831_v39, %s8031_s23 }
 0x1bf   : > { %1373 = vst.msk [vmem:[#allocation3 + $0x28] sm:$0xff] %vm1367_vm11, %v6869_v40  ;;  %v1348_v41 = vpop.f32.mrb[1].mxu1 }
 0x1c0   : > { %v7841_v42 = vpack.i.bf16 %v6869_v40, %v1348_v41  ;;  %1372 = vst.msk [vmem:[#allocation3 + $0x20] sm:$0xff] %vm1367_vm11, %v1348_v41 }
 0x1c2   : > { %7842 = vrot.lane.b32.xlu0 %v7841_v42, %s8031_s23 }
 0x1c5   : > { %v6866_v43 = vpop.f32.mrb[2].mxu0  ;;  %v6872_v44 = vpop.f32.mrb[2].mxu1 }
 0x1c6   : > { %1371 = vst.msk [vmem:[#allocation3 + $0x18] sm:$0xff] %vm1367_vm11, %v6866_v43  ;;  %1375 = vst.msk [vmem:[#allocation3 + $0x38] sm:$0xff] %vm1367_vm11, %v6872_v44  ;;  %v1338_v45 = vpop.f32.mrb[3].mxu0  ;;  %v1358_v46 = vpop.f32.mrb[3].mxu1 }
 0x1c7   : > { %v7836_v47 = vpack.i.bf16 %v6866_v43, %v1338_v45  ;;  %1370 = vst.msk [vmem:[#allocation3 + $0x10] sm:$0xff] %vm1367_vm11, %v1338_v45  ;;  %v7846_v48 = vpack.i.bf16 %v6872_v44, %v1358_v46  ;;  %1374 = vst.msk [vmem:[#allocation3 + $0x30] sm:$0xff] %vm1367_vm11, %v1358_v46 }
 0x1c9   : > { %7837 = vrot.lane.b32.xlu1 %v7836_v47, %s8031_s23 }
 0x1cd   : > { %7847 = vrot.lane.b32.xlu1 %v7846_v48, %s8031_s23 }
 0x230   : > { %v7833_v51 = vpop.permute.xlu0 %7832 }
 0x231   : > { %v7835_v52 = vunpack.i.h.bf16 %v7833_v51  ;;  %v7834_v53 = vunpack.i.l.bf16 %v7833_v51 }
 0x233   : > { %v1417_v54 = vsel %vm1367_vm11, %v1377_v50, %v7835_v52  ;;  %v1416_v55 = vsel %vm1367_vm11, %v1376_v49, %v7834_v53 }
 0x234   : > { %v1424_v56 = vpack.c.bf16 %v1417_v54, %v1416_v55  ;;  %v7843_v59 = vpop.permute.xlu0 %7842 }
 0x235   : > { %v7845_v60 = vunpack.i.h.bf16 %v7843_v59  ;;  %v7844_v61 = vunpack.i.l.bf16 %v7843_v59 }
 0x236   : > { %1429 = vst.msk [vmem:[#allocation4] sm:$0xff] %vm1428_vm12, %v1424_v56 }
 0x237   : > { %v1421_v62 = vsel %vm1367_vm11, %v1381_v58, %v7845_v60  ;;  %v1420_v63 = vsel %vm1367_vm11, %v1380_v57, %v7844_v61 }
 0x238   : > { %v1426_v0 = vpack.c.bf16 %v1421_v62, %v1420_v63 }
 0x23a   : > { %1431 = vst.msk [vmem:[#allocation4 + $0x10] sm:$0xff] %vm1428_vm12, %v1426_v0 }
 0x23b   : > { %v7838_v3 = vpop.permute.xlu1 %7837 }
 0x23c   : > { %v7840_v4 = vunpack.i.h.bf16 %v7838_v3  ;;  %v7839_v5 = vunpack.i.l.bf16 %v7838_v3 }
 0x23e   : > { %v1419_v6 = vsel %vm1367_vm11, %v1379_v2, %v7840_v4  ;;  %v1418_v7 = vsel %vm1367_vm11, %v1378_v1, %v7839_v5 }
 0x23f   : > { %v1425_v8 = vpack.c.bf16 %v1419_v6, %v1418_v7  ;;  %v7848_v11 = vpop.permute.xlu1 %7847 }
 0x240   : > { %v7850_v12 = vunpack.i.h.bf16 %v7848_v11  ;;  %v7849_v13 = vunpack.i.l.bf16 %v7848_v11 }
 0x241   : > { %1430 = vst.msk [vmem:[#allocation4 + $0x8] sm:$0xff] %vm1428_vm12, %v1425_v8 }
 0x242   : > { %v1423_v14 = vsel %vm1367_vm11, %v1383_v10, %v7850_v12  ;;  %v1422_v15 = vsel %vm1367_vm11, %v1382_v9, %v7849_v13 }
 0x243   : > { %v1427_v16 = vpack.c.bf16 %v1423_v14, %v1422_v15 }
 0x245   : > { %1432 = vst.msk [vmem:[#allocation4 + $0x18] sm:$0xff] %vm1428_vm12, %v1427_v16 }
 0x246 PF: > { %v1459_v17 = vld [vmem:[%s8277_s18 + $0xd0] sm:$0xff]  ;;  %v1457_v18 = vld [vmem:[%s8277_s18 + $0xc0] sm:$0xff]  ;;  %v8032_v19 = vmov 0   ;;  %v1460_v20 = vld [vmem:[%s8277_s18 + $0xd8] sm:$0xff]  ;;  %vm2062_vm1 = vcmask 523264   ;;  %s9699_s6 = sld [smem:[#allocation20_spill]] }
 0x247   : > { %7852 = vset.pattern.permute.xlu1 %v8032_v19  ;;  %7851 = vset.pattern.permute.xlu0 %v8032_v19  ;;  %v1458_v21 = vld [vmem:[%s8277_s18 + $0xc8] sm:$0xff]  ;;  %v1461_v23 = vld [vmem:[%s8277_s18 + $0xe0] sm:$0xff]  ;;  %v1464_v24 = vld [vmem:[%s8277_s18 + $0xf8] sm:$0xff]  ;;  %s9707_s2 = sld [smem:[#allocation23_spill]]  ;;  %p6400_p13 = scmp.ne.s32.totalorder %s8243_s0, 2 }
 0x248   : > { %1641 = vperm.xlu1 %7852, %v1459_v17   ;;  %1635 = vperm.xlu0 %7851, %v1457_v18   ;;  %v1462_v22 = vld [vmem:[%s8277_s18 + $0xe8] sm:$0xff]  ;;  %v1463_v25 = vld [vmem:[%s8277_s18 + $0xf0] sm:$0xff]  ;;  %v1465_v27 = vld [vmem:[%s8280_s26] sm:$0xff]  ;;  %s9720_s15 = sld [smem:[#allocation27_spill]] (!%p6400_p13)  ;;  %s9722_s1 = sld [smem:[#allocation26_spill]] (!%p6400_p13) }
 0x249   : > { %v1466_v26 = vld [vmem:[%s8280_s26 + $0x8] sm:$0xff]  ;;  %v1468_v28 = vld [vmem:[%s8280_s26 + $0x18] sm:$0xff]  ;;  %v1467_v29 = vld [vmem:[%s8280_s26 + $0x10] sm:$0xff]  ;;  %s9723_s23 = sld [smem:[#allocation19_spill]] (!%p6400_p13) }
 0x24a   : > { %v8443_v30 = vld [vmem:[#allocation4] sm:$0xff]  ;;  %v8446_v31 = vld [vmem:[#allocation4 + $0x8] sm:$0xff]  ;;  %v8455_v34 = vld [vmem:[#allocation4 + $0x10] sm:$0xff] }
 0x24b   : > { %7641 = vmatprep.subr.bf16.mxu1 %v8443_v30  ;;  %6873 = vmatprep.subr.bf16.mxu0 %v8443_v30  ;;  %v1470_v32 = vld [vmem:[%s8280_s26 + $0x28] sm:$0xff]  ;;  %v1469_v33 = vld [vmem:[%s8280_s26 + $0x20] sm:$0xff]  ;;  %v1472_v35 = vld [vmem:[%s8280_s26 + $0x38] sm:$0xff] }
 0x24c   : > { %1644 = vperm.xlu1 %7852, %v1460_v20   ;;  %1638 = vperm.xlu0 %7851, %v1458_v21   ;;  %v1471_v36 = vld [vmem:[%s8280_s26 + $0x30] sm:$0xff]  ;;  %v1474_v37 = vld [vmem:[%s8280_s26 + $0x48] sm:$0xff]  ;;  %v1473_v38 = vld [vmem:[%s8280_s26 + $0x40] sm:$0xff] }
 0x24d   : > { %7645 = vmatpush3.bf16.msra.mxu1 %v8443_v30  ;;  %6874 = vmatpush3.bf16.msra.mxu0 %v8443_v30  ;;  %v8465_v39 = vld [vmem:[#allocation4 + $0x18] sm:$0xff]  ;;  %v1475_v41 = vld [vmem:[%s8280_s26 + $0x50] sm:$0xff]  ;;  %v1478_v42 = vld [vmem:[%s8280_s26 + $0x68] sm:$0xff] }
 0x24e   : > { %7642 = vmatprep.subr.bf16.mxu1 %v8446_v31  ;;  %6875 = vmatprep.subr.bf16.mxu0 %v8446_v31  ;;  %v1476_v40 = vld [vmem:[%s8280_s26 + $0x58] sm:$0xff]  ;;  %v1477_v43 = vld [vmem:[%s8280_s26 + $0x60] sm:$0xff]  ;;  %v1479_v45 = vld [vmem:[%s8280_s26 + $0x70] sm:$0xff]  ;;  %s9721_s28 = smov (!%p6400_p13), %s9720_s15 }
 0x24f   : > { %v1480_v44 = vld [vmem:[%s8280_s26 + $0x78] sm:$0xff]  ;;  %v1482_v46 = vld [vmem:[%s8280_s26 + $0x88] sm:$0xff]  ;;  %v1481_v47 = vld [vmem:[%s8280_s26 + $0x80] sm:$0xff] }
 0x250   : > { %1650 = vperm.xlu1 %7852, %v1462_v22   ;;  %1647 = vperm.xlu0 %7851, %v1461_v23   ;;  %v1484_v48 = vld [vmem:[%s8280_s26 + $0x98] sm:$0xff]  ;;  %v1483_v49 = vld [vmem:[%s8280_s26 + $0x90] sm:$0xff]  ;;  %v1486_v50 = vld [vmem:[%s8280_s26 + $0xa8] sm:$0xff] }
 0x251   : > { %7646 = vmatpush3.bf16.msra.mxu1 %v8446_v31  ;;  %6876 = vmatpush3.bf16.msra.mxu0 %v8446_v31  ;;  %v1485_v51 = vld [vmem:[%s8280_s26 + $0xa0] sm:$0xff]  ;;  %v1488_v52 = vld [vmem:[%s8280_s26 + $0xb8] sm:$0xff]  ;;  %v1487_v53 = vld [vmem:[%s8280_s26 + $0xb0] sm:$0xff] }
 0x252   : > { %7643 = vmatprep.subr.bf16.mxu1 %v8455_v34  ;;  %6877 = vmatprep.subr.bf16.mxu0 %v8455_v34  ;;  %v1490_v54 = vld [vmem:[%s8280_s26 + $0xc8] sm:$0xff]  ;;  %v1489_v55 = vld [vmem:[%s8280_s26 + $0xc0] sm:$0xff]  ;;  %v1492_v56 = vld [vmem:[%s8280_s26 + $0xd8] sm:$0xff] }
 0x253   : > { %v1491_v57 = vld [vmem:[%s8280_s26 + $0xd0] sm:$0xff]  ;;  %v1494_v58 = vld [vmem:[%s8280_s26 + $0xe8] sm:$0xff]  ;;  %v1493_v59 = vld [vmem:[%s8280_s26 + $0xe0] sm:$0xff] }
 0x254   : > { %1656 = vperm.xlu1 %7852, %v1464_v24   ;;  %1653 = vperm.xlu0 %7851, %v1463_v25   ;;  %v1496_v60 = vld [vmem:[%s8280_s26 + $0xf8] sm:$0xff]  ;;  %v1495_v61 = vld [vmem:[%s8280_s26 + $0xf0] sm:$0xff]  ;;  %v1434_v62 = vld [vmem:[%s8277_s18 + $0x8] sm:$0xff]  ;;  %s9701_s26 = sld [smem:[#allocation24_spill]] }
 0x255   : > { %7647 = vmatpush3.bf16.msra.mxu1 %v8455_v34  ;;  %6878 = vmatpush3.bf16.msra.mxu0 %v8455_v34  ;;  %v1433_v63 = vld [vmem:[%s8277_s18] sm:$0xff]  ;;  %v1436_v0 = vld [vmem:[%s8277_s18 + $0x18] sm:$0xff]  ;;  %v1435_v1 = vld [vmem:[%s8277_s18 + $0x10] sm:$0xff] }
 0x256   : > { %7644 = vmatprep.subr.bf16.mxu1 %v8465_v39  ;;  %6879 = vmatprep.subr.bf16.mxu0 %v8465_v39  ;;  %v1438_v2 = vld [vmem:[%s8277_s18 + $0x28] sm:$0xff]  ;;  %v1437_v3 = vld [vmem:[%s8277_s18 + $0x20] sm:$0xff]  ;;  %v1440_v4 = vld [vmem:[%s8277_s18 + $0x38] sm:$0xff] }
 0x257   : > { %v1439_v5 = vld [vmem:[%s8277_s18 + $0x30] sm:$0xff]  ;;  %v1442_v6 = vld [vmem:[%s8277_s18 + $0x48] sm:$0xff]  ;;  %v1441_v7 = vld [vmem:[%s8277_s18 + $0x40] sm:$0xff] }
 0x258   : > { %1774 = vperm.xlu1 %7852, %v1466_v26   ;;  %1771 = vperm.xlu0 %7851, %v1465_v27   ;;  %v1444_v8 = vld [vmem:[%s8277_s18 + $0x58] sm:$0xff]  ;;  %v1443_v9 = vld [vmem:[%s8277_s18 + $0x50] sm:$0xff]  ;;  %v1446_v10 = vld [vmem:[%s8277_s18 + $0x68] sm:$0xff] }
 0x259   : > { %7648 = vmatpush3.bf16.msra.mxu1 %v8465_v39  ;;  %6880 = vmatpush3.bf16.msra.mxu0 %v8465_v39  ;;  %v1445_v11 = vld [vmem:[%s8277_s18 + $0x60] sm:$0xff]  ;;  %v1448_v12 = vld [vmem:[%s8277_s18 + $0x78] sm:$0xff]  ;;  %v1447_v13 = vld [vmem:[%s8277_s18 + $0x70] sm:$0xff] }
 0x25a   : > { %6913 = vmatprep.subr.bf16.mxu1 %v8443_v30  ;;  %v1450_v14 = vld [vmem:[%s8277_s18 + $0x88] sm:$0xff]  ;;  %v1449_v15 = vld [vmem:[%s8277_s18 + $0x80] sm:$0xff]  ;;  %v1452_v16 = vld [vmem:[%s8277_s18 + $0x98] sm:$0xff] }
 0x25b   : > { %v1451_v17 = vld [vmem:[%s8277_s18 + $0x90] sm:$0xff]  ;;  %v1454_v18 = vld [vmem:[%s8277_s18 + $0xa8] sm:$0xff]  ;;  %v1453_v19 = vld [vmem:[%s8277_s18 + $0xa0] sm:$0xff] }
 0x25c   : > { %1780 = vperm.xlu1 %7852, %v1468_v28   ;;  %1777 = vperm.xlu0 %7851, %v1467_v29   ;;  %v1456_v20 = vld [vmem:[%s8277_s18 + $0xb8] sm:$0xff]  ;;  %v1455_v21 = vld [vmem:[%s8277_s18 + $0xb0] sm:$0xff]  ;;  %v8522_v24 = vld [vmem:[#allocation5 + $0xc0] sm:$0xff]  ;;  %s9700_s18 = sld [smem:[#allocation21_spill]] }
 0x25d   : > { %v8520_v22 = vld [vmem:[#allocation5 + $0xd0] sm:$0xff]  ;;  %v8524_v26 = vld [vmem:[#allocation5 + $0xd8] sm:$0xff]  ;;  %v8526_v27 = vld [vmem:[#allocation5 + $0xc8] sm:$0xff] }
 0x260   : > { %1786 = vperm.xlu1 %7852, %v1470_v32   ;;  %1783 = vperm.xlu0 %7851, %v1469_v33   ;;  %v8033_v32 = vmov 0.0  }
 0x264   : > { %1792 = vperm.xlu1 %7852, %v1472_v35   ;;  %1789 = vperm.xlu0 %7851, %v1471_v36  }
 0x268   : > { %1798 = vperm.xlu1 %7852, %v1474_v37   ;;  %1795 = vperm.xlu0 %7851, %v1473_v38   ;;  %v8536_v38 = vld [vmem:[#allocation5 + $0xe8] sm:$0xff] }
 0x26c   : > { %1804 = vperm.xlu1 %7852, %v1476_v40   ;;  %1801 = vperm.xlu0 %7851, %v1475_v41   ;;  %v8538_v40 = vld [vmem:[#allocation5 + $0xe0] sm:$0xff] }
 0x270   : > { %1810 = vperm.xlu1 %7852, %v1478_v42   ;;  %1807 = vperm.xlu0 %7851, %v1477_v43  }
 0x274   : > { %1816 = vperm.xlu1 %7852, %v1480_v44   ;;  %1813 = vperm.xlu0 %7851, %v1479_v45  }
 0x278   : > { %1822 = vperm.xlu1 %7852, %v1482_v46   ;;  %1819 = vperm.xlu0 %7851, %v1481_v47   ;;  %v8546_v47 = vld [vmem:[#allocation5 + $0xf8] sm:$0xff] }
 0x27c   : > { %1828 = vperm.xlu1 %7852, %v1484_v48   ;;  %1825 = vperm.xlu0 %7851, %v1483_v49   ;;  %v8548_v48 = vld [vmem:[#allocation5 + $0xf0] sm:$0xff] }
 0x280   : > { %1834 = vperm.xlu1 %7852, %v1486_v50   ;;  %1831 = vperm.xlu0 %7851, %v1485_v51  }
 0x284   : > { %1840 = vperm.xlu1 %7852, %v1488_v52   ;;  %1837 = vperm.xlu0 %7851, %v1487_v53  }
 0x288   : > { %1846 = vperm.xlu1 %7852, %v1490_v54   ;;  %1843 = vperm.xlu0 %7851, %v1489_v55   ;;  %v8557_v54 = vld [vmem:[#allocation5 + $0x8] sm:$0xff]  ;;  %v8559_v55 = vld [vmem:[#allocation5] sm:$0xff] }
 0x28c   : > { %1852 = vperm.xlu1 %7852, %v1492_v56   ;;  %1849 = vperm.xlu0 %7851, %v1491_v57  }
 0x290   : > { %1858 = vperm.xlu1 %7852, %v1494_v58   ;;  %1855 = vperm.xlu0 %7851, %v1493_v59  }
 0x294   : > { %1864 = vperm.xlu1 %7852, %v1496_v60   ;;  %1861 = vperm.xlu0 %7851, %v1495_v61   ;;  %v8568_v60 = vld [vmem:[#allocation5 + $0x18] sm:$0xff]  ;;  %v8570_v61 = vld [vmem:[#allocation5 + $0x10] sm:$0xff] }
 0x298   : > { %1566 = vperm.xlu1 %7852, %v1434_v62   ;;  %1563 = vperm.xlu0 %7851, %v1433_v63  }
 0x29c   : > { %1572 = vperm.xlu1 %7852, %v1436_v0   ;;  %1569 = vperm.xlu0 %7851, %v1435_v1  }
 0x2a0   : > { %1578 = vperm.xlu1 %7852, %v1438_v2   ;;  %1575 = vperm.xlu0 %7851, %v1437_v3   ;;  %v8579_v2 = vld [vmem:[#allocation5 + $0x28] sm:$0xff]  ;;  %v8581_v3 = vld [vmem:[#allocation5 + $0x20] sm:$0xff] }
 0x2a4   : > { %1584 = vperm.xlu1 %7852, %v1440_v4   ;;  %1581 = vperm.xlu0 %7851, %v1439_v5  }
 0x2a8   : > { %1590 = vperm.xlu1 %7852, %v1442_v6   ;;  %1587 = vperm.xlu0 %7851, %v1441_v7  }
 0x2ac   : > { %1596 = vperm.xlu1 %7852, %v1444_v8   ;;  %1593 = vperm.xlu0 %7851, %v1443_v9   ;;  %v8589_v8 = vld [vmem:[#allocation5 + $0x38] sm:$0xff]  ;;  %v8591_v9 = vld [vmem:[#allocation5 + $0x30] sm:$0xff] }
 0x2b0   : > { %1602 = vperm.xlu1 %7852, %v1446_v10   ;;  %1599 = vperm.xlu0 %7851, %v1445_v11  }
 0x2b4   : > { %1608 = vperm.xlu1 %7852, %v1448_v12   ;;  %1605 = vperm.xlu0 %7851, %v1447_v13  }
 0x2b8   : > { %1614 = vperm.xlu1 %7852, %v1450_v14   ;;  %1611 = vperm.xlu0 %7851, %v1449_v15   ;;  %v8598_v14 = vld [vmem:[#allocation5 + $0x48] sm:$0xff]  ;;  %v8600_v15 = vld [vmem:[#allocation5 + $0x40] sm:$0xff] }
 0x2bc   : > { %1620 = vperm.xlu1 %7852, %v1452_v16   ;;  %1617 = vperm.xlu0 %7851, %v1451_v17  }
 0x2c0   : > { %1626 = vperm.xlu1 %7852, %v1454_v18   ;;  %1623 = vperm.xlu0 %7851, %v1453_v19  }
 0x2c4   : > { %1632 = vperm.xlu1 %7852, %v1456_v20   ;;  %1629 = vperm.xlu0 %7851, %v1455_v21   ;;  %v8607_v21 = vld [vmem:[#allocation5 + $0x58] sm:$0xff] }
 0x2c7   : > { %v1642_v23 = vpop.permute.xlu1 %1641  ;;  %v1636_v25 = vpop.permute.xlu0 %1635 }
 0x2c8   : > { %vm1684_vm13 = vcmp.eq.s32.totalorder %v8520_v22, %v1642_v23  ;;  %vm1682_vm14 = vcmp.eq.s32.totalorder %v8522_v24, %v1636_v25  ;;  %v8609_v23 = vld [vmem:[#allocation5 + $0x50] sm:$0xff] }
 0x2c9   : > { %v6102_v33 = vsel %vm1684_vm13, 1.0, %v8033_v32  ;;  %v6100_v35 = vsel %vm1682_vm14, 1.0, %v8033_v32 }
 0x2cb   : > { %v1645_v28 = vpop.permute.xlu1 %1644  ;;  %v1639_v29 = vpop.permute.xlu0 %1638 }
 0x2cc   : > { %vm1685_vm15 = vcmp.eq.s32.totalorder %v8524_v26, %v1645_v28  ;;  %vm1683_vm0 = vcmp.eq.s32.totalorder %v8526_v27, %v1639_v29 }
 0x2cd   : > { %v6103_v36 = vsel %vm1685_vm15, 1.0, %v8033_v32  ;;  %v6101_v37 = vsel %vm1683_vm0, 1.0, %v8033_v32 }
 0x2ce   : > { %v1767_v41 = vpack.c.bf16 %v6103_v36, %v6102_v33  ;;  %v1766_v42 = vpack.c.bf16 %v6101_v37, %v6100_v35  ;;  %v8616_v36 = vld [vmem:[#allocation5 + $0x68] sm:$0xff]  ;;  %v8618_v37 = vld [vmem:[#allocation5 + $0x60] sm:$0xff] }
 0x2cf   : > { %v1651_v43 = vpop.permute.xlu1 %1650  ;;  %v1648_v44 = vpop.permute.xlu0 %1647 }
 0x2d0   : > { %vm1687_vm2 = vcmp.eq.s32.totalorder %v8536_v38, %v1651_v43  ;;  %vm1686_vm3 = vcmp.eq.s32.totalorder %v8538_v40, %v1648_v44  ;;  %6905 = vmatprep.mubr.msk.bf16.mxu1 %vm2062_vm1, %v1766_v42 }
 0x2d1   : > { %v6105_v45 = vsel %vm1687_vm2, 1.0, %v8033_v32  ;;  %v6104_v46 = vsel %vm1686_vm3, 1.0, %v8033_v32  ;;  %6906 = vmatmul.mubr.msk.bf16.vlgmr.msra.gmra.mrb[0].mxu1 %vm2062_vm1, %v1767_v41 }
 0x2d2   : > { %v1768_v49 = vpack.c.bf16 %v6105_v45, %v6104_v46  ;;  %6914 = vmatpush3.bf16.msra.mxu1 %v8443_v30  ;;  %v8625_v46 = vld [vmem:[#allocation5 + $0x78] sm:$0xff] }
 0x2d3   : > { %v1657_v50 = vpop.permute.xlu1 %1656  ;;  %v1654_v51 = vpop.permute.xlu0 %1653  ;;  %6915 = vmatprep.subr.bf16.mxu1 %v8446_v31 }
 0x2d4   : > { %vm1689_vm4 = vcmp.eq.s32.totalorder %v8546_v47, %v1657_v50  ;;  %vm1688_vm5 = vcmp.eq.s32.totalorder %v8548_v48, %v1654_v51  ;;  %6909 = vmatprep.mubr.msk.bf16.mxu1 %vm2062_vm1, %v1768_v49  ;;  %v8627_v49 = vld [vmem:[#allocation5 + $0x70] sm:$0xff] }
 0x2d5   : > { %v6107_v52 = vsel %vm1689_vm4, 1.0, %v8033_v32  ;;  %v6106_v53 = vsel %vm1688_vm5, 1.0, %v8033_v32 }
 0x2d6   : > { %v1769_v56 = vpack.c.bf16 %v6107_v52, %v6106_v53  ;;  %6916 = vmatpush3.bf16.msra.mxu1 %v8446_v31 }
 0x2d7   : > { %v1775_v30 = vpop.permute.xlu1 %1774  ;;  %v1772_v57 = vpop.permute.xlu0 %1771  ;;  %6917 = vmatprep.subr.bf16.mxu1 %v8455_v34 }
 0x2d8   : > { %vm1867_vm6 = vcmp.eq.s32.totalorder %v8557_v54, %v1775_v30  ;;  %vm1866_vm7 = vcmp.eq.s32.totalorder %v8559_v55, %v1772_v57  ;;  %v8634_v30 = vld [vmem:[#allocation5 + $0x88] sm:$0xff]  ;;  %v8636_v57 = vld [vmem:[#allocation5 + $0x80] sm:$0xff] }
 0x2d9   : > { %v6109_v58 = vsel %vm1867_vm6, 1.0, %v8033_v32  ;;  %v6108_v59 = vsel %vm1866_vm7, 1.0, %v8033_v32  ;;  %6910 = vmatmul.mubr.msk.bf16.gmra.mrb[4].mxu1 %vm2062_vm1, %v1769_v56 }
 0x2da   : > { %v1962_v62 = vpack.c.bf16 %v6109_v58, %v6108_v59  ;;  %6918 = vmatpush3.bf16.msra.mxu1 %v8455_v34 }
 0x2db   : > { %v1781_v31 = vpop.permute.xlu1 %1780  ;;  %v1778_v63 = vpop.permute.xlu0 %1777  ;;  %6919 = vmatprep.subr.bf16.mxu1 %v8465_v39 }
 0x2dc   : > { %vm1869_vm8 = vcmp.eq.s32.totalorder %v8568_v60, %v1781_v31  ;;  %vm1868_vm9 = vcmp.eq.s32.totalorder %v8570_v61, %v1778_v63  ;;  %6921 = vmatprep.mubr.msk.bf16.mxu1 %vm2062_vm1, %v1962_v62 }
 0x2dd   : > { %v6111_v0 = vsel %vm1869_vm8, 1.0, %v8033_v32  ;;  %v6110_v1 = vsel %vm1868_vm9, 1.0, %v8033_v32 }
 0x2de   : > { %v1963_v4 = vpack.c.bf16 %v6111_v0, %v6110_v1  ;;  %6920 = vmatpush3.bf16.msra.mxu1 %v8465_v39  ;;  %v8643_v0 = vld [vmem:[#allocation5 + $0x98] sm:$0xff]  ;;  %v8645_v1 = vld [vmem:[#allocation5 + $0x90] sm:$0xff] }
 0x2df   : > { %v1787_v34 = vpop.permute.xlu1 %1786  ;;  %v1784_v5 = vpop.permute.xlu0 %1783 }
 0x2e0   : > { %vm1871_vm10 = vcmp.eq.s32.totalorder %v8579_v2, %v1787_v34  ;;  %vm1870_vm11 = vcmp.eq.s32.totalorder %v8581_v3, %v1784_v5 }
 0x2e1   : > { %v6113_v6 = vsel %vm1871_vm10, 1.0, %v8033_v32  ;;  %v6112_v7 = vsel %vm1870_vm11, 1.0, %v8033_v32  ;;  %6922 = vmatmul.mubr.msk.bf16.vlgmr.msra.gmra.mrb[8].mxu1 %vm2062_vm1, %v1963_v4 }
 0x2e2   : > { %v1964_v10 = vpack.c.bf16 %v6113_v6, %v6112_v7 }
 0x2e3   : > { %v1793_v11 = vpop.permute.xlu1 %1792  ;;  %v1790_v12 = vpop.permute.xlu0 %1789 }
 0x2e4   : > { %vm1873_vm12 = vcmp.eq.s32.totalorder %v8589_v8, %v1793_v11  ;;  %vm1872_vm13 = vcmp.eq.s32.totalorder %v8591_v9, %v1790_v12  ;;  %6925 = vmatprep.mubr.msk.bf16.mxu1 %vm2062_vm1, %v1964_v10  ;;  %v8652_v10 = vld [vmem:[#allocation5 + $0xa8] sm:$0xff]  ;;  %v8654_v11 = vld [vmem:[#allocation5 + $0xa0] sm:$0xff] }
 0x2e5   : > { %v6115_v39 = vsel %vm1873_vm12, 1.0, %v8033_v32  ;;  %v6114_v13 = vsel %vm1872_vm13, 1.0, %v8033_v32 }
 0x2e6   : > { %v1965_v16 = vpack.c.bf16 %v6115_v39, %v6114_v13 }
 0x2e7   : > { %v1799_v17 = vpop.permute.xlu1 %1798  ;;  %v1796_v18 = vpop.permute.xlu0 %1795 }
 0x2e8   : > { %vm1875_vm14 = vcmp.eq.s32.totalorder %v8598_v14, %v1799_v17  ;;  %vm1874_vm15 = vcmp.eq.s32.totalorder %v8600_v15, %v1796_v18  ;;  %v8661_v18 = vld [vmem:[#allocation5 + $0xb8] sm:$0xff] }
 0x2e9   : > { %v6117_v19 = vsel %vm1875_vm14, 1.0, %v8033_v32  ;;  %v6116_v20 = vsel %vm1874_vm15, 1.0, %v8033_v32  ;;  %6926 = vmatmul.mubr.msk.bf16.gmra.mrb[12].mxu1 %vm2062_vm1, %v1965_v16 }
 0x2ea   : > { %v1966_v25 = vpack.c.bf16 %v6117_v19, %v6116_v20  ;;  %v8663_v19 = vld [vmem:[#allocation5 + $0xb0] sm:$0xff] }
 0x2eb   : > { %v1805_v28 = vpop.permute.xlu1 %1804  ;;  %v1802_v29 = vpop.permute.xlu0 %1801 }
 0x2ec   : > { %vm1877_vm0 = vcmp.eq.s32.totalorder %v8607_v21, %v1805_v28  ;;  %vm1876_vm2 = vcmp.eq.s32.totalorder %v8609_v23, %v1802_v29  ;;  %6929 = vmatprep.mubr.msk.bf16.mxu1 %vm2062_vm1, %v1966_v25 }
 0x2ed   : > { %v6119_v33 = vsel %vm1877_vm0, 1.0, %v8033_v32  ;;  %v6118_v35 = vsel %vm1876_vm2, 1.0, %v8033_v32 }
 0x2ee   : > { %v1967_v41 = vpack.c.bf16 %v6119_v33, %v6118_v35 }
 0x2ef   : > { %v1811_v42 = vpop.permute.xlu1 %1810  ;;  %v1808_v43 = vpop.permute.xlu0 %1807 }
 0x2f0   : > { %vm1879_vm3 = vcmp.eq.s32.totalorder %v8616_v36, %v1811_v42  ;;  %vm1878_vm4 = vcmp.eq.s32.totalorder %v8618_v37, %v1808_v43 }
 0x2f1   : > { %v6121_v44 = vsel %vm1879_vm3, 1.0, %v8033_v32  ;;  %v6120_v45 = vsel %vm1878_vm4, 1.0, %v8033_v32  ;;  %6930 = vmatmul.mubr.msk.bf16.gmra.mrb[16].mxu1 %vm2062_vm1, %v1967_v41 }
 0x2f2   : > { %v1968_v50 = vpack.c.bf16 %v6121_v44, %v6120_v45 }
 0x2f3   : > { %v1817_v51 = vpop.permute.xlu1 %1816  ;;  %v1814_v52 = vpop.permute.xlu0 %1813 }
 0x2f4   : > { %vm1881_vm5 = vcmp.eq.s32.totalorder %v8625_v46, %v1817_v51  ;;  %vm1880_vm6 = vcmp.eq.s32.totalorder %v8627_v49, %v1814_v52  ;;  %6933 = vmatprep.mubr.msk.bf16.mxu1 %vm2062_vm1, %v1968_v50 }
 0x2f5   : > { %v6123_v53 = vsel %vm1881_vm5, 1.0, %v8033_v32  ;;  %v6122_v56 = vsel %vm1880_vm6, 1.0, %v8033_v32 }
 0x2f6   : > { %v1969_v58 = vpack.c.bf16 %v6123_v53, %v6122_v56 }
 0x2f7   : > { %v1823_v59 = vpop.permute.xlu1 %1822  ;;  %v1820_v62 = vpop.permute.xlu0 %1819 }
 0x2f8   : > { %vm1883_vm7 = vcmp.eq.s32.totalorder %v8634_v30, %v1823_v59  ;;  %vm1882_vm8 = vcmp.eq.s32.totalorder %v8636_v57, %v1820_v62 }
 0x2f9   : > { %v6125_v31 = vsel %vm1883_vm7, 1.0, %v8033_v32  ;;  %v6124_v63 = vsel %vm1882_vm8, 1.0, %v8033_v32  ;;  %6934 = vmatmul.mubr.msk.bf16.gmra.mrb[20].mxu1 %vm2062_vm1, %v1969_v58 }
 0x2fa   : > { %v1970_v4 = vpack.c.bf16 %v6125_v31, %v6124_v63 }
 0x2fb   : > { %v1829_v34 = vpop.permute.xlu1 %1828  ;;  %v1826_v5 = vpop.permute.xlu0 %1825 }
 0x2fc   : > { %vm1885_vm9 = vcmp.eq.s32.totalorder %v8643_v0, %v1829_v34  ;;  %vm1884_vm10 = vcmp.eq.s32.totalorder %v8645_v1, %v1826_v5  ;;  %6937 = vmatprep.mubr.msk.bf16.mxu1 %vm2062_vm1, %v1970_v4 }
 0x2fd   : > { %v6127_v6 = vsel %vm1885_vm9, 1.0, %v8033_v32  ;;  %v6126_v7 = vsel %vm1884_vm10, 1.0, %v8033_v32 }
 0x2fe   : > { %v1971_v12 = vpack.c.bf16 %v6127_v6, %v6126_v7 }
 0x2ff   : > { %v1835_v39 = vpop.permute.xlu1 %1834  ;;  %v1832_v13 = vpop.permute.xlu0 %1831 }
 0x300   : > { %vm1887_vm11 = vcmp.eq.s32.totalorder %v8652_v10, %v1835_v39  ;;  %vm1886_vm12 = vcmp.eq.s32.totalorder %v8654_v11, %v1832_v13 }
 0x301   : > { %v6129_v16 = vsel %vm1887_vm11, 1.0, %v8033_v32  ;;  %v6128_v17 = vsel %vm1886_vm12, 1.0, %v8033_v32  ;;  %6938 = vmatmul.mubr.msk.bf16.gmra.mrb[24].mxu1 %vm2062_vm1, %v1971_v12 }
 0x302   : > { %v1972_v20 = vpack.c.bf16 %v6129_v16, %v6128_v17 }
 0x303   : > { %v1841_v25 = vpop.permute.xlu1 %1840  ;;  %v1838_v28 = vpop.permute.xlu0 %1837 }
 0x304   : > { %vm1889_vm13 = vcmp.eq.s32.totalorder %v8661_v18, %v1841_v25  ;;  %vm1888_vm14 = vcmp.eq.s32.totalorder %v8663_v19, %v1838_v28  ;;  %6941 = vmatprep.mubr.msk.bf16.mxu1 %vm2062_vm1, %v1972_v20 }
 0x305   : > { %v6131_v29 = vsel %vm1889_vm13, 1.0, %v8033_v32  ;;  %v6130_v33 = vsel %vm1888_vm14, 1.0, %v8033_v32 }
 0x306   : > { %v1973_v35 = vpack.c.bf16 %v6131_v29, %v6130_v33  ;;  %v2483_v29 = vld [vmem:[%s8107_s24] sm:$0xff]  ;;  %v2484_v33 = vld [vmem:[%s8107_s24 + $0x8] sm:$0xff] }
 0x307   : > { %v1847_v41 = vpop.permute.xlu1 %1846  ;;  %v1844_v42 = vpop.permute.xlu0 %1843 }
 0x308   : > { %vm1891_vm15 = vcmp.eq.s32.totalorder %v8526_v27, %v1847_v41  ;;  %vm1890_vm0 = vcmp.eq.s32.totalorder %v8522_v24, %v1844_v42 }
 0x309   : > { %v6133_v43 = vsel %vm1891_vm15, 1.0, %v8033_v32  ;;  %v6132_v44 = vsel %vm1890_vm0, 1.0, %v8033_v32  ;;  %6942 = vmatmul.mubr.msk.bf16.gmra.mrb[28].mxu1 %vm2062_vm1, %v1973_v35 }
 0x30a   : > { %v1974_v45 = vpack.c.bf16 %v6133_v43, %v6132_v44 }
 0x30b   : > { %v1853_v50 = vpop.permute.xlu1 %1852  ;;  %v1850_v51 = vpop.permute.xlu0 %1849 }
 0x30c   : > { %vm1893_vm2 = vcmp.eq.s32.totalorder %v8524_v26, %v1853_v50  ;;  %vm1892_vm3 = vcmp.eq.s32.totalorder %v8520_v22, %v1850_v51  ;;  %6945 = vmatprep.mubr.msk.bf16.mxu1 %vm2062_vm1, %v1974_v45 }
 0x30d   : > { %v6135_v52 = vsel %vm1893_vm2, 1.0, %v8033_v32  ;;  %v6134_v27 = vsel %vm1892_vm3, 1.0, %v8033_v32 }
 0x30e   : > { %v1975_v24 = vpack.c.bf16 %v6135_v52, %v6134_v27 }
 0x30f   : > { %v1859_v53 = vpop.permute.xlu1 %1858  ;;  %v1856_v56 = vpop.permute.xlu0 %1855 }
 0x310   : > { %vm1895_vm4 = vcmp.eq.s32.totalorder %v8536_v38, %v1859_v53  ;;  %vm1894_vm5 = vcmp.eq.s32.totalorder %v8538_v40, %v1856_v56 }
 0x311   : > { %v6137_v58 = vsel %vm1895_vm4, 1.0, %v8033_v32  ;;  %v6136_v59 = vsel %vm1894_vm5, 1.0, %v8033_v32  ;;  %6946 = vmatmul.mubr.msk.bf16.gmra.mrb[32].mxu1 %vm2062_vm1, %v1975_v24 }
 0x312   : > { %v1976_v22 = vpack.c.bf16 %v6137_v58, %v6136_v59 }
 0x313   : > { %v1865_v26 = vpop.permute.xlu1 %1864  ;;  %v1862_v62 = vpop.permute.xlu0 %1861 }
 0x314   : > { %vm1897_vm6 = vcmp.eq.s32.totalorder %v8546_v47, %v1865_v26  ;;  %vm1896_vm7 = vcmp.eq.s32.totalorder %v8548_v48, %v1862_v62  ;;  %6949 = vmatprep.mubr.msk.bf16.mxu1 %vm2062_vm1, %v1976_v22 }
 0x315   : > { %v6139_v31 = vsel %vm1897_vm6, 1.0, %v8033_v32  ;;  %v6138_v38 = vsel %vm1896_vm7, 1.0, %v8033_v32 }
 0x316   : > { %v1977_v40 = vpack.c.bf16 %v6139_v31, %v6138_v38 }
 0x317   : > { %v1567_v63 = vpop.permute.xlu1 %1566  ;;  %v1564_v4 = vpop.permute.xlu0 %1563 }
 0x318   : > { %vm1659_vm8 = vcmp.eq.s32.totalorder %v8557_v54, %v1567_v63  ;;  %vm1658_vm9 = vcmp.eq.s32.totalorder %v8559_v55, %v1564_v4 }
 0x319   : > { %v6077_v34 = vsel %vm1659_vm8, 1.0, %v8033_v32  ;;  %v6076_v5 = vsel %vm1658_vm9, 1.0, %v8033_v32  ;;  %6950 = vmatmul.mubr.msk.bf16.gmra.mrb[36].mxu1 %vm2062_vm1, %v1977_v40 }
 0x31a   : > { %v1754_v47 = vpack.c.bf16 %v6077_v34, %v6076_v5  ;;  %v3128_v34 = vld [vmem:[%s8112_s30] sm:$0xf]  ;;  %v2482_v5 = vld [vmem:[%s8102_s19 + $0x8] sm:$0xff] }
 0x31b   : > { %v1573_v48 = vpop.permute.xlu1 %1572  ;;  %v1570_v6 = vpop.permute.xlu0 %1569 }
 0x31c   : > { %vm1661_vm10 = vcmp.eq.s32.totalorder %v8568_v60, %v1573_v48  ;;  %vm1660_vm11 = vcmp.eq.s32.totalorder %v8570_v61, %v1570_v6  ;;  %6881 = vmatprep.mubr.msk.bf16.mxu0 %vm2062_vm1, %v1754_v47  ;;  %v7853_v48 = vld [vmem:[%s8285_s10] sm:$0xff]   ;;  %v7855_v6 = vld [vmem:[%s8285_s10 + $0x10] sm:$0xff]  }
 0x31d   : > { %v6079_v7 = vsel %vm1661_vm10, 1.0, %v8033_v32  ;;  %v6078_v54 = vsel %vm1660_vm11, 1.0, %v8033_v32 }
 0x31e   : > { %v1755_v55 = vpack.c.bf16 %v6079_v7, %v6078_v54  ;;  %v7856_v7 = vld [vmem:[%s8285_s10 + $0x18] sm:$0xff]   ;;  %v7857_v54 = vld [vmem:[%s8285_s10 + $0x20] sm:$0xff]  }
 0x31f   : > { %v1579_v12 = vpop.permute.xlu1 %1578  ;;  %v1576_v39 = vpop.permute.xlu0 %1575 }
 0x320   : > { %vm1663_vm12 = vcmp.eq.s32.totalorder %v8579_v2, %v1579_v12  ;;  %vm1662_vm13 = vcmp.eq.s32.totalorder %v8581_v3, %v1576_v39  ;;  %6882 = vmatmul.mubr.msk.bf16.vlgmr.msra.gmra.mrb[0].mxu0 %vm2062_vm1, %v1755_v55  ;;  %v7858_v55 = vld [vmem:[%s8285_s10 + $0x28] sm:$0xff]   ;;  %v7859_v12 = vld [vmem:[%s8285_s10 + $0x30] sm:$0xff]   ;;  %v7860_v39 = vld [vmem:[%s8285_s10 + $0x38] sm:$0xff]  }
 0x321   : > { %v6081_v60 = vsel %vm1663_vm12, 1.0, %v8033_v32  ;;  %v6080_v61 = vsel %vm1662_vm13, 1.0, %v8033_v32 }
 0x322   : > { %v1756_v13 = vpack.c.bf16 %v6081_v60, %v6080_v61  ;;  %v7861_v60 = vld [vmem:[%s8285_s10 + $0x40] sm:$0xff]   ;;  %v7862_v61 = vld [vmem:[%s8285_s10 + $0x48] sm:$0xff]  }
 0x323   : > { %v1585_v16 = vpop.permute.xlu1 %1584  ;;  %v1582_v17 = vpop.permute.xlu0 %1581 }
 0x324   : > { %vm1665_vm14 = vcmp.eq.s32.totalorder %v8589_v8, %v1585_v16  ;;  %vm1664_vm15 = vcmp.eq.s32.totalorder %v8591_v9, %v1582_v17  ;;  %6885 = vmatprep.mubr.msk.bf16.mxu0 %vm2062_vm1, %v1756_v13  ;;  %v7497_v8 = vpack.c.bf16 %v2484_v33, %v2483_v29  ;;  %v7863_v13 = vld [vmem:[%s8285_s10 + $0x50] sm:$0xff]   ;;  %v7864_v16 = vld [vmem:[%s8285_s10 + $0x58] sm:$0xff]   ;;  %v7865_v17 = vld [vmem:[%s8285_s10 + $0x60] sm:$0xff]  }
 0x325   : > { %v6083_v2 = vsel %vm1665_vm14, 1.0, %v8033_v32  ;;  %v6082_v3 = vsel %vm1664_vm15, 1.0, %v8033_v32  ;;  %v7867_v29 = vld [vmem:[%s8285_s10 + $0x70] sm:$0xff]   ;;  %v7868_v33 = vld [vmem:[%s8285_s10 + $0x78] sm:$0xff]  }
 0x326   : > { %v1757_v20 = vpack.c.bf16 %v6083_v2, %v6082_v3  ;;  %7498 = vmatprep.subr.bf16.mxu0 %v7497_v8  ;;  %v7866_v2 = vld [vmem:[%s8285_s10 + $0x68] sm:$0xff]  }
 0x327   : > { %v1591_v25 = vpop.permute.xlu1 %1590  ;;  %v1588_v28 = vpop.permute.xlu0 %1587  ;;  %7500 = vmatpush3.bf16.msra.mxu0 %v7497_v8 }
 0x328   : > { %vm1667_vm0 = vcmp.eq.s32.totalorder %v8598_v14, %v1591_v25  ;;  %vm1666_vm2 = vcmp.eq.s32.totalorder %v8600_v15, %v1588_v28  ;;  %6886 = vmatmul.mubr.msk.bf16.gmra.mrb[4].mxu0 %vm2062_vm1, %v1757_v20 }
 0x329   : > { %v6085_v9 = vsel %vm1667_vm0, 1.0, %v8033_v32  ;;  %v6084_v35 = vsel %vm1666_vm2, 1.0, %v8033_v32  ;;  %vm3258_vm2 = vcmask 1043456  }
 0x32a   : > { %v1758_v41 = vpack.c.bf16 %v6085_v9, %v6084_v35  ;;  %7729 = vmatprep.subr.msk.bf16.mxu1 %vm3258_vm2, %v3128_v34 }
 0x32b   : > { %v1597_v42 = vpop.permute.xlu1 %1596  ;;  %v1594_v43 = vpop.permute.xlu0 %1593 }
 0x32c   : > { %vm1669_vm3 = vcmp.eq.s32.totalorder %v8607_v21, %v1597_v42  ;;  %vm1668_vm4 = vcmp.eq.s32.totalorder %v8609_v23, %v1594_v43  ;;  %6889 = vmatprep.mubr.msk.bf16.mxu0 %vm2062_vm1, %v1758_v41  ;;  %v3526_v43 = vld [vmem:[%s8122_s12] sm:$0xff] }
 0x32d   : > { %v6087_v14 = vsel %vm1669_vm3, 1.0, %v8033_v32  ;;  %v6086_v15 = vsel %vm1668_vm4, 1.0, %v8033_v32  ;;  %vm3209_vm3 = vcmask 64512   ;;  %vm2485_vm4 = vcmask 130048  }
 0x32e   : > { %v1759_v44 = vpack.c.bf16 %v6087_v14, %v6086_v15  ;;  %7059 = vmatprep.mubr.msk.bf16.mxu1 %vm3209_vm3, %v7853_v48  ;;  %v3527_v14 = vld [vmem:[%s8122_s12 + $0x8] sm:$0xff] }
 0x32f   : > { %v1603_v45 = vpop.permute.xlu1 %1602  ;;  %v1600_v50 = vpop.permute.xlu0 %1599 }
 0x330   : > { %vm1671_vm5 = vcmp.eq.s32.totalorder %v8616_v36, %v1603_v45  ;;  %vm1670_vm6 = vcmp.eq.s32.totalorder %v8618_v37, %v1600_v50  ;;  %6890 = vmatmul.mubr.msk.bf16.gmra.mrb[8].mxu0 %vm2062_vm1, %v1759_v44  ;;  %v7505_v44 = vpack.c.bf16 %v3527_v14, %v3526_v43 }
 0x331   : > { %v6089_v51 = vsel %vm1671_vm5, 1.0, %v8033_v32  ;;  %v6088_v21 = vsel %vm1670_vm6, 1.0, %v8033_v32  ;;  %vm3537_vm5 = vcmask 261120  }
 0x332   : > { %v1760_v23 = vpack.c.bf16 %v6089_v51, %v6088_v21 }
 0x333   : > { %v1609_v52 = vpop.permute.xlu1 %1608  ;;  %v1606_v27 = vpop.permute.xlu0 %1605 }
 0x334   : > { %vm1673_vm7 = vcmp.eq.s32.totalorder %v8625_v46, %v1609_v52  ;;  %vm1672_vm8 = vcmp.eq.s32.totalorder %v8627_v49, %v1606_v27  ;;  %6893 = vmatprep.mubr.msk.bf16.mxu0 %vm2062_vm1, %v1760_v23 }
 0x335   : > { %v6091_v24 = vsel %vm1673_vm7, 1.0, %v8033_v32  ;;  %v6090_v36 = vsel %vm1672_vm8, 1.0, %v8033_v32 }
 0x336   : > { %v1761_v37 = vpack.c.bf16 %v6091_v24, %v6090_v36 }
 0x337   : > { %v1615_v53 = vpop.permute.xlu1 %1614  ;;  %v1612_v56 = vpop.permute.xlu0 %1611 }
 0x338   : > { %vm1675_vm9 = vcmp.eq.s32.totalorder %v8634_v30, %v1615_v53  ;;  %vm1674_vm10 = vcmp.eq.s32.totalorder %v8636_v57, %v1612_v56  ;;  %6894 = vmatmul.mubr.msk.bf16.gmra.mrb[12].mxu0 %vm2062_vm1, %v1761_v37 }
 0x339   : > { %v6093_v58 = vsel %vm1675_vm9, 1.0, %v8033_v32  ;;  %v6092_v46 = vsel %vm1674_vm10, 1.0, %v8033_v32 }
 0x33a   : > { %v1762_v49 = vpack.c.bf16 %v6093_v58, %v6092_v46 }
 0x33b   : > { %v1621_v59 = vpop.permute.xlu1 %1620  ;;  %v1618_v22 = vpop.permute.xlu0 %1617 }
 0x33c   : > { %vm1677_vm11 = vcmp.eq.s32.totalorder %v8643_v0, %v1621_v59  ;;  %vm1676_vm12 = vcmp.eq.s32.totalorder %v8645_v1, %v1618_v22  ;;  %6897 = vmatprep.mubr.msk.bf16.mxu0 %vm2062_vm1, %v1762_v49 }
 0x33d   : > { %v6095_v26 = vsel %vm1677_vm11, 1.0, %v8033_v32  ;;  %v6094_v30 = vsel %vm1676_vm12, 1.0, %v8033_v32 }
 0x33e   : > { %v1763_v57 = vpack.c.bf16 %v6095_v26, %v6094_v30 }
 0x33f   : > { %v1627_v62 = vpop.permute.xlu1 %1626  ;;  %v1624_v31 = vpop.permute.xlu0 %1623 }
 0x340   : > { %vm1679_vm13 = vcmp.eq.s32.totalorder %v8652_v10, %v1627_v62  ;;  %vm1678_vm14 = vcmp.eq.s32.totalorder %v8654_v11, %v1624_v31  ;;  %6898 = vmatmul.mubr.msk.bf16.gmra.mrb[16].mxu0 %vm2062_vm1, %v1763_v57 }
 0x341   : > { %v6097_v0 = vsel %vm1679_vm13, 1.0, %v8033_v32  ;;  %v6096_v1 = vsel %vm1678_vm14, 1.0, %v8033_v32 }
 0x342   : > { %v1764_v38 = vpack.c.bf16 %v6097_v0, %v6096_v1 }
 0x343   : > { %v1633_v40 = vpop.permute.xlu1 %1632  ;;  %v1630_v63 = vpop.permute.xlu0 %1629 }
 0x344   : > { %vm1681_vm15 = vcmp.eq.s32.totalorder %v8661_v18, %v1633_v40  ;;  %vm1680_vm0 = vcmp.eq.s32.totalorder %v8663_v19, %v1630_v63  ;;  %6901 = vmatprep.mubr.msk.bf16.mxu0 %vm2062_vm1, %v1764_v38  ;;  %v2481_v18 = vld [vmem:[%s8102_s19] sm:$0xff]  ;;  %v3260_v19 = vsel %vm3258_vm2, %v3128_v34, 0 }
 0x345   : > { %v6099_v10 = vsel %vm1681_vm15, 1.0, %v8033_v32  ;;  %v6098_v11 = vsel %vm1680_vm0, 1.0, %v8033_v32  ;;  %v7501_v47 = vpack.c.bf16 %v2482_v5, %v2481_v18  ;;  %7058 = vmatpush3.bf16.msra.mxu1 %v3260_v19  ;;  %v7854_v32 = vld [vmem:[%s8285_s10 + $0x8] sm:$0xff]   ;;  %s9717_s10 = sld [smem:[#allocation25_spill]] }
 0x346   : > { %v1765_v4 = vpack.c.bf16 %v6099_v10, %v6098_v11  ;;  %7506 = vmatprep.subr.bf16.mxu1 %v7505_v44 }
 0x347   : > { %7502 = vmatprep.subr.bf16.mxu0 %v7501_v47 }
 0x348   : > { %6902 = vmatmul.mubr.msk.bf16.gmra.mrb[20].mxu0 %vm2062_vm1, %v1765_v4  ;;  %7060 = vmatmul.mubr.msk.bf16.vlgmr.msra.gmra.mrb[40].mxu1 %vm3209_vm3, %v7854_v32 }
 0x349   : > { %7063 = vmatprep.mubr.msk.bf16.mxu1 %vm3209_vm3, %v7855_v6  ;;  %7508 = vmatpush3.bf16.msra.mxu1 %v7505_v44 }
 0x350   : > { %7064 = vmatmul.mubr.msk.bf16.gmra.mrb[44].mxu1 %vm3209_vm3, %v7856_v7 }
 0x351   : > { %7067 = vmatprep.mubr.msk.bf16.mxu1 %vm3209_vm3, %v7857_v54 }
 0x358   : > { %7068 = vmatmul.mubr.msk.bf16.gmra.mrb[48].mxu1 %vm3209_vm3, %v7858_v55 }
 0x359   : > { %7071 = vmatprep.mubr.msk.bf16.mxu1 %vm3209_vm3, %v7859_v12 }
 0x360   : > { %7072 = vmatmul.mubr.msk.bf16.gmra.mrb[52].mxu1 %vm3209_vm3, %v7860_v39 }
 0x361   : > { %7075 = vmatprep.mubr.msk.bf16.mxu1 %vm3209_vm3, %v7861_v60 }
 0x368   : > { %7076 = vmatmul.mubr.msk.bf16.gmra.mrb[56].mxu1 %vm3209_vm3, %v7862_v61 }
 0x369   : > { %7079 = vmatprep.mubr.msk.bf16.mxu1 %vm3209_vm3, %v7863_v13 }
 0x370   : > { %7080 = vmatmul.mubr.msk.bf16.gmra.mrb[60].mxu1 %vm3209_vm3, %v7864_v16 }
 0x371   : > { %7083 = vmatprep.mubr.msk.bf16.mxu1 %vm3209_vm3, %v7865_v17 }
 0x378   : > { %7084 = vmatmul.mubr.msk.bf16.gmra.mrb[64].mxu1 %vm3209_vm3, %v7866_v2 }
 0x379   : > { %7087 = vmatprep.mubr.msk.bf16.mxu1 %vm3209_vm3, %v7867_v29 }
 0x380   : > { %7088 = vmatmul.mubr.msk.bf16.gmra.mrb[68].mxu1 %vm3209_vm3, %v7868_v33 }
 0x3a4   : > { %v8783_v3 = vpop.f32.mrb[0].mxu1 }
 0x3a5   : > { %9685 = vst [vmem:[#allocation42_spill] sm:$0xff] %v8783_v3  ;;  %v8786_v20 = vpop.f32.mrb[1].mxu1 }
 0x3a6   : > { %9686 = vst [vmem:[#allocation43_spill] sm:$0xff] %v8786_v20  ;;  %v8788_v25 = vpop.f32.mrb[2].mxu1 }
 0x3a7   : > { %9687 = vst [vmem:[#allocation44_spill] sm:$0xff] %v8788_v25  ;;  %v8790_v28 = vpop.f32.mrb[3].mxu1 }
 0x3a8   : > { %9688 = vst [vmem:[#allocation45_spill] sm:$0xff] %v8790_v28 }
 0x3ac   : > { %v8795_v8 = vpop.f32.mrb[4].mxu1 }
 0x3ad   : > { %9689 = vst [vmem:[#allocation46_spill] sm:$0xff] %v8795_v8  ;;  %v8798_v9 = vpop.f32.mrb[5].mxu1 }
 0x3ae   : > { %9690 = vst [vmem:[#allocation47_spill] sm:$0xff] %v8798_v9  ;;  %v8800_v35 = vpop.f32.mrb[6].mxu1 }
 0x3af   : > { %9691 = vst [vmem:[#allocation48_spill] sm:$0xff] %v8800_v35  ;;  %v8802_v41 = vpop.f32.mrb[7].mxu1 }
 0x3b0   : > { %9692 = vst [vmem:[#allocation49_spill] sm:$0xff] %v8802_v41 }
 0x3b4   : > { %v6923_v42 = vpop.f32.mrb[8].mxu1 }
 0x3b5   : > { %v2354_v15 = vpop.f32.mrb[9].mxu1 }
 0x3b6   : > { %v6924_v45 = vpop.f32.mrb[10].mxu1  ;;  %6957 = vmatprep.mubr.msk.f32.mxu0 %vm2485_vm4, %v2354_v15 }
 0x3b7   : > { %v2357_v50 = vpop.f32.mrb[11].mxu1 }
 0x3b8   : > { %6958 = vmatmul.mubr.msk.f32.vlgmr.msra.gmra.mrb[24].mxu0 %vm2485_vm4, %v2357_v50 }
 0x3b9   : > { %6960 = vmatprep.mubr.msk.f32.mxu0 %vm2485_vm4, %v6923_v42  ;;  %7504 = vmatpush3.bf16.msra.mxu0 %v7501_v47 }
 0x3bc   : > { %v6927_v51 = vpop.f32.mrb[12].mxu1  ;;  %6961 = vmatmul.mubr.msk.f32.gmra.mrb[26].mxu0 %vm2485_vm4, %v6924_v45 }
 0x3bd   : > { %v2370_v21 = vpop.f32.mrb[13].mxu1 }
 0x3be   : > { %v6928_v23 = vpop.f32.mrb[14].mxu1  ;;  %6963 = vmatprep.mubr.msk.f32.mxu0 %vm2485_vm4, %v2370_v21  ;;  %v3529_v21 = vld [vmem:[%s8122_s12 + $0x18] sm:$0xff] }
 0x3bf   : > { %v2373_v52 = vpop.f32.mrb[15].mxu1 }
 0x3c0   : > { %6964 = vmatmul.mubr.msk.f32.gmra.mrb[28].mxu0 %vm2485_vm4, %v2373_v52 }
 0x3c1   : > { %6966 = vmatprep.mubr.msk.f32.mxu0 %vm2485_vm4, %v6927_v51  ;;  %v3528_v51 = vld [vmem:[%s8122_s12 + $0x10] sm:$0xff] }
 0x3c4   : > { %v6931_v27 = vpop.f32.mrb[16].mxu1  ;;  %6967 = vmatmul.mubr.msk.f32.gmra.mrb[30].mxu0 %vm2485_vm4, %v6928_v23  ;;  %v7509_v23 = vpack.c.bf16 %v3529_v21, %v3528_v51 }
 0x3c5   : > { %v2386_v24 = vpop.f32.mrb[17].mxu1 }
 0x3c6   : > { %v6932_v36 = vpop.f32.mrb[18].mxu1  ;;  %6969 = vmatprep.mubr.msk.f32.mxu0 %vm2485_vm4, %v2386_v24  ;;  %7510 = vmatprep.subr.bf16.mxu1 %v7509_v23 }
 0x3c7   : > { %v2389_v37 = vpop.f32.mrb[19].mxu1  ;;  %7512 = vmatpush3.bf16.msra.mxu1 %v7509_v23 }
 0x3c8   : > { %6970 = vmatmul.mubr.msk.f32.gmra.mrb[32].mxu0 %vm2485_vm4, %v2389_v37 }
 0x3c9   : > { %6972 = vmatprep.mubr.msk.f32.mxu0 %vm2485_vm4, %v6931_v27 }
 0x3cc   : > { %v6935_v53 = vpop.f32.mrb[20].mxu1  ;;  %6973 = vmatmul.mubr.msk.f32.gmra.mrb[34].mxu0 %vm2485_vm4, %v6932_v36 }
 0x3cd   : > { %v2402_v56 = vpop.f32.mrb[21].mxu1 }
 0x3ce   : > { %v6936_v58 = vpop.f32.mrb[22].mxu1  ;;  %6975 = vmatprep.mubr.msk.f32.mxu0 %vm2485_vm4, %v2402_v56 }
 0x3cf   : > { %v2405_v46 = vpop.f32.mrb[23].mxu1 }
 0x3d0   : > { %6976 = vmatmul.mubr.msk.f32.gmra.mrb[36].mxu0 %vm2485_vm4, %v2405_v46 }
 0x3d1   : > { %6978 = vmatprep.mubr.msk.f32.mxu0 %vm2485_vm4, %v6935_v53 }
 0x3d4   : > { %v6939_v49 = vpop.f32.mrb[24].mxu1  ;;  %6979 = vmatmul.mubr.msk.f32.gmra.mrb[38].mxu0 %vm2485_vm4, %v6936_v58 }
 0x3d5   : > { %v2418_v59 = vpop.f32.mrb[25].mxu1 }
 0x3d6   : > { %v6940_v22 = vpop.f32.mrb[26].mxu1  ;;  %6981 = vmatprep.mubr.msk.f32.mxu0 %vm2485_vm4, %v2418_v59 }
 0x3d7   : > { %v2421_v26 = vpop.f32.mrb[27].mxu1 }
 0x3d8   : > { %6982 = vmatmul.mubr.msk.f32.gmra.mrb[40].mxu0 %vm2485_vm4, %v2421_v26 }
 0x3d9   : > { %6984 = vmatprep.mubr.msk.f32.mxu0 %vm2485_vm4, %v6939_v49 }
 0x3dc   : > { %v6943_v30 = vpop.f32.mrb[28].mxu1  ;;  %6985 = vmatmul.mubr.msk.f32.gmra.mrb[42].mxu0 %vm2485_vm4, %v6940_v22 }
 0x3dd   : > { %v2434_v57 = vpop.f32.mrb[29].mxu1 }
 0x3de   : > { %v6944_v62 = vpop.f32.mrb[30].mxu1  ;;  %6987 = vmatprep.mubr.msk.f32.mxu0 %vm2485_vm4, %v2434_v57 }
 0x3df   : > { %v2437_v31 = vpop.f32.mrb[31].mxu1 }
 0x3e0   : > { %6988 = vmatmul.mubr.msk.f32.gmra.mrb[44].mxu0 %vm2485_vm4, %v2437_v31 }
 0x3e1   : > { %6990 = vmatprep.mubr.msk.f32.mxu0 %vm2485_vm4, %v6943_v30 }
 0x3e4   : > { %v6947_v0 = vpop.f32.mrb[32].mxu1  ;;  %6991 = vmatmul.mubr.msk.f32.gmra.mrb[46].mxu0 %vm2485_vm4, %v6944_v62 }
 0x3e5   : > { %v2450_v1 = vpop.f32.mrb[33].mxu1 }
 0x3e6   : > { %v6948_v38 = vpop.f32.mrb[34].mxu1  ;;  %6993 = vmatprep.mubr.msk.f32.mxu0 %vm2485_vm4, %v2450_v1 }
 0x3e7   : > { %v2453_v40 = vpop.f32.mrb[35].mxu1 }
 0x3e8   : > { %6994 = vmatmul.mubr.msk.f32.gmra.mrb[48].mxu0 %vm2485_vm4, %v2453_v40 }
 0x3e9   : > { %6996 = vmatprep.mubr.msk.f32.mxu0 %vm2485_vm4, %v6947_v0 }
 0x3ec   : > { %v6951_v63 = vpop.f32.mrb[36].mxu1  ;;  %6997 = vmatmul.mubr.msk.f32.gmra.mrb[50].mxu0 %vm2485_vm4, %v6948_v38 }
 0x3ed   : > { %v2466_v10 = vpop.f32.mrb[37].mxu1 }
 0x3ee   : > { %v6952_v11 = vpop.f32.mrb[38].mxu1  ;;  %6999 = vmatprep.mubr.msk.f32.mxu0 %vm2485_vm4, %v2466_v10 }
 0x3ef   : > { %v2469_v4 = vpop.f32.mrb[39].mxu1 }
 0x3f0   : > { %7000 = vmatmul.mubr.msk.f32.gmra.mrb[52].mxu0 %vm2485_vm4, %v2469_v4 }
 0x3f1   : > { %7002 = vmatprep.mubr.msk.f32.mxu0 %vm2485_vm4, %v6951_v63 }
 0x3f3   : > { %v8837_v34 = vpop.f32.mrb[0].mxu0 }
 0x3f4   : > { %v8839_v18 = vpop.f32.mrb[1].mxu0  ;;  %7003 = vmatmul.mubr.msk.f32.gmra.mrb[54].mxu0 %vm2485_vm4, %v6952_v11 }
 0x3f5   : > { %v8842_v5 = vpop.f32.mrb[2].mxu0  ;;  %7009 = vmatprep.mubr.msk.f32.mxu0 %vm2485_vm4, %v8839_v18 }
 0x3f6   : > { %v8846_v19 = vpop.f32.mrb[3].mxu0 }
 0x3f8   : > { %7010 = vmatmul.mubr.msk.f32.vlgmr.msra.gmra.mrb[24].mxu0 %vm2485_vm4, %v8846_v19 }
 0x3f9   : > { %7012 = vmatprep.mubr.msk.f32.mxu0 %vm2485_vm4, %v8837_v34 }
 0x3fb   : > { %v8852_v47 = vpop.f32.mrb[4].mxu0 }
 0x3fc   : > { %v8854_v48 = vpop.f32.mrb[5].mxu0  ;;  %7013 = vmatmul.mubr.msk.f32.gmra.mrb[26].mxu0 %vm2485_vm4, %v8842_v5 }
 0x3fd   : > { %v8858_v32 = vpop.f32.mrb[6].mxu0  ;;  %7015 = vmatprep.mubr.msk.f32.mxu0 %vm2485_vm4, %v8854_v48 }
 0x3fe   : > { %v8862_v6 = vpop.f32.mrb[7].mxu0 }
 0x400   : > { %7016 = vmatmul.mubr.msk.f32.gmra.mrb[28].mxu0 %vm2485_vm4, %v8862_v6 }
 0x401   : > { %7018 = vmatprep.mubr.msk.f32.mxu0 %vm2485_vm4, %v8852_v47 }
 0x403   : > { %v8868_v7 = vpop.f32.mrb[8].mxu0 }
 0x404   : > { %v8870_v54 = vpop.f32.mrb[9].mxu0  ;;  %7019 = vmatmul.mubr.msk.f32.gmra.mrb[30].mxu0 %vm2485_vm4, %v8858_v32 }
 0x405   : > { %v8874_v55 = vpop.f32.mrb[10].mxu0  ;;  %7021 = vmatprep.mubr.msk.f32.mxu0 %vm2485_vm4, %v8870_v54 }
 0x406   : > { %v8878_v12 = vpop.f32.mrb[11].mxu0 }
 0x408   : > { %7022 = vmatmul.mubr.msk.f32.gmra.mrb[32].mxu0 %vm2485_vm4, %v8878_v12 }
 0x409   : > { %7024 = vmatprep.mubr.msk.f32.mxu0 %vm2485_vm4, %v8868_v7 }
 0x40b   : > { %v8884_v39 = vpop.f32.mrb[12].mxu0 }
 0x40c   : > { %v8886_v60 = vpop.f32.mrb[13].mxu0  ;;  %7025 = vmatmul.mubr.msk.f32.gmra.mrb[34].mxu0 %vm2485_vm4, %v8874_v55 }
 0x40d   : > { %v8890_v61 = vpop.f32.mrb[14].mxu0  ;;  %7027 = vmatprep.mubr.msk.f32.mxu0 %vm2485_vm4, %v8886_v60 }
 0x40e   : > { %v8894_v13 = vpop.f32.mrb[15].mxu0 }
 0x410   : > { %7028 = vmatmul.mubr.msk.f32.gmra.mrb[36].mxu0 %vm2485_vm4, %v8894_v13 }
 0x411   : > { %7030 = vmatprep.mubr.msk.f32.mxu0 %vm2485_vm4, %v8884_v39 }
 0x413   : > { %v8900_v16 = vpop.f32.mrb[16].mxu0 }
 0x414   : > { %9693 = vst [vmem:[#allocation50_spill] sm:$0xff] %v8900_v16  ;;  %v8902_v17 = vpop.f32.mrb[17].mxu0  ;;  %7031 = vmatmul.mubr.msk.f32.gmra.mrb[38].mxu0 %vm2485_vm4, %v8890_v61 }
 0x415   : > { %v8906_v2 = vpop.f32.mrb[18].mxu0  ;;  %7033 = vmatprep.mubr.msk.f32.mxu0 %vm2485_vm4, %v8902_v17 }
 0x416   : > { %9694 = vst [vmem:[#allocation51_spill] sm:$0xff] %v8906_v2  ;;  %v8910_v29 = vpop.f32.mrb[19].mxu0 }
 0x418   : > { %7034 = vmatmul.mubr.msk.f32.gmra.mrb[40].mxu0 %vm2485_vm4, %v8910_v29 }
 0x419   : > { %7036 = vmatprep.mubr.msk.f32.mxu0 %vm2485_vm4, %v8900_v16  ;;  %v3902_v16 = vld [vmem:[%s9675_s4 + $0x48] sm:$0xff] }
 0x41b   : > { %v8916_v33 = vpop.f32.mrb[20].mxu0  ;;  %v8950_v15 = vpop.f32.mrb[40].mxu1 }
 0x41c   : > { %9695 = vst [vmem:[#allocation52_spill] sm:$0xff] %v8916_v33  ;;  %v8918_v42 = vpop.f32.mrb[21].mxu0  ;;  %7037 = vmatmul.mubr.msk.f32.gmra.mrb[42].mxu0 %vm2485_vm4, %v8906_v2  ;;  %v8952_v44 = vpop.f32.mrb[41].mxu1  ;;  %v3901_v2 = vld [vmem:[%s9675_s4 + $0x40] sm:$0xff] }
 0x41d   : > { %9696 = vst [vmem:[#allocation53_spill] sm:$0xff] %v8918_v42  ;;  %v8922_v43 = vpop.f32.mrb[22].mxu0  ;;  %7039 = vmatprep.mubr.msk.f32.mxu0 %vm2485_vm4, %v8918_v42  ;;  %v8954_v45 = vpop.f32.mrb[42].mxu1 }
 0x41e   : > { %9697 = vst [vmem:[#allocation54_spill] sm:$0xff] %v8922_v43  ;;  %v8926_v14 = vpop.f32.mrb[23].mxu0  ;;  %v8956_v50 = vpop.f32.mrb[43].mxu1 }
 0x41f   : > { %9698 = vst [vmem:[#allocation55_spill] sm:$0xff] %v8926_v14 }
 0x420   : > { %7040 = vmatmul.mubr.msk.f32.gmra.mrb[44].mxu0 %vm2485_vm4, %v8926_v14  ;;  %v3900_v14 = vld [vmem:[%s9675_s4 + $0x38] sm:$0xff] }
 0x421   : > { %7042 = vmatprep.mubr.msk.f32.mxu0 %vm2485_vm4, %v8916_v33  ;;  %v3899_v33 = vld [vmem:[%s9675_s4 + $0x30] sm:$0xff] }
 0x422   : > { %v7525_v42 = vpack.c.bf16 %v3900_v14, %v3899_v33  ;;  %v9031_v33 = vld [vmem:[%s9699_s6] ss:$0 sm:$0xff] }
 0x423   : > { %v8960_v52 = vpop.f32.mrb[44].mxu1 }
 0x424   : > { %7043 = vmatmul.mubr.msk.f32.gmra.mrb[46].mxu0 %vm2485_vm4, %v8922_v43  ;;  %v8962_v27 = vpop.f32.mrb[45].mxu1 }
 0x425   : > { %7045 = vmatprep.mubr.msk.f32.mxu0 %vm2485_vm4, %v8786_v20  ;;  %v8964_v24 = vpop.f32.mrb[46].mxu1  ;;  %v3898_v20 = vld [vmem:[%s9675_s4 + $0x28] sm:$0xff] }
 0x426   : > { %v8966_v36 = vpop.f32.mrb[47].mxu1 }
 0x428   : > { %7046 = vmatmul.mubr.msk.f32.gmra.mrb[48].mxu0 %vm2485_vm4, %v8790_v28  ;;  %v3897_v28 = vld [vmem:[%s9675_s4 + $0x20] sm:$0xff] }
 0x429   : > { %7048 = vmatprep.mubr.msk.f32.mxu0 %vm2485_vm4, %v8783_v3  ;;  %v7521_v43 = vpack.c.bf16 %v3898_v20, %v3897_v28  ;;  %v3906_v20 = vld [vmem:[%s9675_s4 + $0x68] sm:$0xff] }
 0x42b   : > { %v8968_v37 = vpop.f32.mrb[48].mxu1 }
 0x42c   : > { %7049 = vmatmul.mubr.msk.f32.gmra.mrb[50].mxu0 %vm2485_vm4, %v8788_v25  ;;  %v8970_v53 = vpop.f32.mrb[49].mxu1  ;;  %v3896_v25 = vld [vmem:[%s9675_s4 + $0x18] sm:$0xff] }
 0x42d   : > { %7051 = vmatprep.mubr.msk.f32.mxu0 %vm2485_vm4, %v8798_v9  ;;  %v8972_v56 = vpop.f32.mrb[50].mxu1 }
 0x42e   : > { %v8974_v58 = vpop.f32.mrb[51].mxu1 }
 0x430   : > { %7052 = vmatmul.mubr.msk.f32.gmra.mrb[52].mxu0 %vm2485_vm4, %v8802_v41  ;;  %v3895_v41 = vld [vmem:[%s9675_s4 + $0x10] sm:$0xff] }
 0x431   : > { %7054 = vmatprep.mubr.msk.f32.mxu0 %vm2485_vm4, %v8795_v8  ;;  %v3894_v8 = vld [vmem:[%s9675_s4 + $0x8] sm:$0xff]  ;;  %v7517_v3 = vpack.c.bf16 %v3896_v25, %v3895_v41  ;;  %v7529_v25 = vpack.c.bf16 %v3902_v16, %v3901_v2  ;;  %v3905_v41 = vld [vmem:[%s9675_s4 + $0x60] sm:$0xff] }
 0x432   : > { %v7537_v28 = vpack.c.bf16 %v3906_v20, %v3905_v41 }
 0x433   : > { %v8976_v46 = vpop.f32.mrb[52].mxu1 }
 0x434   : > { %7055 = vmatmul.mubr.msk.f32.gmra.mrb[54].mxu0 %vm2485_vm4, %v8800_v35  ;;  %v8978_v49 = vpop.f32.mrb[53].mxu1  ;;  %v3893_v35 = vld [vmem:[%s9675_s4] sm:$0xff] }
 0x435   : > { %v8980_v59 = vpop.f32.mrb[54].mxu1  ;;  %v7513_v9 = vpack.c.bf16 %v3894_v8, %v3893_v35  ;;  %v3903_v8 = vld [vmem:[%s9675_s4 + $0x50] sm:$0xff]  ;;  %v3904_v35 = vld [vmem:[%s9675_s4 + $0x58] sm:$0xff] }
 0x436   : > { %v8982_v22 = vpop.f32.mrb[55].mxu1 }
 0x437   : > { %7514 = vmatprep.subr.bf16.mxu0 %v7513_v9 }
 0x438   : > { %7516 = vmatpush3.bf16.msra.mxu0 %v7513_v9  ;;  %v7533_v9 = vpack.c.bf16 %v3904_v35, %v3903_v8 }
 0x439   : > { %7518 = vmatprep.subr.bf16.mxu0 %v7517_v3 }
 0x43b   : > { %v8984_v26 = vpop.f32.mrb[56].mxu1 }
 0x43c   : > { %v8986_v30 = vpop.f32.mrb[57].mxu1  ;;  %7520 = vmatpush3.bf16.msra.mxu0 %v7517_v3 }
 0x43d   : > { %v8988_v57 = vpop.f32.mrb[58].mxu1  ;;  %7522 = vmatprep.subr.bf16.mxu0 %v7521_v43 }
 0x43e   : > { %v8990_v62 = vpop.f32.mrb[59].mxu1 }
 0x440   : > { %7524 = vmatpush3.bf16.msra.mxu0 %v7521_v43 }
 0x441   : > { %7526 = vmatprep.subr.bf16.mxu0 %v7525_v42 }
 0x443   : > { %v8992_v31 = vpop.f32.mrb[60].mxu1 }
 0x444   : > { %v8994_v0 = vpop.f32.mrb[61].mxu1  ;;  %7528 = vmatpush3.bf16.msra.mxu0 %v7525_v42 }
 0x445   : > { %v8996_v1 = vpop.f32.mrb[62].mxu1  ;;  %7530 = vmatprep.subr.bf16.mxu0 %v7529_v25 }
 0x446   : > { %v8998_v38 = vpop.f32.mrb[63].mxu1 }
 0x448   : > { %7532 = vmatpush3.bf16.msra.mxu0 %v7529_v25 }
 0x449   : > { %7534 = vmatprep.subr.bf16.mxu0 %v7533_v9 }
 0x44b   : > { %v9000_v40 = vpop.f32.mrb[64].mxu1 }
 0x44c   : > { %v9002_v63 = vpop.f32.mrb[65].mxu1  ;;  %7536 = vmatpush3.bf16.msra.mxu0 %v7533_v9 }
 0x44d   : > { %v9004_v10 = vpop.f32.mrb[66].mxu1  ;;  %7538 = vmatprep.subr.bf16.mxu0 %v7537_v28 }
 0x44e   : > { %v9006_v11 = vpop.f32.mrb[67].mxu1 }
 0x450   : > { %7540 = vmatpush3.bf16.msra.mxu0 %v7537_v28 }
 0x453   : > { %v9008_v4 = vpop.f32.mrb[68].mxu1 }
 0x454   : > { %v9010_v51 = vpop.f32.mrb[69].mxu1 }
 0x455   : > { %v9012_v21 = vpop.f32.mrb[70].mxu1 }
 0x456   : > { %v9014_v23 = vpop.f32.mrb[71].mxu1 }
 0x4cb   : > { %v7011_v3 = vpop.f32.mrb[24].mxu0 }
 0x4cc   : > { %v3424_v43 = vadd.f32 %v7011_v3, %v8956_v50  ;;  %v2969_v14 = vpop.f32.mrb[25].mxu0 }
 0x4cd   : > { %v3423_v16 = vadd.f32 %v8952_v44, %v2969_v14 }
 0x4ce   : > { %v3463_v2 = vadd.f32 %v9031_v33, %v3424_v43 }
 0x4cf   : > { %v3462_v42 = vadd.f32 %v9031_v33, %v3423_v16  ;;  %v7014_v8 = vpop.f32.mrb[26].mxu0 }
 0x4d0   : > { %v3426_v25 = vadd.f32 %v8954_v45, %v7014_v8  ;;  %v2979_v35 = vpop.f32.mrb[27].mxu0  ;;  %v3495_v20 = vmax.f32 %v3463_v2, 0.0 }
 0x4d1   : > { %v3494_v9 = vmax.f32 %v3462_v42, 0.0  ;;  %v3425_v41 = vadd.f32 %v8950_v15, %v2979_v35 }
 0x4d2   : > { %v3465_v28 = vadd.f32 %v9031_v33, %v3426_v25 }
 0x4d3   : > { %v3464_v50 = vadd.f32 %v9031_v33, %v3425_v41  ;;  %v7017_v3 = vpop.f32.mrb[28].mxu0  ;;  %7099 = vmatprep.mubr.msk.f32.mxu1 %vm3537_vm5, %v3494_v9 }
 0x4d4   : > { %v3428_v44 = vadd.f32 %v7017_v3, %v8966_v36  ;;  %v2989_v43 = vpop.f32.mrb[29].mxu0  ;;  %7100 = vmatmul.mubr.msk.f32.vlgmr.msra.gmra.mrb[72].mxu1 %vm3537_vm5, %v3495_v20  ;;  %v3497_v16 = vmax.f32 %v3465_v28, 0.0 }
 0x4d5   : > { %v3496_v14 = vmax.f32 %v3464_v50, 0.0  ;;  %v3427_v45 = vadd.f32 %v8962_v27, %v2989_v43 }
 0x4d6   : > { %v3467_v42 = vadd.f32 %v9031_v33, %v3428_v44 }
 0x4d7   : > { %v3466_v15 = vadd.f32 %v9031_v33, %v3427_v45  ;;  %v7020_v2 = vpop.f32.mrb[30].mxu0  ;;  %7102 = vmatprep.mubr.msk.f32.mxu1 %vm3537_vm5, %v3496_v14 }
 0x4d8   : > { %v3430_v8 = vadd.f32 %v8964_v24, %v7020_v2  ;;  %v2999_v25 = vpop.f32.mrb[31].mxu0  ;;  %7103 = vmatmul.mubr.msk.f32.gmra.mrb[74].mxu1 %vm3537_vm5, %v3497_v16  ;;  %v3499_v9 = vmax.f32 %v3467_v42, 0.0 }
 0x4d9   : > { %v3498_v36 = vmax.f32 %v3466_v15, 0.0  ;;  %v3429_v35 = vadd.f32 %v8960_v52, %v2999_v25 }
 0x4da   : > { %v3469_v41 = vadd.f32 %v9031_v33, %v3430_v8 }
 0x4db   : > { %v3468_v27 = vadd.f32 %v9031_v33, %v3429_v35  ;;  %v7023_v20 = vpop.f32.mrb[32].mxu0  ;;  %7105 = vmatprep.mubr.msk.f32.mxu1 %vm3537_vm5, %v3498_v36 }
 0x4dc   : > { %v3432_v28 = vadd.f32 %v7023_v20, %v8974_v58  ;;  %v3009_v50 = vpop.f32.mrb[33].mxu0  ;;  %7106 = vmatmul.mubr.msk.f32.gmra.mrb[76].mxu1 %vm3537_vm5, %v3499_v9  ;;  %v3501_v44 = vmax.f32 %v3469_v41, 0.0 }
 0x4dd   : > { %v3500_v24 = vmax.f32 %v3468_v27, 0.0  ;;  %v3431_v3 = vadd.f32 %v8970_v53, %v3009_v50 }
 0x4de   : > { %v3471_v43 = vadd.f32 %v9031_v33, %v3432_v28 }
 0x4df   : > { %v3470_v52 = vadd.f32 %v9031_v33, %v3431_v3  ;;  %v7026_v14 = vpop.f32.mrb[34].mxu0  ;;  %7108 = vmatprep.mubr.msk.f32.mxu1 %vm3537_vm5, %v3500_v24 }
 0x4e0   : > { %v3434_v45 = vadd.f32 %v8972_v56, %v7026_v14  ;;  %v3019_v16 = vpop.f32.mrb[35].mxu0  ;;  %7109 = vmatmul.mubr.msk.f32.gmra.mrb[78].mxu1 %vm3537_vm5, %v3501_v44  ;;  %v3503_v15 = vmax.f32 %v3471_v43, 0.0 }
 0x4e1   : > { %v3502_v58 = vmax.f32 %v3470_v52, 0.0  ;;  %v3433_v42 = vadd.f32 %v8968_v37, %v3019_v16 }
 0x4e2   : > { %v3473_v2 = vadd.f32 %v9031_v33, %v3434_v45 }
 0x4e3   : > { %v3472_v53 = vadd.f32 %v9031_v33, %v3433_v42  ;;  %v7029_v8 = vpop.f32.mrb[36].mxu0  ;;  %7111 = vmatprep.mubr.msk.f32.mxu1 %vm3537_vm5, %v3502_v58 }
 0x4e4   : > { %v3436_v25 = vadd.f32 %v7029_v8, %v8982_v22  ;;  %v3029_v36 = vpop.f32.mrb[37].mxu0  ;;  %7112 = vmatmul.mubr.msk.f32.gmra.mrb[80].mxu1 %vm3537_vm5, %v3503_v15  ;;  %v3505_v9 = vmax.f32 %v3473_v2, 0.0 }
 0x4e5   : > { %v3504_v56 = vmax.f32 %v3472_v53, 0.0  ;;  %v3435_v35 = vadd.f32 %v8978_v49, %v3029_v36 }
 0x4e6   : > { %v3475_v41 = vadd.f32 %v9031_v33, %v3436_v25 }
 0x4e7   : > { %v3474_v37 = vadd.f32 %v9031_v33, %v3435_v35  ;;  %v7032_v27 = vpop.f32.mrb[38].mxu0  ;;  %7114 = vmatprep.mubr.msk.f32.mxu1 %vm3537_vm5, %v3504_v56 }
 0x4e8   : > { %v3438_v20 = vadd.f32 %v8980_v59, %v7032_v27  ;;  %v3039_v28 = vpop.f32.mrb[39].mxu0  ;;  %7115 = vmatmul.mubr.msk.f32.gmra.mrb[82].mxu1 %vm3537_vm5, %v3505_v9  ;;  %v3507_v24 = vmax.f32 %v3475_v41, 0.0 }
 0x4e9   : > { %v3506_v22 = vmax.f32 %v3474_v37, 0.0  ;;  %v3437_v50 = vadd.f32 %v8976_v46, %v3039_v28 }
 0x4ea   : > { %v3477_v3 = vadd.f32 %v9031_v33, %v3438_v20 }
 0x4eb   : > { %v3476_v49 = vadd.f32 %v9031_v33, %v3437_v50  ;;  %v7035_v44 = vpop.f32.mrb[40].mxu0  ;;  %7117 = vmatprep.mubr.msk.f32.mxu1 %vm3537_vm5, %v3506_v22 }
 0x4ec   : > { %v3440_v43 = vadd.f32 %v7035_v44, %v8990_v62  ;;  %v3049_v52 = vpop.f32.mrb[41].mxu0  ;;  %7118 = vmatmul.mubr.msk.f32.gmra.mrb[84].mxu1 %vm3537_vm5, %v3507_v24  ;;  %v3509_v45 = vmax.f32 %v3477_v3, 0.0 }
 0x4ed   : > { %v3508_v59 = vmax.f32 %v3476_v49, 0.0  ;;  %v3439_v14 = vadd.f32 %v8986_v30, %v3049_v52 }
 0x4ee   : > { %v3479_v16 = vadd.f32 %v9031_v33, %v3440_v43 }
 0x4ef   : > { %v3478_v46 = vadd.f32 %v9031_v33, %v3439_v14  ;;  %v7038_v58 = vpop.f32.mrb[42].mxu0  ;;  %7120 = vmatprep.mubr.msk.f32.mxu1 %vm3537_vm5, %v3508_v59 }
 0x4f0   : > { %v3442_v42 = vadd.f32 %v8988_v57, %v7038_v58  ;;  %v3059_v15 = vpop.f32.mrb[43].mxu0  ;;  %7121 = vmatmul.mubr.msk.f32.gmra.mrb[86].mxu1 %vm3537_vm5, %v3509_v45  ;;  %v3511_v53 = vmax.f32 %v3479_v16, 0.0 }
 0x4f1   : > { %v3510_v62 = vmax.f32 %v3478_v46, 0.0  ;;  %v3441_v2 = vadd.f32 %v8984_v26, %v3059_v15 }
 0x4f2   : > { %v3481_v8 = vadd.f32 %v9031_v33, %v3442_v42 }
 0x4f3   : > { %v3480_v30 = vadd.f32 %v9031_v33, %v3441_v2  ;;  %v7041_v25 = vpop.f32.mrb[44].mxu0  ;;  %7123 = vmatprep.mubr.msk.f32.mxu1 %vm3537_vm5, %v3510_v62 }
 0x4f4   : > { %v3444_v36 = vadd.f32 %v7041_v25, %v8998_v38  ;;  %v3069_v56 = vpop.f32.mrb[45].mxu0  ;;  %7124 = vmatmul.mubr.msk.f32.gmra.mrb[88].mxu1 %vm3537_vm5, %v3511_v53  ;;  %v3513_v9 = vmax.f32 %v3481_v8, 0.0 }
 0x4f5   : > { %v3512_v57 = vmax.f32 %v3480_v30, 0.0  ;;  %v3443_v35 = vadd.f32 %v8994_v0, %v3069_v56 }
 0x4f6   : > { %v3483_v41 = vadd.f32 %v9031_v33, %v3444_v36 }
 0x4f7   : > { %v3482_v26 = vadd.f32 %v9031_v33, %v3443_v35  ;;  %v7044_v37 = vpop.f32.mrb[46].mxu0  ;;  %7126 = vmatprep.mubr.msk.f32.mxu1 %vm3537_vm5, %v3512_v57 }
 0x4f8   : > { %v3446_v27 = vadd.f32 %v8996_v1, %v7044_v37  ;;  %v3079_v20 = vpop.f32.mrb[47].mxu0  ;;  %7127 = vmatmul.mubr.msk.f32.gmra.mrb[90].mxu1 %vm3537_vm5, %v3513_v9  ;;  %v3515_v22 = vmax.f32 %v3483_v41, 0.0  ;;  %v3908_v41 = vld [vmem:[%s9675_s4 + $0x78] sm:$0xff]  ;;  %v3892_v37 = vld [vmem:[%s8132_s27 + $0x8] sm:$0xff] }
 0x4f9   : > { %v3514_v38 = vmax.f32 %v3482_v26, 0.0  ;;  %v3445_v28 = vadd.f32 %v8992_v31, %v3079_v20  ;;  %v9134_v20 = vld [vmem:[%s9700_s18] ss:$0 sm:$0xff]  ;;  %s9724_s18 = sld [smem:[#allocation28_spill]] (!%p6400_p13) }
 0x4fa   : > { %v3485_v50 = vadd.f32 %v9031_v33, %v3446_v27 }
 0x4fb   : > { %v3484_v0 = vadd.f32 %v9031_v33, %v3445_v28  ;;  %v7047_v24 = vpop.f32.mrb[48].mxu0  ;;  %7129 = vmatprep.mubr.msk.f32.mxu1 %vm3537_vm5, %v3514_v38 }
 0x4fc   : > { %v3448_v3 = vadd.f32 %v7047_v24, %v9006_v11  ;;  %v3089_v49 = vpop.f32.mrb[49].mxu0  ;;  %7130 = vmatmul.mubr.msk.f32.gmra.mrb[92].mxu1 %vm3537_vm5, %v3515_v22  ;;  %v3517_v43 = vmax.f32 %v3485_v50, 0.0  ;;  %v4430_v50 = vld [vmem:[%s9701_s26] sm:$0xff] }
 0x4fd   : > { %v3516_v1 = vmax.f32 %v3484_v0, 0.0  ;;  %v3447_v44 = vadd.f32 %v9002_v63, %v3089_v49  ;;  %v4431_v0 = vld [vmem:[%s9701_s26 + $0x8] sm:$0xff] }
 0x4fe   : > { %v3487_v52 = vadd.f32 %v9031_v33, %v3448_v3  ;;  %v7549_v3 = vpack.c.bf16 %v4431_v0, %v4430_v50 }
 0x4ff   : > { %v3486_v31 = vadd.f32 %v9031_v33, %v3447_v44  ;;  %v7050_v59 = vpop.f32.mrb[50].mxu0  ;;  %7132 = vmatprep.mubr.msk.f32.mxu1 %vm3537_vm5, %v3516_v1 }
 0x500   : > { %v3450_v14 = vadd.f32 %v9004_v10, %v7050_v59  ;;  %v3099_v45 = vpop.f32.mrb[51].mxu0  ;;  %7133 = vmatmul.mubr.msk.f32.gmra.mrb[94].mxu1 %vm3537_vm5, %v3517_v43  ;;  %v3519_v46 = vmax.f32 %v3487_v52, 0.0  ;;  %7550 = vmatprep.subr.bf16.mxu1 %v7549_v3 }
 0x501   : > { %v3518_v11 = vmax.f32 %v3486_v31, 0.0  ;;  %v3449_v16 = vadd.f32 %v9000_v40, %v3099_v45  ;;  %7552 = vmatpush3.bf16.msra.mxu1 %v7549_v3 }
 0x502   : > { %v3489_v58 = vadd.f32 %v9031_v33, %v3450_v14 }
 0x503   : > { %v3488_v63 = vadd.f32 %v9031_v33, %v3449_v16  ;;  %v7053_v42 = vpop.f32.mrb[52].mxu0  ;;  %7135 = vmatprep.mubr.msk.f32.mxu1 %vm3537_vm5, %v3518_v11 }
 0x504   : > { %v3452_v15 = vadd.f32 %v7053_v42, %v9014_v23  ;;  %v3109_v62 = vpop.f32.mrb[53].mxu0  ;;  %7136 = vmatmul.mubr.msk.f32.gmra.mrb[96].mxu1 %vm3537_vm5, %v3519_v46  ;;  %v3521_v53 = vmax.f32 %v3489_v58, 0.0 }
 0x505   : > { %v3520_v10 = vmax.f32 %v3488_v63, 0.0  ;;  %v3451_v2 = vadd.f32 %v9010_v51, %v3109_v62 }
 0x506   : > { %v3491_v8 = vadd.f32 %v9031_v33, %v3452_v15 }
 0x507   : > { %v3490_v40 = vadd.f32 %v9031_v33, %v3451_v2  ;;  %v7056_v30 = vpop.f32.mrb[54].mxu0  ;;  %7138 = vmatprep.mubr.msk.f32.mxu1 %vm3537_vm5, %v3520_v10 }
 0x508   : > { %v3454_v25 = vadd.f32 %v9012_v21, %v7056_v30  ;;  %v3119_v36 = vpop.f32.mrb[55].mxu0  ;;  %7139 = vmatmul.mubr.msk.f32.gmra.mrb[98].mxu1 %vm3537_vm5, %v3521_v53  ;;  %v3523_v51 = vmax.f32 %v3491_v8, 0.0 }
 0x509   : > { %v3522_v23 = vmax.f32 %v3490_v40, 0.0  ;;  %v3453_v56 = vadd.f32 %v9008_v4, %v3119_v36  ;;  %v3907_v4 = vld [vmem:[%s9675_s4 + $0x70] sm:$0xff] }
 0x50a   : > { %v3493_v57 = vadd.f32 %v9031_v33, %v3454_v25  ;;  %v7541_v26 = vpack.c.bf16 %v3908_v41, %v3907_v4 }
 0x50b   : > { %v3492_v35 = vadd.f32 %v9031_v33, %v3453_v56  ;;  %7141 = vmatprep.mubr.msk.f32.mxu1 %vm3537_vm5, %v3522_v23  ;;  %v3891_v33 = vld [vmem:[%s8132_s27] sm:$0xff] }
 0x50c   : > { %7142 = vmatmul.mubr.msk.f32.gmra.mrb[100].mxu1 %vm3537_vm5, %v3523_v51  ;;  %v3525_v21 = vmax.f32 %v3493_v57, 0.0  ;;  %7542 = vmatprep.subr.bf16.mxu0 %v7541_v26  ;;  %v7545_v27 = vpack.c.bf16 %v3892_v37, %v3891_v33 }
 0x50d   : > { %v3524_v9 = vmax.f32 %v3492_v35, 0.0  ;;  %7544 = vmatpush3.bf16.msra.mxu0 %v7541_v26 }
 0x50e   : > { %7546 = vmatprep.subr.bf16.mxu0 %v7545_v27 }
 0x50f   : > { %7144 = vmatprep.mubr.msk.f32.mxu1 %vm3537_vm5, %v3524_v9 }
 0x510   : > { %7145 = vmatmul.mubr.msk.f32.gmra.mrb[102].mxu1 %vm3537_vm5, %v3525_v21 }
 0x5a7   : > { %v7101_v38 = vpop.f32.mrb[72].mxu1 }
 0x5a8   : > { %v3706_v28 = vadd.f32 %v7101_v38, %v9134_v20  ;;  %v3700_v22 = vpop.f32.mrb[73].mxu1 }
 0x5a9   : > { %v3701_v24 = vadd.f32 %v9134_v20, %v3700_v22 }
 0x5aa   : > { %3860 = vst [vmem:[%s8289_s3 + $0x8] sm:$0xff] %v3706_v28 }
 0x5ab   : > { %3859 = vst [vmem:[%s8289_s3] sm:$0xff] %v3701_v24  ;;  %v7104_v49 = vpop.f32.mrb[74].mxu1  ;;  %7179 = vmatprep.mubr.f32.mxu0 %v3701_v24 }
 0x5ac   : > { %v3716_v1 = vadd.f32 %v7104_v49, %v9134_v20  ;;  %v3710_v44 = vpop.f32.mrb[75].mxu1  ;;  %7180 = vmatmul.mubr.f32.vlgmr.msra.gmra.mrb[56].mxu0 %v3706_v28 }
 0x5ad   : > { %v3711_v43 = vadd.f32 %v9134_v20, %v3710_v44  ;;  %7548 = vmatpush3.bf16.msra.mxu0 %v7545_v27 }
 0x5ae   : > { %3862 = vst [vmem:[%s8289_s3 + $0x18] sm:$0xff] %v3716_v1 }
 0x5af   : > { %3861 = vst [vmem:[%s8289_s3 + $0x10] sm:$0xff] %v3711_v43  ;;  %v7107_v52 = vpop.f32.mrb[76].mxu1  ;;  %7182 = vmatprep.mubr.f32.mxu0 %v3711_v43 }
 0x5b0   : > { %v3726_v31 = vadd.f32 %v7107_v52, %v9134_v20  ;;  %v3720_v59 = vpop.f32.mrb[77].mxu1  ;;  %7183 = vmatmul.mubr.f32.gmra.mrb[58].mxu0 %v3716_v1 }
 0x5b1   : > { %v3721_v14 = vadd.f32 %v9134_v20, %v3720_v59 }
 0x5b2   : > { %3864 = vst [vmem:[%s8289_s3 + $0x28] sm:$0xff] %v3726_v31 }
 0x5b3   : > { %3863 = vst [vmem:[%s8289_s3 + $0x20] sm:$0xff] %v3721_v14  ;;  %v7110_v45 = vpop.f32.mrb[78].mxu1  ;;  %7185 = vmatprep.mubr.f32.mxu0 %v3721_v14 }
 0x5b4   : > { %v3736_v11 = vadd.f32 %v7110_v45, %v9134_v20  ;;  %v3730_v16 = vpop.f32.mrb[79].mxu1  ;;  %7186 = vmatmul.mubr.f32.gmra.mrb[60].mxu0 %v3726_v31 }
 0x5b5   : > { %v3731_v46 = vadd.f32 %v9134_v20, %v3730_v16 }
 0x5b6   : > { %3866 = vst [vmem:[%s8289_s3 + $0x38] sm:$0xff] %v3736_v11 }
 0x5b7   : > { %3865 = vst [vmem:[%s8289_s3 + $0x30] sm:$0xff] %v3731_v46  ;;  %v7113_v58 = vpop.f32.mrb[80].mxu1  ;;  %7188 = vmatprep.mubr.f32.mxu0 %v3731_v46 }
 0x5b8   : > { %v3746_v63 = vadd.f32 %v7113_v58, %v9134_v20  ;;  %v3740_v42 = vpop.f32.mrb[81].mxu1  ;;  %7189 = vmatmul.mubr.f32.gmra.mrb[62].mxu0 %v3736_v11 }
 0x5b9   : > { %v3741_v15 = vadd.f32 %v9134_v20, %v3740_v42 }
 0x5ba   : > { %3868 = vst [vmem:[%s8289_s3 + $0x48] sm:$0xff] %v3746_v63 }
 0x5bb   : > { %3867 = vst [vmem:[%s8289_s3 + $0x40] sm:$0xff] %v3741_v15  ;;  %v7116_v62 = vpop.f32.mrb[82].mxu1  ;;  %7191 = vmatprep.mubr.f32.mxu0 %v3741_v15 }
 0x5bc   : > { %v3756_v10 = vadd.f32 %v7116_v62, %v9134_v20  ;;  %v3750_v2 = vpop.f32.mrb[83].mxu1  ;;  %7192 = vmatmul.mubr.f32.gmra.mrb[64].mxu0 %v3746_v63 }
 0x5bd   : > { %v3751_v53 = vadd.f32 %v9134_v20, %v3750_v2 }
 0x5be   : > { %3870 = vst [vmem:[%s8289_s3 + $0x58] sm:$0xff] %v3756_v10 }
 0x5bf   : > { %3869 = vst [vmem:[%s8289_s3 + $0x50] sm:$0xff] %v3751_v53  ;;  %v7119_v8 = vpop.f32.mrb[84].mxu1  ;;  %7194 = vmatprep.mubr.f32.mxu0 %v3751_v53 }
 0x5c0   : > { %v3766_v40 = vadd.f32 %v7119_v8, %v9134_v20  ;;  %v3760_v30 = vpop.f32.mrb[85].mxu1  ;;  %7195 = vmatmul.mubr.f32.gmra.mrb[66].mxu0 %v3756_v10 }
 0x5c1   : > { %v3761_v25 = vadd.f32 %v9134_v20, %v3760_v30 }
 0x5c2   : > { %3872 = vst [vmem:[%s8289_s3 + $0x68] sm:$0xff] %v3766_v40 }
 0x5c3   : > { %3871 = vst [vmem:[%s8289_s3 + $0x60] sm:$0xff] %v3761_v25  ;;  %v7122_v36 = vpop.f32.mrb[86].mxu1  ;;  %7197 = vmatprep.mubr.f32.mxu0 %v3761_v25 }
 0x5c4   : > { %v3776_v23 = vadd.f32 %v7122_v36, %v9134_v20  ;;  %v3770_v56 = vpop.f32.mrb[87].mxu1  ;;  %7198 = vmatmul.mubr.f32.gmra.mrb[68].mxu0 %v3766_v40 }
 0x5c5   : > { %v3771_v51 = vadd.f32 %v9134_v20, %v3770_v56 }
 0x5c6   : > { %3874 = vst [vmem:[%s8289_s3 + $0x78] sm:$0xff] %v3776_v23 }
 0x5c7   : > { %3873 = vst [vmem:[%s8289_s3 + $0x70] sm:$0xff] %v3771_v51  ;;  %v7125_v57 = vpop.f32.mrb[88].mxu1  ;;  %7200 = vmatprep.mubr.f32.mxu0 %v3771_v51 }
 0x5c8   : > { %v3786_v35 = vadd.f32 %v7125_v57, %v9134_v20  ;;  %v3780_v9 = vpop.f32.mrb[89].mxu1  ;;  %7201 = vmatmul.mubr.f32.gmra.mrb[70].mxu0 %v3776_v23 }
 0x5c9   : > { %v3781_v21 = vadd.f32 %v9134_v20, %v3780_v9 }
 0x5ca   : > { %3876 = vst [vmem:[%s8289_s3 + $0x88] sm:$0xff] %v3786_v35 }
 0x5cb   : > { %3875 = vst [vmem:[%s8289_s3 + $0x80] sm:$0xff] %v3781_v21  ;;  %v7128_v4 = vpop.f32.mrb[90].mxu1  ;;  %7203 = vmatprep.mubr.f32.mxu0 %v3781_v21 }
 0x5cc   : > { %v3796_v41 = vadd.f32 %v7128_v4, %v9134_v20  ;;  %v3790_v26 = vpop.f32.mrb[91].mxu1  ;;  %7204 = vmatmul.mubr.f32.gmra.mrb[72].mxu0 %v3786_v35 }
 0x5cd   : > { %v3791_v33 = vadd.f32 %v9134_v20, %v3790_v26 }
 0x5ce   : > { %3878 = vst [vmem:[%s8289_s3 + $0x98] sm:$0xff] %v3796_v41 }
 0x5cf   : > { %3877 = vst [vmem:[%s8289_s3 + $0x90] sm:$0xff] %v3791_v33  ;;  %v7131_v37 = vpop.f32.mrb[92].mxu1  ;;  %7206 = vmatprep.mubr.f32.mxu0 %v3791_v33 }
 0x5d0   : > { %v3806_v27 = vadd.f32 %v7131_v37, %v9134_v20  ;;  %v3800_v38 = vpop.f32.mrb[93].mxu1  ;;  %7207 = vmatmul.mubr.f32.gmra.mrb[74].mxu0 %v3796_v41 }
 0x5d1   : > { %v3801_v28 = vadd.f32 %v9134_v20, %v3800_v38 }
 0x5d2   : > { %3880 = vst [vmem:[%s8289_s3 + $0xa8] sm:$0xff] %v3806_v27 }
 0x5d3   : > { %3879 = vst [vmem:[%s8289_s3 + $0xa0] sm:$0xff] %v3801_v28  ;;  %v7134_v22 = vpop.f32.mrb[94].mxu1  ;;  %7209 = vmatprep.mubr.f32.mxu0 %v3801_v28 }
 0x5d4   : > { %v3816_v50 = vadd.f32 %v7134_v22, %v9134_v20  ;;  %v3810_v0 = vpop.f32.mrb[95].mxu1  ;;  %7210 = vmatmul.mubr.f32.gmra.mrb[76].mxu0 %v3806_v27 }
 0x5d5   : > { %v3811_v24 = vadd.f32 %v9134_v20, %v3810_v0 }
 0x5d6   : > { %3882 = vst [vmem:[%s8289_s3 + $0xb8] sm:$0xff] %v3816_v50 }
 0x5d7   : > { %3881 = vst [vmem:[%s8289_s3 + $0xb0] sm:$0xff] %v3811_v24  ;;  %v7137_v3 = vpop.f32.mrb[96].mxu1  ;;  %7212 = vmatprep.mubr.f32.mxu0 %v3811_v24 }
 0x5d8   : > { %v3826_v49 = vadd.f32 %v7137_v3, %v9134_v20  ;;  %v3820_v1 = vpop.f32.mrb[97].mxu1  ;;  %7213 = vmatmul.mubr.f32.gmra.mrb[78].mxu0 %v3816_v50 }
 0x5d9   : > { %v3821_v44 = vadd.f32 %v9134_v20, %v3820_v1 }
 0x5da   : > { %3884 = vst [vmem:[%s8289_s3 + $0xc8] sm:$0xff] %v3826_v49 }
 0x5db   : > { %3883 = vst [vmem:[%s8289_s3 + $0xc0] sm:$0xff] %v3821_v44  ;;  %v7140_v43 = vpop.f32.mrb[98].mxu1  ;;  %7215 = vmatprep.mubr.f32.mxu0 %v3821_v44 }
 0x5dc   : > { %v3836_v52 = vadd.f32 %v7140_v43, %v9134_v20  ;;  %v3830_v31 = vpop.f32.mrb[99].mxu1  ;;  %7216 = vmatmul.mubr.f32.gmra.mrb[80].mxu0 %v3826_v49 }
 0x5dd   : > { %v3831_v59 = vadd.f32 %v9134_v20, %v3830_v31 }
 0x5de   : > { %3886 = vst [vmem:[%s8289_s3 + $0xd8] sm:$0xff] %v3836_v52 }
 0x5df   : > { %3885 = vst [vmem:[%s8289_s3 + $0xd0] sm:$0xff] %v3831_v59  ;;  %v7143_v14 = vpop.f32.mrb[100].mxu1  ;;  %7218 = vmatprep.mubr.f32.mxu0 %v3831_v59 }
 0x5e0   : > { %v3846_v45 = vadd.f32 %v7143_v14, %v9134_v20  ;;  %v3840_v11 = vpop.f32.mrb[101].mxu1  ;;  %7219 = vmatmul.mubr.f32.gmra.mrb[82].mxu0 %v3836_v52 }
 0x5e1   : > { %v3841_v16 = vadd.f32 %v9134_v20, %v3840_v11 }
 0x5e2   : > { %3888 = vst [vmem:[%s8289_s3 + $0xe8] sm:$0xff] %v3846_v45 }
 0x5e3   : > { %3887 = vst [vmem:[%s8289_s3 + $0xe0] sm:$0xff] %v3841_v16  ;;  %v7146_v46 = vpop.f32.mrb[102].mxu1  ;;  %7221 = vmatprep.mubr.f32.mxu0 %v3841_v16 }
 0x5e4   : > { %v3856_v58 = vadd.f32 %v7146_v46, %v9134_v20  ;;  %v3850_v63 = vpop.f32.mrb[103].mxu1  ;;  %7222 = vmatmul.mubr.f32.gmra.mrb[84].mxu0 %v3846_v45 }
 0x5e5   : > { %v3851_v42 = vadd.f32 %v9134_v20, %v3850_v63 }
 0x5e6   : > { %3890 = vst [vmem:[%s8289_s3 + $0xf8] sm:$0xff] %v3856_v58 }
 0x5e7   : > { %3889 = vst [vmem:[%s8289_s3 + $0xf0] sm:$0xff] %v3851_v42  ;;  %7224 = vmatprep.mubr.f32.mxu0 %v3851_v42 }
 0x5e8   : > { %7225 = vmatmul.mubr.f32.gmra.mrb[86].mxu0 %v3856_v58 }
 0x5e9   : > { %7231 = vmatprep.mubr.msk.f32.mxu0 %vm2485_vm4, %v8839_v18  ;;  %v9703_v18 = vld [vmem:[#allocation51_spill] sm:$0xff] }
 0x5ec   : > { %7232 = vmatmul.mubr.msk.f32.vlgmr.msra.gmra.mrb[56].mxu0 %vm2485_vm4, %v8846_v19  ;;  %v9705_v19 = vld [vmem:[#allocation55_spill] sm:$0xff] }
 0x5ed   : > { %7234 = vmatprep.mubr.msk.f32.mxu0 %vm2485_vm4, %v8837_v34  ;;  %v9702_v34 = vld [vmem:[#allocation50_spill] sm:$0xff] }
 0x5f0   : > { %7235 = vmatmul.mubr.msk.f32.gmra.mrb[58].mxu0 %vm2485_vm4, %v8842_v5  ;;  %v9704_v5 = vld [vmem:[#allocation53_spill] sm:$0xff] }
 0x5f1   : > { %7237 = vmatprep.mubr.msk.f32.mxu0 %vm2485_vm4, %v8854_v48  ;;  %v9708_v48 = vld [vmem:[#allocation54_spill] sm:$0xff] }
 0x5f4   : > { %7238 = vmatmul.mubr.msk.f32.gmra.mrb[60].mxu0 %vm2485_vm4, %v8862_v6  ;;  %v9710_v6 = vld [vmem:[#allocation45_spill] sm:$0xff] }
 0x5f5   : > { %7240 = vmatprep.mubr.msk.f32.mxu0 %vm2485_vm4, %v8852_v47  ;;  %v9706_v47 = vld [vmem:[#allocation52_spill] sm:$0xff] }
 0x5f8   : > { %7241 = vmatmul.mubr.msk.f32.gmra.mrb[62].mxu0 %vm2485_vm4, %v8858_v32  ;;  %v9709_v32 = vld [vmem:[#allocation43_spill] sm:$0xff] }
 0x5f9   : > { %7243 = vmatprep.mubr.msk.f32.mxu0 %vm2485_vm4, %v8870_v54  ;;  %v9712_v54 = vld [vmem:[#allocation44_spill] sm:$0xff] }
 0x5fc   : > { %7244 = vmatmul.mubr.msk.f32.gmra.mrb[64].mxu0 %vm2485_vm4, %v8878_v12  ;;  %v9714_v12 = vld [vmem:[#allocation49_spill] sm:$0xff] }
 0x5fd   : > { %7246 = vmatprep.mubr.msk.f32.mxu0 %vm2485_vm4, %v8868_v7  ;;  %v9711_v7 = vld [vmem:[#allocation42_spill] sm:$0xff] }
 0x600   : > { %7247 = vmatmul.mubr.msk.f32.gmra.mrb[66].mxu0 %vm2485_vm4, %v8874_v55  ;;  %v9713_v55 = vld [vmem:[#allocation47_spill] sm:$0xff] }
 0x601   : > { %7249 = vmatprep.mubr.msk.f32.mxu0 %vm2485_vm4, %v8886_v60  ;;  %v9716_v60 = vld [vmem:[#allocation48_spill] sm:$0xff] }
 0x604   : > { %7250 = vmatmul.mubr.msk.f32.gmra.mrb[68].mxu0 %vm2485_vm4, %v8894_v13  ;;  %v4433_v13 = vld [vmem:[%s9701_s26 + $0x18] sm:$0xff] }
 0x605   : > { %7252 = vmatprep.mubr.msk.f32.mxu0 %vm2485_vm4, %v8884_v39  ;;  %v9715_v39 = vld [vmem:[#allocation46_spill] sm:$0xff] }
 0x608   : > { %7253 = vmatmul.mubr.msk.f32.gmra.mrb[70].mxu0 %vm2485_vm4, %v8890_v61  ;;  %v4432_v61 = vld [vmem:[%s9701_s26 + $0x10] sm:$0xff] }
 0x609   : > { %7255 = vmatprep.mubr.msk.f32.mxu0 %vm2485_vm4, %v8902_v17  ;;  %v7553_v17 = vpack.c.bf16 %v4433_v13, %v4432_v61 }
 0x60b   : > { %7554 = vmatprep.subr.bf16.mxu1 %v7553_v17 }
 0x60c   : > { %7256 = vmatmul.mubr.msk.f32.gmra.mrb[72].mxu0 %vm2485_vm4, %v8910_v29  ;;  %7556 = vmatpush3.bf16.msra.mxu1 %v7553_v17  ;;  %v9269_v29 = vld [vmem:[%s9707_s2] ss:$0 sm:$0xff]  ;;  %s9725_s2 = sld [smem:[#allocation30_spill]] (!%p6400_p13) }
 0x60d   : > { %7258 = vmatprep.mubr.msk.f32.mxu0 %vm2485_vm4, %v9702_v34 }
 0x610   : > { %7259 = vmatmul.mubr.msk.f32.gmra.mrb[74].mxu0 %vm2485_vm4, %v9703_v18 }
 0x611   : > { %7261 = vmatprep.mubr.msk.f32.mxu0 %vm2485_vm4, %v9704_v5 }
 0x614   : > { %7262 = vmatmul.mubr.msk.f32.gmra.mrb[76].mxu0 %vm2485_vm4, %v9705_v19 }
 0x615   : > { %7264 = vmatprep.mubr.msk.f32.mxu0 %vm2485_vm4, %v9706_v47 }
 0x618   : > { %7265 = vmatmul.mubr.msk.f32.gmra.mrb[78].mxu0 %vm2485_vm4, %v9708_v48 }
 0x619   : > { %7267 = vmatprep.mubr.msk.f32.mxu0 %vm2485_vm4, %v9709_v32 }
 0x61c   : > { %7268 = vmatmul.mubr.msk.f32.gmra.mrb[80].mxu0 %vm2485_vm4, %v9710_v6 }
 0x61d   : > { %7270 = vmatprep.mubr.msk.f32.mxu0 %vm2485_vm4, %v9711_v7 }
 0x620   : > { %7271 = vmatmul.mubr.msk.f32.gmra.mrb[82].mxu0 %vm2485_vm4, %v9712_v54 }
 0x621   : > { %7273 = vmatprep.mubr.msk.f32.mxu0 %vm2485_vm4, %v9713_v55 }
 0x624   : > { %7274 = vmatmul.mubr.msk.f32.gmra.mrb[84].mxu0 %vm2485_vm4, %v9714_v12 }
 0x625   : > { %7276 = vmatprep.mubr.msk.f32.mxu0 %vm2485_vm4, %v9715_v39 }
 0x628   : > { %7277 = vmatmul.mubr.msk.f32.gmra.mrb[86].mxu0 %vm2485_vm4, %v9716_v60 }
 0x6bf   : > { %v7233_v20 = vpop.f32.mrb[56].mxu0 }
 0x6c0   : > { %v4367_v15 = vadd.f32 %v7233_v20, %v9269_v29  ;;  %v4200_v62 = vpop.f32.mrb[57].mxu0 }
 0x6c1   : > { %v4366_v10 = vadd.f32 %v9269_v29, %v4200_v62 }
 0x6c2   : > { %v4399_v8 = vmax.f32 %v4367_v15, 0.0 }
 0x6c3   : > { %v4398_v2 = vmax.f32 %v4366_v10, 0.0  ;;  %v7236_v53 = vpop.f32.mrb[58].mxu0 }
 0x6c4   : > { %v4369_v40 = vadd.f32 %v7236_v53, %v9269_v29  ;;  %v4210_v30 = vpop.f32.mrb[59].mxu0 }
 0x6c5   : > { %v4368_v25 = vadd.f32 %v9269_v29, %v4210_v30  ;;  %7287 = vmatprep.mubr.msk.f32.mxu1 %vm3537_vm5, %v4398_v2 }
 0x6c6   : > { %7288 = vmatmul.mubr.msk.f32.vlgmr.msra.gmra.mrb[104].mxu1 %vm3537_vm5, %v4399_v8  ;;  %v4401_v56 = vmax.f32 %v4369_v40, 0.0 }
 0x6c7   : > { %v4400_v36 = vmax.f32 %v4368_v25, 0.0  ;;  %v7239_v23 = vpop.f32.mrb[60].mxu0 }
 0x6c8   : > { %v4371_v51 = vadd.f32 %v7239_v23, %v9269_v29  ;;  %v4220_v57 = vpop.f32.mrb[61].mxu0 }
 0x6c9   : > { %v4370_v35 = vadd.f32 %v9269_v29, %v4220_v57  ;;  %7290 = vmatprep.mubr.msk.f32.mxu1 %vm3537_vm5, %v4400_v36 }
 0x6ca   : > { %7291 = vmatmul.mubr.msk.f32.gmra.mrb[106].mxu1 %vm3537_vm5, %v4401_v56  ;;  %v4403_v4 = vmax.f32 %v4371_v51, 0.0 }
 0x6cb   : > { %v4402_v9 = vmax.f32 %v4370_v35, 0.0  ;;  %v7242_v21 = vpop.f32.mrb[62].mxu0 }
 0x6cc   : > { %v4373_v41 = vadd.f32 %v7242_v21, %v9269_v29  ;;  %v4230_v26 = vpop.f32.mrb[63].mxu0 }
 0x6cd   : > { %v4372_v33 = vadd.f32 %v9269_v29, %v4230_v26  ;;  %7293 = vmatprep.mubr.msk.f32.mxu1 %vm3537_vm5, %v4402_v9 }
 0x6ce   : > { %7294 = vmatmul.mubr.msk.f32.gmra.mrb[108].mxu1 %vm3537_vm5, %v4403_v4  ;;  %v4405_v38 = vmax.f32 %v4373_v41, 0.0 }
 0x6cf   : > { %v4404_v37 = vmax.f32 %v4372_v33, 0.0  ;;  %v7245_v27 = vpop.f32.mrb[64].mxu0 }
 0x6d0   : > { %v4375_v28 = vadd.f32 %v7245_v27, %v9269_v29  ;;  %v4240_v22 = vpop.f32.mrb[65].mxu0 }
 0x6d1   : > { %v4374_v50 = vadd.f32 %v9269_v29, %v4240_v22  ;;  %7296 = vmatprep.mubr.msk.f32.mxu1 %vm3537_vm5, %v4404_v37 }
 0x6d2   : > { %7297 = vmatmul.mubr.msk.f32.gmra.mrb[110].mxu1 %vm3537_vm5, %v4405_v38  ;;  %v4407_v3 = vmax.f32 %v4375_v28, 0.0 }
 0x6d3   : > { %v4406_v0 = vmax.f32 %v4374_v50, 0.0  ;;  %v7248_v24 = vpop.f32.mrb[66].mxu0 }
 0x6d4   : > { %v4377_v49 = vadd.f32 %v7248_v24, %v9269_v29  ;;  %v4250_v1 = vpop.f32.mrb[67].mxu0 }
 0x6d5   : > { %v4376_v44 = vadd.f32 %v9269_v29, %v4250_v1  ;;  %7299 = vmatprep.mubr.msk.f32.mxu1 %vm3537_vm5, %v4406_v0 }
 0x6d6   : > { %7300 = vmatmul.mubr.msk.f32.gmra.mrb[112].mxu1 %vm3537_vm5, %v4407_v3  ;;  %v4409_v31 = vmax.f32 %v4377_v49, 0.0 }
 0x6d7   : > { %v4408_v43 = vmax.f32 %v4376_v44, 0.0  ;;  %v7251_v52 = vpop.f32.mrb[68].mxu0  ;;  %v1994_v44 = vlaneseq }
 0x6d8   : > { %v4379_v59 = vadd.f32 %v7251_v52, %v9269_v29  ;;  %v4260_v14 = vpop.f32.mrb[69].mxu0 }
 0x6d9   : > { %v4378_v45 = vadd.f32 %v9269_v29, %v4260_v14  ;;  %7302 = vmatprep.mubr.msk.f32.mxu1 %vm3537_vm5, %v4408_v43  ;;  %v9335_v43 = vshrl.u32 %v1994_v44, 7  ;;  %v1979_v14 = vld [vmem:[#allocation6 + $0x8] sm:$0xff] }
 0x6da   : > { %7303 = vmatmul.mubr.msk.f32.gmra.mrb[114].mxu1 %vm3537_vm5, %v4409_v31  ;;  %v4411_v46 = vmax.f32 %v4379_v59, 0.0  ;;  %v1497_v31 = vld [vmem:[%s1094_s22] sm:$0x3]  ;;  %s9718_s22 = sld [smem:[#allocation18_spill]] (!%p6400_p13) }
 0x6db   : > { %v4410_v11 = vmax.f32 %v4378_v45, 0.0  ;;  %v7254_v16 = vpop.f32.mrb[70].mxu0  ;;  %v2000_v52 = vsub.s32 1, %v9335_v43  ;;  %v1981_v45 = vld [vmem:[#allocation6 + $0x18] sm:$0xff] }
 0x6dc   : > { %v4381_v58 = vadd.f32 %v7254_v16, %v9269_v29  ;;  %v4270_v63 = vpop.f32.mrb[71].mxu0  ;;  %v8034_v16 = vmov 1.0|1.0  }
 0x6dd   : > { %v4380_v42 = vadd.f32 %v9269_v29, %v4270_v63  ;;  %7305 = vmatprep.mubr.msk.f32.mxu1 %vm3537_vm5, %v4410_v11  ;;  %v9342_v59 = vrot.slane %v1497_v31, %v2000_v52 }
 0x6de   : > { %7306 = vmatmul.mubr.msk.f32.gmra.mrb[116].mxu1 %vm3537_vm5, %v4411_v46  ;;  %v4413_v5 = vmax.f32 %v4381_v58, 0.0  ;;  %v9350_v46 = vld [vmem:[%s9717_s10] ss:$0 sm:$0xff]  ;;  %s9726_s10 = sld [smem:[#allocation29_spill]] (!%p6400_p13) }
 0x6df   : > { %v4412_v34 = vmax.f32 %v4380_v42, 0.0  ;;  %v7257_v18 = vpop.f32.mrb[72].mxu0  ;;  %vm2003_vm6 = vcmp.eq.s32.totalorder %v1979_v14, %v9342_v59  ;;  %vm2005_vm7 = vcmp.eq.s32.totalorder %v1981_v45, %v9342_v59 }
 0x6e0   : > { %v4383_v19 = vadd.f32 %v7257_v18, %v9269_v29  ;;  %v4280_v47 = vpop.f32.mrb[73].mxu0  ;;  %vm6384_vm8 = vmpackc.low %vm2005_vm7, %vm2003_vm6  ;;  %s9719_s11 = smov (!%p6400_p13), %s9718_s22 }
 0x6e1   : > { %v4382_v48 = vadd.f32 %v9269_v29, %v4280_v47  ;;  %7308 = vmatprep.mubr.msk.f32.mxu1 %vm3537_vm5, %v4412_v34 }
 0x6e2   : > { %7309 = vmatmul.mubr.msk.f32.gmra.mrb[118].mxu1 %vm3537_vm5, %v4413_v5  ;;  %v4415_v7 = vmax.f32 %v4383_v19, 0.0 }
 0x6e3   : > { %v4414_v32 = vmax.f32 %v4382_v48, 0.0  ;;  %v7260_v6 = vpop.f32.mrb[74].mxu0 }
 0x6e4   : > { %v4385_v54 = vadd.f32 %v7260_v6, %v9269_v29  ;;  %v4290_v55 = vpop.f32.mrb[75].mxu0 }
 0x6e5   : > { %v4384_v12 = vadd.f32 %v9269_v29, %v4290_v55  ;;  %7311 = vmatprep.mubr.msk.f32.mxu1 %vm3537_vm5, %v4414_v32 }
 0x6e6   : > { %7312 = vmatmul.mubr.msk.f32.gmra.mrb[120].mxu1 %vm3537_vm5, %v4415_v7  ;;  %v4417_v61 = vmax.f32 %v4385_v54, 0.0 }
 0x6e7   : > { %v4416_v39 = vmax.f32 %v4384_v12, 0.0  ;;  %v7263_v60 = vpop.f32.mrb[76].mxu0 }
 0x6e8   : > { %v4387_v13 = vadd.f32 %v7263_v60, %v9269_v29  ;;  %v4300_v17 = vpop.f32.mrb[77].mxu0 }
 0x6e9   : > { %v4386_v20 = vadd.f32 %v9269_v29, %v4300_v17  ;;  %7314 = vmatprep.mubr.msk.f32.mxu1 %vm3537_vm5, %v4416_v39 }
 0x6ea   : > { %7315 = vmatmul.mubr.msk.f32.gmra.mrb[122].mxu1 %vm3537_vm5, %v4417_v61  ;;  %v4419_v10 = vmax.f32 %v4387_v13, 0.0 }
 0x6eb   : > { %v4418_v15 = vmax.f32 %v4386_v20, 0.0  ;;  %v7266_v62 = vpop.f32.mrb[78].mxu0 }
 0x6ec   : > { %v4389_v2 = vadd.f32 %v7266_v62, %v9269_v29  ;;  %v4310_v53 = vpop.f32.mrb[79].mxu0 }
 0x6ed   : > { %v4388_v8 = vadd.f32 %v9269_v29, %v4310_v53  ;;  %7317 = vmatprep.mubr.msk.f32.mxu1 %vm3537_vm5, %v4418_v15 }
 0x6ee   : > { %7318 = vmatmul.mubr.msk.f32.gmra.mrb[124].mxu1 %vm3537_vm5, %v4419_v10  ;;  %v4421_v25 = vmax.f32 %v4389_v2, 0.0 }
 0x6ef   : > { %v4420_v40 = vmax.f32 %v4388_v8, 0.0  ;;  %v7269_v30 = vpop.f32.mrb[80].mxu0 }
 0x6f0   : > { %v4391_v36 = vadd.f32 %v7269_v30, %v9269_v29  ;;  %v4320_v23 = vpop.f32.mrb[81].mxu0 }
 0x6f1   : > { %v4390_v56 = vadd.f32 %v9269_v29, %v4320_v23  ;;  %7320 = vmatprep.mubr.msk.f32.mxu1 %vm3537_vm5, %v4420_v40 }
 0x6f2   : > { %7321 = vmatmul.mubr.msk.f32.gmra.mrb[126].mxu1 %vm3537_vm5, %v4421_v25  ;;  %v4423_v35 = vmax.f32 %v4391_v36, 0.0 }
 0x6f3   : > { %v4422_v51 = vmax.f32 %v4390_v56, 0.0  ;;  %v7272_v57 = vpop.f32.mrb[82].mxu0 }
 0x6f4   : > { %v4393_v9 = vadd.f32 %v7272_v57, %v9269_v29  ;;  %v4330_v21 = vpop.f32.mrb[83].mxu0 }
 0x6f5   : > { %v4392_v4 = vadd.f32 %v9269_v29, %v4330_v21  ;;  %7323 = vmatprep.mubr.msk.f32.mxu1 %vm3537_vm5, %v4422_v51 }
 0x6f6   : > { %7324 = vmatmul.mubr.msk.f32.gmra.mrb[128].mxu1 %vm3537_vm5, %v4423_v35  ;;  %v4425_v33 = vmax.f32 %v4393_v9, 0.0 }
 0x6f7   : > { %v4424_v41 = vmax.f32 %v4392_v4, 0.0  ;;  %v7275_v26 = vpop.f32.mrb[84].mxu0 }
 0x6f8   : > { %v4395_v37 = vadd.f32 %v7275_v26, %v9269_v29  ;;  %v4340_v27 = vpop.f32.mrb[85].mxu0 }
 0x6f9   : > { %v4394_v38 = vadd.f32 %v9269_v29, %v4340_v27  ;;  %7326 = vmatprep.mubr.msk.f32.mxu1 %vm3537_vm5, %v4424_v41 }
 0x6fa   : > { %7327 = vmatmul.mubr.msk.f32.gmra.mrb[130].mxu1 %vm3537_vm5, %v4425_v33  ;;  %v4427_v50 = vmax.f32 %v4395_v37, 0.0 }
 0x6fb   : > { %v4426_v28 = vmax.f32 %v4394_v38, 0.0  ;;  %v7278_v22 = vpop.f32.mrb[86].mxu0 }
 0x6fc   : > { %v4397_v0 = vadd.f32 %v7278_v22, %v9269_v29  ;;  %v4350_v24 = vpop.f32.mrb[87].mxu0 }
 0x6fd   : > { %v4396_v3 = vadd.f32 %v9269_v29, %v4350_v24  ;;  %7329 = vmatprep.mubr.msk.f32.mxu1 %vm3537_vm5, %v4426_v28  ;;  %v1996_v29 = vsub.s32 0, %v9335_v43 }
 0x6fe   : > { %7330 = vmatmul.mubr.msk.f32.gmra.mrb[132].mxu1 %vm3537_vm5, %v4427_v50  ;;  %v4429_v1 = vmax.f32 %v4397_v0, 0.0 }
 0x6ff   : > { %v4428_v49 = vmax.f32 %v4396_v3, 0.0  ;;  %v9344_v11 = vrot.slane %v1497_v31, %v1996_v29 }
 0x701   : > { %7332 = vmatprep.mubr.msk.f32.mxu1 %vm3537_vm5, %v4428_v49 }
 0x702   : > { %7333 = vmatmul.mubr.msk.f32.gmra.mrb[134].mxu1 %vm3537_vm5, %v4429_v1 }
 0x703   : > { %6385 = vmatprep.mubr.msk.bf16.mxu1 %vm6384_vm8, %v8034_v16 }
 0x799   : > { %v7289_v58 = vpop.f32.mrb[104].mxu1 }
 0x79a   : > { %v4609_v63 = vadd.f32 %v7289_v58, %v9350_v46  ;;  %v4603_v42 = vpop.f32.mrb[105].mxu1 }
 0x79b   : > { %v4604_v34 = vadd.f32 %v9350_v46, %v4603_v42 }
 0x79d   : > { %v4770_v18 = vpack.c.bf16 %v4609_v63, %v4604_v34  ;;  %v7292_v5 = vpop.f32.mrb[106].mxu1 }
 0x79e   : > { %v4619_v19 = vadd.f32 %v7292_v5, %v9350_v46  ;;  %v4613_v47 = vpop.f32.mrb[107].mxu1 }
 0x79f   : > { %v4614_v48 = vadd.f32 %v9350_v46, %v4613_v47 }
 0x7a1   : > { %v4771_v32 = vpack.c.bf16 %v4619_v19, %v4614_v48  ;;  %v7295_v6 = vpop.f32.mrb[108].mxu1 }
 0x7a2   : > { %v4629_v7 = vadd.f32 %v7295_v6, %v9350_v46  ;;  %v4623_v54 = vpop.f32.mrb[109].mxu1 }
 0x7a3   : > { %v4624_v55 = vadd.f32 %v9350_v46, %v4623_v54 }
 0x7a5   : > { %v4772_v12 = vpack.c.bf16 %v4629_v7, %v4624_v55  ;;  %v7298_v39 = vpop.f32.mrb[110].mxu1 }
 0x7a6   : > { %v4639_v60 = vadd.f32 %v7298_v39, %v9350_v46  ;;  %v4633_v61 = vpop.f32.mrb[111].mxu1 }
 0x7a7   : > { %v4634_v13 = vadd.f32 %v9350_v46, %v4633_v61 }
 0x7a9   : > { %v4773_v17 = vpack.c.bf16 %v4639_v60, %v4634_v13  ;;  %v7301_v20 = vpop.f32.mrb[112].mxu1 }
 0x7aa   : > { %v4649_v15 = vadd.f32 %v7301_v20, %v9350_v46  ;;  %v4643_v62 = vpop.f32.mrb[113].mxu1  ;;  %v1980_v20 = vld [vmem:[#allocation6 + $0x10] sm:$0xff] }
 0x7ab   : > { %v4644_v10 = vadd.f32 %v9350_v46, %v4643_v62  ;;  %v1983_v62 = vld [vmem:[#allocation6 + $0x28] sm:$0xff]  ;;  %vm2004_vm10 = vcmp.eq.s32.totalorder %v1980_v20, %v9344_v11 }
 0x7ac   : > { %vm2007_vm11 = vcmp.eq.s32.totalorder %v1983_v62, %v9342_v59 }
 0x7ad   : > { %v4774_v2 = vpack.c.bf16 %v4649_v15, %v4644_v10  ;;  %v7304_v53 = vpop.f32.mrb[114].mxu1  ;;  %v1985_v10 = vld [vmem:[#allocation6 + $0x38] sm:$0xff] }
 0x7ae   : > { %v4659_v8 = vadd.f32 %v7304_v53, %v9350_v46  ;;  %v4653_v40 = vpop.f32.mrb[115].mxu1  ;;  %vm2009_vm12 = vcmp.eq.s32.totalorder %v1985_v10, %v9342_v59  ;;  %v1984_v53 = vld [vmem:[#allocation6 + $0x30] sm:$0xff]  ;;  %v4956_v10 = vld [vmem:[%s9721_s28 + $0x20] sm:$0xff] (!%p6400_p13) }
 0x7af   : > { %v4654_v30 = vadd.f32 %v9350_v46, %v4653_v40  ;;  %vm6388_vm14 = vmpackc.low %vm2009_vm12, %vm2007_vm11  ;;  %v1989_v40 = vld [vmem:[#allocation6 + $0x58] sm:$0xff]  ;;  %vm2008_vm0 = vcmp.eq.s32.totalorder %v1984_v53, %v9344_v11  ;;  %v4899_v53 = vld [vmem:[%s9719_s11 + $0x20] sm:$0xff] (!%p6400_p13) }
 0x7b0   : > { %vm2013_vm4 = vcmp.eq.s32.totalorder %v1989_v40, %v9342_v59  ;;  %v4958_v40 = vld [vmem:[%s9721_s28 + $0x30] sm:$0xff] (!%p6400_p13) }
 0x7b1   : > { %v4775_v25 = vpack.c.bf16 %v4659_v8, %v4654_v30  ;;  %v7307_v36 = vpop.f32.mrb[116].mxu1  ;;  %v1987_v8 = vld [vmem:[#allocation6 + $0x48] sm:$0xff]  ;;  %v1986_v30 = vld [vmem:[#allocation6 + $0x40] sm:$0xff] }
 0x7b2   : > { %v9365_v23 = vadd.f32 %v7307_v36, %v9350_v46  ;;  %v4663_v56 = vpop.f32.mrb[117].mxu1  ;;  %vm2011_vm2 = vcmp.eq.s32.totalorder %v1987_v8, %v9342_v59  ;;  %v1991_v36 = vld [vmem:[#allocation6 + $0x68] sm:$0xff]  ;;  %vm2010_vm8 = vcmp.eq.s32.totalorder %v1986_v30, %v9344_v11  ;;  %v4951_v30 = vld [vmem:[%s9722_s1] sm:$0xff] (!%p6400_p13) }
 0x7b3   : > { %v9368_v51 = vadd.f32 %v9350_v46, %v4663_v56  ;;  %vm6392_vm7 = vmpackc.low %vm2013_vm4, %vm2011_vm2  ;;  %v1990_v56 = vld [vmem:[#allocation6 + $0x60] sm:$0xff]  ;;  %vm8037_vm2 = vmmov (!%p6400_p13), 0  }
 0x7b5   : > { %v4776_v57 = vpack.c.bf16 %v9365_v23, %v9368_v51  ;;  %v7310_v35 = vpop.f32.mrb[118].mxu1  ;;  %v1993_v23 = vld [vmem:[#allocation6 + $0x78] sm:$0xff]  ;;  %v1992_v51 = vld [vmem:[#allocation6 + $0x70] sm:$0xff] }
 0x7b6   : > { %v9373_v9 = vadd.f32 %v7310_v35, %v9350_v46  ;;  %v4673_v21 = vpop.f32.mrb[119].mxu1  ;;  %vm2017_vm11 = vcmp.eq.s32.totalorder %v1993_v23, %v9342_v59  ;;  %v4762_v35 = vld [vmem:[#allocation2] sm:$0xff]  ;;  %v4872_v23 = vld [vmem:[%s8072_s21 + $0x8] sm:$0xff] (!%p6400_p13) }
 0x7b7   : > { %v9376_v4 = vadd.f32 %v9350_v46, %v4673_v21 }
 0x7b9   : > { %v4777_v41 = vpack.c.bf16 %v9373_v9, %v9376_v4  ;;  %v7313_v26 = vpop.f32.mrb[120].mxu1  ;;  %v4763_v4 = vld [vmem:[#allocation2 + $0x8] sm:$0xff] }
 0x7ba   : > { %v4689_v33 = vadd.f32 %v7313_v26, %v9350_v46  ;;  %v4683_v37 = vpop.f32.mrb[121].mxu1 }
 0x7bb   : > { %v4684_v27 = vadd.f32 %v9350_v46, %v4683_v37 }
 0x7bd   : > { %v4778_v38 = vpack.c.bf16 %v4689_v33, %v4684_v27  ;;  %v7316_v28 = vpop.f32.mrb[122].mxu1 }
 0x7be   : > { %v4699_v22 = vadd.f32 %v7316_v28, %v9350_v46  ;;  %v4693_v50 = vpop.f32.mrb[123].mxu1 }
 0x7bf   : > { %v4694_v0 = vadd.f32 %v9350_v46, %v4693_v50  ;;  %6732 = vmatprep.subr.bf16.mxu1 %v4778_v38  ;;  %v4764_v38 = vld [vmem:[#allocation2 + $0x10] sm:$0xff]  ;;  %v4765_v50 = vld [vmem:[#allocation2 + $0x18] sm:$0xff] }
 0x7c0   : > { %6733 = vmatpush3.bf16.msra.mxu1 %v4770_v18 }
 0x7c1   : > { %v4779_v24 = vpack.c.bf16 %v4699_v22, %v4694_v0  ;;  %v7319_v3 = vpop.f32.mrb[124].mxu1 }
 0x7c2   : > { %v4709_v49 = vadd.f32 %v7319_v3, %v9350_v46  ;;  %v4703_v1 = vpop.f32.mrb[125].mxu1 }
 0x7c3   : > { %v4704_v44 = vadd.f32 %v9350_v46, %v4703_v1  ;;  %6734 = vmatprep.subr.bf16.mxu1 %v4779_v24  ;;  %v4766_v1 = vld [vmem:[#allocation2 + $0x20] sm:$0xff] }
 0x7c4   : > { %6735 = vmatpush3.bf16.msra.mxu1 %v4771_v32 }
 0x7c5   : > { %v4780_v52 = vpack.c.bf16 %v4709_v49, %v4704_v44  ;;  %v7322_v31 = vpop.f32.mrb[126].mxu1 }
 0x7c6   : > { %v4719_v29 = vadd.f32 %v7322_v31, %v9350_v46  ;;  %v4713_v14 = vpop.f32.mrb[127].mxu1 }
 0x7c7   : > { %v4714_v45 = vadd.f32 %v9350_v46, %v4713_v14  ;;  %6736 = vmatprep.subr.bf16.mxu1 %v4780_v52 }
 0x7c8   : > { %6737 = vmatpush3.bf16.msra.mxu1 %v4772_v12 }
 0x7c9   : > { %v4781_v58 = vpack.c.bf16 %v4719_v29, %v4714_v45  ;;  %v7325_v63 = vpop.f32.mrb[128].mxu1  ;;  %v4767_v29 = vld [vmem:[#allocation2 + $0x28] sm:$0xff] }
 0x7ca   : > { %v4729_v42 = vadd.f32 %v7325_v63, %v9350_v46  ;;  %v4723_v34 = vpop.f32.mrb[129].mxu1 }
 0x7cb   : > { %v4724_v18 = vadd.f32 %v9350_v46, %v4723_v34  ;;  %6738 = vmatprep.subr.bf16.mxu1 %v4781_v58  ;;  %v4768_v34 = vld [vmem:[#allocation2 + $0x30] sm:$0xff] }
 0x7cc   : > { %6739 = vmatpush3.bf16.msra.mxu1 %v4773_v17  ;;  %v1978_v17 = vld [vmem:[#allocation6] sm:$0xff] }
 0x7cd   : > { %v4782_v5 = vpack.c.bf16 %v4729_v42, %v4724_v18  ;;  %v7328_v19 = vpop.f32.mrb[130].mxu1  ;;  %vm2002_vm9 = vcmp.eq.s32.totalorder %v1978_v17, %v9344_v11  ;;  %v4954_v17 = vld [vmem:[%s9721_s28 + $0x10] sm:$0xff] (!%p6400_p13) }
 0x7ce   : > { %v4739_v47 = vadd.f32 %v7328_v19, %v9350_v46  ;;  %v4733_v48 = vpop.f32.mrb[131].mxu1  ;;  %vm6386_vm13 = vmpackc.low %vm2004_vm10, %vm2002_vm9  ;;  %vm2015_vm10 = vcmp.eq.s32.totalorder %v1991_v36, %v9342_v59  ;;  %v4871_v36 = vld [vmem:[%s8072_s21] sm:$0xff] (!%p6400_p13) }
 0x7cf   : > { %v4734_v32 = vadd.f32 %v9350_v46, %v4733_v48  ;;  %6740 = vmatprep.subr.bf16.mxu1 %v4782_v5 }
 0x7d0   : > { %6741 = vmatpush3.bf16.msra.mxu1 %v4774_v2 }
 0x7d1   : > { %v4783_v6 = vpack.c.bf16 %v4739_v47, %v4734_v32  ;;  %v7331_v7 = vpop.f32.mrb[132].mxu1  ;;  %v4769_v47 = vld [vmem:[#allocation2 + $0x38] sm:$0xff] }
 0x7d2   : > { %v4749_v54 = vadd.f32 %v7331_v7, %v9350_v46  ;;  %v4743_v55 = vpop.f32.mrb[133].mxu1 }
 0x7d3   : > { %v4744_v12 = vadd.f32 %v9350_v46, %v4743_v55  ;;  %6742 = vmatprep.subr.bf16.mxu1 %v4783_v6  ;;  %v4895_v55 = vld [vmem:[%s9719_s11] sm:$0xff] (!%p6400_p13) }
 0x7d4   : > { %6743 = vmatpush3.bf16.msra.mxu1 %v4775_v25  ;;  %v1988_v25 = vld [vmem:[#allocation6 + $0x50] sm:$0xff] }
 0x7d5   : > { %v4784_v39 = vpack.c.bf16 %v4749_v54, %v4744_v12  ;;  %v7334_v60 = vpop.f32.mrb[134].mxu1  ;;  %vm2012_vm9 = vcmp.eq.s32.totalorder %v1988_v25, %v9344_v11  ;;  %v4897_v54 = vld [vmem:[%s9718_s22 + $0x10] sm:$0xff] (!%p6400_p13)  ;;  %v8035_v12 = vmov (!%p6400_p13), 0   ;;  %v4959_v25 = vld [vmem:[%s9721_s28 + $0x38] sm:$0xff] (!%p6400_p13)  ;;  %s9727_s22 = sld [smem:[#allocation33_spill]] (!%p6400_p13) }
 0x7d6   : > { %v4759_v61 = vadd.f32 %v7334_v60, %v9350_v46  ;;  %v4753_v13 = vpop.f32.mrb[135].mxu1  ;;  %vm6394_vm12 = vmpackc.low %vm2012_vm9, %vm2010_vm8  ;;  %7870 = vset.pattern.permute.xlu1 (!%p6400_p13), %v8035_v12  ;;  %7869 = vset.pattern.permute.xlu0 (!%p6400_p13), %v8035_v12  ;;  %v4896_v60 = vld [vmem:[%s9719_s11 + $0x8] sm:$0xff] (!%p6400_p13) }
 0x7d7   : > { %v4754_v15 = vadd.f32 %v9350_v46, %v4753_v13  ;;  %6744 = vmatprep.subr.bf16.mxu1 %v4784_v39  ;;  %v1982_v46 = vld [vmem:[#allocation6 + $0x20] sm:$0xff]  ;;  %4915 = vperm.xlu1 (!%p6400_p13), %7870, %v4897_v54   ;;  %v4898_v39 = vld [vmem:[%s9719_s11 + $0x18] sm:$0xff] (!%p6400_p13)  ;;  %v4953_v13 = vld [vmem:[%s9721_s28 + $0x8] sm:$0xff] (!%p6400_p13) }
 0x7d8   : > { %6745 = vmatpush3.bf16.msra.mxu1 %v4776_v57  ;;  %vm2006_vm15 = vcmp.eq.s32.totalorder %v1982_v46, %v9344_v11  ;;  %4905 = vperm.xlu0 (!%p6400_p13), %7869, %v4895_v55   ;;  %v4900_v46 = vld [vmem:[%s9719_s11 + $0x28] sm:$0xff] (!%p6400_p13) }
 0x7d9   : > { %v4785_v2 = vpack.c.bf16 %v4759_v61, %v4754_v15  ;;  %vm6390_vm6 = vmpackc.low %vm2008_vm0, %vm2006_vm15  ;;  %vm2016_vm15 = vcmp.eq.s32.totalorder %v1992_v51, %v9344_v11  ;;  %v4952_v61 = vld [vmem:[%s9720_s15] sm:$0xff] (!%p6400_p13)  ;;  %v4955_v15 = vld [vmem:[%s9721_s28 + $0x18] sm:$0xff] (!%p6400_p13)  ;;  %s9729_s15 = sld [smem:[#allocation31_spill]] (!%p6400_p13) }
 0x7da   : > { %v7557_v20 = vpack.c.bf16 (!%p6400_p13), %v4953_v13, %v4952_v61  ;;  %v7561_v62 = vpack.c.bf16 (!%p6400_p13), %v4955_v15, %v4954_v17  ;;  %v4901_v51 = vld [vmem:[%s9719_s11 + $0x30] sm:$0xff] (!%p6400_p13)  ;;  %v4879_v61 = vld [vmem:[#allocation3] sm:$0xff] (!%p6400_p13)  ;;  %v4880_v13 = vld [vmem:[#allocation3 + $0x8] sm:$0xff] (!%p6400_p13) }
 0x7db   : > { %6746 = vmatprep.subr.bf16.mxu1 %v4785_v2  ;;  %4920 = vperm.xlu1 (!%p6400_p13), %7870, %v4898_v39   ;;  %v4957_v2 = vld [vmem:[%s9721_s28 + $0x28] sm:$0xff] (!%p6400_p13)  ;;  %v4881_v17 = vld [vmem:[#allocation3 + $0x10] sm:$0xff] (!%p6400_p13)  ;;  %v4883_v15 = vld [vmem:[#allocation3 + $0x20] sm:$0xff] (!%p6400_p13)  ;;  %s9728_s1 = smov (!%p6400_p13), %s9727_s22 }
 0x7dc   : > { %6747 = vmatpush3.bf16.msra.mxu1 %v4777_v41  ;;  %4910 = vperm.xlu0 (!%p6400_p13), %7869, %v4896_v60   ;;  %v7565_v8 = vpack.c.bf16 (!%p6400_p13), %v4957_v2, %v4956_v10  ;;  %v4885_v10 = vld [vmem:[#allocation3 + $0x30] sm:$0xff] (!%p6400_p13)  ;;  %v4886_v2 = vld [vmem:[#allocation3 + $0x38] sm:$0xff] (!%p6400_p13) }
 0x7dd   : > { %7558 = vmatprep.subr.bf16.mxu0 (!%p6400_p13), %v7557_v20  ;;  %7379 = vmatprep.subr.mxu1 (!%p6400_p13), %v4951_v30 }
 0x7de   : > { %7560 = vmatpush3.bf16.msra.mxu0 (!%p6400_p13), %v7557_v20  ;;  %v4882_v20 = vld [vmem:[#allocation3 + $0x18] sm:$0xff] (!%p6400_p13) }
 0x7df   : > { %6387 = vmatmul.mubr.msk.bf16.vlgmr.msra.gmra.mrb[136].mxu1 %vm6386_vm13, %v8034_v16  ;;  %vm6396_vm13 = vmpackc.low %vm2017_vm11, %vm2015_vm10  ;;  %7562 = vmatprep.subr.bf16.mxu0 (!%p6400_p13), %v7561_v62 }
 0x7e0   : > { %6389 = vmatprep.mubr.msk.bf16.mxu1 %vm6388_vm14, %v8034_v16  ;;  %vm2014_vm14 = vcmp.eq.s32.totalorder %v1990_v56, %v9344_v11  ;;  %4930 = vperm.xlu1 (!%p6400_p13), %7870, %v4900_v46   ;;  %v4902_v56 = vld [vmem:[%s9719_s11 + $0x38] sm:$0xff] (!%p6400_p13) }
 0x7e1   : > { %vm6398_vm0 = vmpackc.low %vm2016_vm15, %vm2014_vm14  ;;  %4925 = vperm.xlu0 (!%p6400_p13), %7869, %v4899_v53   ;;  %7380 = vmatpush3.msra.mxu1 (!%p6400_p13), %v4951_v30  ;;  %v5363_v30 = vld [vmem:[%s9725_s2] sm:$0xff] (!%p6400_p13) }
 0x7e2   : > { %7564 = vmatpush3.bf16.msra.mxu0 (!%p6400_p13), %v7561_v62  ;;  %v4884_v62 = vld [vmem:[#allocation3 + $0x28] sm:$0xff] (!%p6400_p13) }
 0x7e3   : > { %7566 = vmatprep.subr.bf16.mxu0 (!%p6400_p13), %v7565_v8 }
 0x7e4   : > { %4940 = vperm.xlu1 (!%p6400_p13), %7870, %v4902_v56  }
 0x7e5   : > { %4935 = vperm.xlu0 (!%p6400_p13), %7869, %v4901_v51  }
 0x7e6   : > { %7568 = vmatpush3.bf16.msra.mxu0 (!%p6400_p13), %v7565_v8 }
 0x7e7   : > { %6391 = vmatmul.mubr.msk.bf16.gmra.mrb[140].mxu1 %vm6390_vm6, %v8034_v16 }
 0x7e8   : > { %6393 = vmatprep.mubr.msk.bf16.mxu1 %vm6392_vm7, %v8034_v16 }
 0x7ef   : > { %6395 = vmatmul.mubr.msk.bf16.gmra.mrb[144].mxu1 %vm6394_vm12, %v8034_v16 }
 0x7f0   : > { %6397 = vmatprep.mubr.msk.bf16.mxu1 %vm6396_vm13, %v8034_v16 }
 0x7f7   : > { %6399 = vmatmul.mubr.msk.bf16.gmra.mrb[148].mxu1 %vm6398_vm0, %v8034_v16 }
 0x7f8   : > { %7381 = vmatprep.mubr.msk.f32.mxu1 (!%p6400_p13), %vm3209_vm3, %v4871_v36 }
 0x7ff   : > { %7382 = vmatmul.mubr.msk.f32.vlgmr.msra.gmra.mrb[0].mxu1 (!%p6400_p13), %vm3209_vm3, %v4872_v23 }
 0x8b2   : > { %v6748_v57 = vpop.f32.mrb[136].mxu1 }
 0x8b3   : > { %v6749_v9 = vpop.f32.mrb[137].mxu1 }
 0x8b4   : > { %v6750_v21 = vadd.f32 %v6749_v9, %v6748_v57  ;;  %v6751_v59 = vpop.f32.mrb[138].mxu1  ;;  %v4873_v57 = vld [vmem:[%s8072_s21 + $0x10] sm:$0xff] (!%p6400_p13)  ;;  %v4960_v9 = vld [vmem:[%s9721_s28 + $0x40] sm:$0xff] (!%p6400_p13) }
 0x8b5   : > { %v6752_v41 = vpop.f32.mrb[139].mxu1  ;;  %7384 = vmatprep.mubr.msk.f32.mxu1 (!%p6400_p13), %vm3209_vm3, %v4873_v57 }
 0x8b6   : > { %v4851_v26 = vadd.f32 %v6750_v21, %v4762_v35  ;;  %v6753_v33 = vadd.f32 %v6752_v41, %v6751_v59  ;;  %v7569_v35 = vpack.c.bf16 (!%p6400_p13), %v4959_v25, %v4958_v40  ;;  %v4961_v21 = vld [vmem:[%s9721_s28 + $0x48] sm:$0xff] (!%p6400_p13)  ;;  %v4874_v59 = vld [vmem:[%s8072_s21 + $0x18] sm:$0xff] (!%p6400_p13)  ;;  %v4875_v41 = vld [vmem:[%s8072_s21 + $0x20] sm:$0xff] (!%p6400_p13) }
 0x8b7   : > { %7385 = vmatmul.mubr.msk.f32.gmra.mrb[2].mxu1 (!%p6400_p13), %vm3209_vm3, %v4874_v59  ;;  %v5364_v25 = vld [vmem:[%s9725_s2 + $0x8] sm:$0xff] (!%p6400_p13) }
 0x8b8   : > { %4859 = vst [vmem:[#allocation2] sm:$0xff] %v4851_v26  ;;  %v4852_v37 = vadd.f32 %v6753_v33, %v4763_v4  ;;  %v5594_v4 = vld [vmem:[%s9723_s23] sm:$0xf] (!%p6400_p13)  ;;  %7570 = vmatprep.subr.bf16.mxu0 (!%p6400_p13), %v7569_v35  ;;  %v7573_v26 = vpack.c.bf16 (!%p6400_p13), %v4961_v21, %v4960_v9  ;;  %v4962_v33 = vld [vmem:[%s9721_s28 + $0x50] sm:$0xff] (!%p6400_p13)  ;;  %7387 = vmatprep.mubr.msk.f32.mxu1 (!%p6400_p13), %vm3209_vm3, %v4875_v41  ;;  %v5366_v9 = vld [vmem:[%s9725_s2 + $0x18] sm:$0xff] (!%p6400_p13)  ;;  %s9730_s23 = sld [smem:[#allocation17_spill]] (!%p6400_p13) }
 0x8b9   : > { %5597 = vperm.xlu0 (!%p6400_p13), %7869, %v5594_v4   ;;  %7572 = vmatpush3.bf16.msra.mxu0 (!%p6400_p13), %v7569_v35  ;;  %v7589_v36 = vpack.c.bf16 (!%p6400_p13), %v5364_v25, %v5363_v30  ;;  %v5365_v35 = vld [vmem:[%s9725_s2 + $0x10] sm:$0xff] (!%p6400_p13) }
 0x8ba   : > { %4860 = vst [vmem:[#allocation2 + $0x8] sm:$0xff] %v4852_v37  ;;  %v6754_v27 = vpop.f32.mrb[140].mxu1  ;;  %v4963_v37 = vld [vmem:[%s9721_s28 + $0x58] sm:$0xff] (!%p6400_p13)  ;;  %7574 = vmatprep.subr.bf16.mxu0 (!%p6400_p13), %v7573_v26  ;;  %v7593_v21 = vpack.c.bf16 (!%p6400_p13), %v5366_v9, %v5365_v35  ;;  %v5605_v30 = vld [vmem:[%s9728_s1 + $0x10] sm:$0xff] (!%p6400_p13) }
 0x8bb   : > { %v6755_v28 = vpop.f32.mrb[141].mxu1  ;;  %7590 = vmatprep.subr.bf16.mxu1 (!%p6400_p13), %v7589_v36  ;;  %v5609_v35 = vld [vmem:[%s9728_s1 + $0x30] sm:$0xff] (!%p6400_p13)  ;;  %v5610_v9 = vld [vmem:[%s9728_s1 + $0x38] sm:$0xff] (!%p6400_p13) }
 0x8bc   : > { %v6756_v22 = vadd.f32 %v6755_v28, %v6754_v27  ;;  %v6757_v11 = vpop.f32.mrb[142].mxu1  ;;  %v4876_v27 = vld [vmem:[%s8072_s21 + $0x28] sm:$0xff] (!%p6400_p13)  ;;  %v7577_v28 = vpack.c.bf16 (!%p6400_p13), %v4963_v37, %v4962_v33  ;;  %7592 = vmatpush3.bf16.msra.mxu1 (!%p6400_p13), %v7589_v36  ;;  %v5606_v36 = vld [vmem:[%s9728_s1 + $0x18] sm:$0xff] (!%p6400_p13) }
 0x8bd   : > { %v6758_v0 = vpop.f32.mrb[143].mxu1  ;;  %7388 = vmatmul.mubr.msk.f32.gmra.mrb[4].mxu1 (!%p6400_p13), %vm3209_vm3, %v4876_v27  ;;  %7576 = vmatpush3.bf16.msra.mxu0 (!%p6400_p13), %v7573_v26 }
 0x8be   : > { %v4853_v16 = vadd.f32 %v6756_v22, %v4764_v38  ;;  %v6759_v24 = vadd.f32 %v6758_v0, %v6757_v11  ;;  %v4877_v38 = vld [vmem:[%s8072_s21 + $0x30] sm:$0xff] (!%p6400_p13)  ;;  %v4964_v22 = vld [vmem:[%s9721_s28 + $0x60] sm:$0xff] (!%p6400_p13)  ;;  %v4965_v11 = vld [vmem:[%s9721_s28 + $0x68] sm:$0xff] (!%p6400_p13)  ;;  %7578 = vmatprep.subr.bf16.mxu0 (!%p6400_p13), %v7577_v28  ;;  %7594 = vmatprep.subr.bf16.mxu1 (!%p6400_p13), %v7593_v21 }
 0x8bf   : > { %7390 = vmatprep.mubr.msk.f32.mxu1 (!%p6400_p13), %vm3209_vm3, %v4877_v38  ;;  %v7581_v0 = vpack.c.bf16 (!%p6400_p13), %v4965_v11, %v4964_v22 }
 0x8c0   : > { %4861 = vst [vmem:[#allocation2 + $0x10] sm:$0xff] %v4853_v16  ;;  %v4854_v3 = vadd.f32 %v6759_v24, %v4765_v50  ;;  %v4878_v50 = vld [vmem:[%s8072_s21 + $0x38] sm:$0xff] (!%p6400_p13)  ;;  %v4966_v16 = vld [vmem:[%s9721_s28 + $0x70] sm:$0xff] (!%p6400_p13)  ;;  %7596 = vmatpush3.bf16.msra.mxu1 (!%p6400_p13), %v7593_v21  ;;  %v7619_v21 = vpack.c.bf16 (!%p6400_p13), %v5610_v9, %v5609_v35 }
 0x8c1   : > { %7391 = vmatmul.mubr.msk.f32.gmra.mrb[6].mxu1 (!%p6400_p13), %vm3209_vm3, %v4878_v50  ;;  %v4967_v24 = vld [vmem:[%s9721_s28 + $0x78] sm:$0xff] (!%p6400_p13)  ;;  %7580 = vmatpush3.bf16.msra.mxu0 (!%p6400_p13), %v7577_v28 }
 0x8c2   : > { %4862 = vst [vmem:[#allocation2 + $0x18] sm:$0xff] %v4854_v3  ;;  %v6760_v49 = vpop.f32.mrb[144].mxu1  ;;  %7582 = vmatprep.subr.bf16.mxu0 (!%p6400_p13), %v7581_v0  ;;  %v7585_v3 = vpack.c.bf16 (!%p6400_p13), %v4967_v24, %v4966_v16 }
 0x8c3   : > { %v6761_v44 = vpop.f32.mrb[145].mxu1 }
 0x8c4   : > { %v6762_v52 = vadd.f32 %v6761_v44, %v6760_v49  ;;  %v6763_v31 = vpop.f32.mrb[146].mxu1  ;;  %v5202_v49 = vld [vmem:[%s9724_s18] sm:$0xff] (!%p6400_p13)  ;;  %v4916_v44 = vpop.permute.xlu1 (!%p6400_p13), %4915  ;;  %s9731_s18 = sld [smem:[#allocation32_spill]] (!%p6400_p13) }
 0x8c5   : > { %v6764_v14 = vpop.f32.mrb[147].mxu1  ;;  %7584 = vmatpush3.bf16.msra.mxu0 (!%p6400_p13), %v7581_v0 }
 0x8c6   : > { %v4855_v45 = vadd.f32 %v6762_v52, %v4766_v1  ;;  %v6765_v58 = vadd.f32 %v6764_v14, %v6763_v31  ;;  %7586 = vmatprep.subr.bf16.mxu0 (!%p6400_p13), %v7585_v3  ;;  %v4887_v1 = vld [vmem:[#allocation2] sm:$0xff] (!%p6400_p13)  ;;  %v4906_v52 = vpop.permute.xlu0 (!%p6400_p13), %4905  ;;  %v4888_v14 = vld [vmem:[#allocation2 + $0x8] sm:$0xff] (!%p6400_p13) }
 0x8c7   : > { %v4889_v31 = vld [vmem:[#allocation2 + $0x10] sm:$0xff] (!%p6400_p13) }
 0x8c8   : > { %4863 = vst [vmem:[#allocation2 + $0x20] sm:$0xff] %v4855_v45  ;;  %v4856_v63 = vadd.f32 %v6765_v58, %v4767_v29  ;;  %v4943_v29 = vmul.f32 (!%p6400_p13), %v4906_v52, %v4887_v1  ;;  %v4945_v45 = vmul.f32 (!%p6400_p13), %v4916_v44, %v4889_v31  ;;  %v4921_v58 = vpop.permute.xlu1 (!%p6400_p13), %4920  ;;  %v6417_v1 = vld [vmem:[%s9726_s10] ss:$0 sm:$0xff] (!%p6400_p13)  ;;  %s9732_s10 = sld [smem:[#allocation35_spill]] (!%p6400_p13) }
 0x8c9   : > { %7588 = vmatpush3.bf16.msra.mxu0 (!%p6400_p13), %v7585_v3 }
 0x8ca   : > { %4864 = vst [vmem:[#allocation2 + $0x28] sm:$0xff] %v4856_v63  ;;  %v6766_v42 = vpop.f32.mrb[148].mxu1  ;;  %7393 = vmatprep.subr.mxu0 (!%p6400_p13), %v5202_v49  ;;  %7367 = vmatprep.mubr.f32.mxu0 (!%p6400_p13), %v4943_v29  ;;  %v4911_v63 = vpop.permute.xlu0 (!%p6400_p13), %4910 }
 0x8cb   : > { %v6767_v18 = vpop.f32.mrb[149].mxu1 }
 0x8cc   : > { %v6768_v5 = vadd.f32 %v6767_v18, %v6766_v42  ;;  %v6769_v19 = vpop.f32.mrb[150].mxu1  ;;  %4870 = sbr.rel (%p6400_p13) target bundleno = 3375 (0xd2f), region = 156  ;;  %v4944_v42 = vmul.f32 (!%p6400_p13), %v4911_v63, %v4888_v14 }
 0x8cd   : > { %v6770_v48 = vpop.f32.mrb[151].mxu1 }
 0x8ce   : > { %v4857_v32 = vadd.f32 %v6768_v5, %v4768_v34  ;;  %v6771_v6 = vadd.f32 %v6770_v48, %v6769_v19  ;;  %v4890_v34 = vld [vmem:[#allocation2 + $0x18] sm:$0xff] (!%p6400_p13)  ;;  %7368 = vmatmul.mubr.f32.vlgmr.msra.gmra.mrb[0].mxu0 (!%p6400_p13), %v4944_v42  ;;  %v4931_v5 = vpop.permute.xlu1 (!%p6400_p13), %4930  ;;  %v4926_v19 = vpop.permute.xlu0 (!%p6400_p13), %4925 }
 0x8cf   : > { %v4891_v18 = vld [vmem:[#allocation2 + $0x20] sm:$0xff] (!%p6400_p13)  ;;  %7370 = vmatprep.mubr.f32.mxu0 (!%p6400_p13), %v4945_v45  ;;  %7394 = vmatpush3.msra.mxu0 (!%p6400_p13), %v5202_v49 }
 0x8d0   : > { %4865 = vst [vmem:[#allocation2 + $0x30] sm:$0xff] %v4857_v32  ;;  %v4858_v7 = vadd.f32 %v6771_v6, %v4769_v47  ;;  %v4946_v47 = vmul.f32 (!%p6400_p13), %v4921_v58, %v4890_v34  ;;  %v4947_v48 = vmul.f32 (!%p6400_p13), %v4926_v19, %v4891_v18 }
 0x8d1   : > { %v4892_v32 = vld [vmem:[#allocation2 + $0x28] sm:$0xff] (!%p6400_p13) }
 0x8d2   : > { %4866 = vst [vmem:[#allocation2 + $0x38] sm:$0xff] %v4858_v7  ;;  %7371 = vmatmul.mubr.f32.gmra.mrb[2].mxu0 (!%p6400_p13), %v4946_v47  ;;  %v4936_v7 = vpop.permute.xlu0 (!%p6400_p13), %4935  ;;  %v4948_v54 = vmul.f32 (!%p6400_p13), %v4931_v5, %v4892_v32  ;;  %v4941_v12 = vpop.permute.xlu1 (!%p6400_p13), %4940 }
 0x8d3   : > { %7373 = vmatprep.mubr.f32.mxu0 %v4947_v48  ;;  %v7383_v46 = vpop.f32.mrb[0].mxu1 }
 0x8d4   : > { %v5163_v53 = vpop.f32.mrb[1].mxu1 }
 0x8d6   : > { %7374 = vmatmul.mubr.f32.gmra.mrb[4].mxu0 %v4948_v54 }
 0x8d7   : > { %v4893_v6 = vld [vmem:[#allocation2 + $0x30] sm:$0xff] }
 0x8d8   : > { %v4949_v55 = vmul.f32 %v4936_v7, %v4893_v6 }
 0x8d9   : > { %v4894_v39 = vld [vmem:[#allocation2 + $0x38] sm:$0xff] }
 0x8da   : > { %7376 = vmatprep.mubr.f32.mxu0 %v4949_v55  ;;  %v4950_v60 = vmul.f32 %v4941_v12, %v4894_v39 }
 0x8dc   : > { %7377 = vmatmul.mubr.f32.gmra.mrb[6].mxu0 %v4950_v60 }
 0x8dd   : > { %7395 = vmatprep.mubr.msk.f32.mxu0 %vm3209_vm3, %v4879_v61 }
 0x8e0   : > { %7396 = vmatmul.mubr.msk.f32.vlgmr.msra.gmra.mrb[8].mxu0 %vm3209_vm3, %v4880_v13 }
 0x8e1   : > { %7398 = vmatprep.mubr.msk.f32.mxu0 %vm3209_vm3, %v4881_v17 }
 0x8e4   : > { %7399 = vmatmul.mubr.msk.f32.gmra.mrb[10].mxu0 %vm3209_vm3, %v4882_v20 }
 0x8e5   : > { %7401 = vmatprep.mubr.msk.f32.mxu0 %vm3209_vm3, %v4883_v15 }
 0x8e8   : > { %7402 = vmatmul.mubr.msk.f32.gmra.mrb[12].mxu0 %vm3209_vm3, %v4884_v62 }
 0x8e9   : > { %7404 = vmatprep.mubr.msk.f32.mxu0 %vm3209_vm3, %v4885_v10 }
 0x8ec   : > { %7405 = vmatmul.mubr.msk.f32.gmra.mrb[14].mxu0 %vm3209_vm3, %v4886_v2 }
 0x98a   : > { %v7386_v8 = vpop.f32.mrb[2].mxu1 }
 0x98b   : > { %v5173_v40 = vpop.f32.mrb[3].mxu1 }
 0x990   : > { %v7389_v23 = vpop.f32.mrb[4].mxu1 }
 0x991   : > { %v5183_v56 = vpop.f32.mrb[5].mxu1 }
 0x994   : > { %v7392_v51 = vpop.f32.mrb[6].mxu1 }
 0x995   : > { %v5193_v57 = vpop.f32.mrb[7].mxu1 }
 0x9a1   : > { %v7369_v59 = vpop.f32.mrb[0].mxu0 }
 0x9a2   : > { %v5169_v4 = vadd.f32 %v7383_v46, %v7369_v59  ;;  %v5034_v41 = vpop.f32.mrb[1].mxu0  ;;  %v8036_v46 = vmov 0.0|0.0   ;;  %v5611_v59 = vld [vmem:[%s9728_s1 + $0x40] sm:$0xff] }
 0x9a3   : > { %v5164_v26 = vadd.f32 %v5163_v53, %v5034_v41  ;;  %7597 = vmatprep.subr.bf16.mxu0 %v8036_v46  ;;  %7609 = vmatprep.subr.bf16.mxu1 %v8036_v46  ;;  %v8038_v53 = vmov 0.0  }
 0x9a4   : > { %7443 = vmatprep.mubr.msk.f32.mxu0 %vm8037_vm2, %v8038_v53 }
 0x9a5   : > { %v7372_v33 = vpop.f32.mrb[2].mxu0 }
 0x9a6   : > { %v5179_v37 = vadd.f32 %v7386_v8, %v7372_v33  ;;  %v5044_v27 = vpop.f32.mrb[3].mxu0  ;;  %v5603_v8 = vld [vmem:[%s9727_s22] sm:$0xff]  ;;  %v5614_v33 = vld [vmem:[%s9728_s1 + $0x58] sm:$0xff]  ;;  %s9733_s22 = sld [smem:[#allocation34_spill]] }
 0x9a7   : > { %v5174_v38 = vadd.f32 %v5173_v40, %v5044_v27  ;;  %v5604_v40 = vld [vmem:[%s9728_s1 + $0x8] sm:$0xff]  ;;  %v5615_v27 = vld [vmem:[%s9728_s1 + $0x60] sm:$0xff] }
 0x9a8   : > { %v7610_v25 = vpack.c.bf16 %v5604_v40, %v5603_v8 }
 0x9a9   : > { %v7375_v28 = vpop.f32.mrb[4].mxu0 }
 0x9aa   : > { %v5189_v22 = vadd.f32 %v7389_v23, %v7375_v28  ;;  %v5054_v11 = vpop.f32.mrb[5].mxu0  ;;  %v7613_v23 = vpack.c.bf16 %v5606_v36, %v5605_v30 }
 0x9ab   : > { %v5184_v50 = vadd.f32 %v5183_v56, %v5054_v11  ;;  %v5607_v56 = vld [vmem:[%s9728_s1 + $0x20] sm:$0xff] }
 0x9ac   : > { %v6431_v8 = vld [vmem:[%s9733_s22] ss:$0 sm:$0xff] }
 0x9af   : > { %v7378_v0 = vpop.f32.mrb[6].mxu0 }
 0x9b0   : > { %v5199_v16 = vadd.f32 %v7392_v51, %v7378_v0  ;;  %v5064_v24 = vpop.f32.mrb[7].mxu0  ;;  %v5608_v51 = vld [vmem:[%s9728_s1 + $0x28] sm:$0xff] }
 0x9b1   : > { %v5194_v3 = vadd.f32 %v5193_v57, %v5064_v24  ;;  %v7616_v57 = vpack.c.bf16 %v5608_v51, %v5607_v56 }
 0x9b3   : > { %v7397_v49 = vpop.f32.mrb[8].mxu0 }
 0x9b4   : > { %v5333_v44 = vadd.f32 %v7397_v49, %v5169_v4  ;;  %v5293_v52 = vpop.f32.mrb[9].mxu0  ;;  %v5612_v4 = vld [vmem:[%s9728_s1 + $0x48] sm:$0xff] }
 0x9b5   : > { %v5332_v31 = vadd.f32 %v5293_v52, %v5164_v26  ;;  %v7622_v41 = vpack.c.bf16 %v5612_v4, %v5611_v59  ;;  %v5613_v26 = vld [vmem:[%s9728_s1 + $0x50] sm:$0xff] }
 0x9b6   : > { %v5348_v29 = vadd.f32 %v6417_v1, %v5333_v44 }
 0x9b7   : > { %v5347_v14 = vadd.f32 %v6417_v1, %v5332_v31  ;;  %v7400_v45 = vpop.f32.mrb[10].mxu0 }
 0x9b8   : > { %v5335_v58 = vadd.f32 %v7400_v45, %v5179_v37  ;;  %v5303_v63 = vpop.f32.mrb[11].mxu0  ;;  %v5356_v18 = vmax.f32 %v5348_v29, 0.0  ;;  %v7625_v37 = vpack.c.bf16 %v5614_v33, %v5613_v26 }
 0x9b9   : > { %v5355_v42 = vmax.f32 %v5347_v14, 0.0  ;;  %v5334_v34 = vadd.f32 %v5303_v63, %v5174_v38  ;;  %v5616_v38 = vld [vmem:[%s9728_s1 + $0x68] sm:$0xff] }
 0x9ba   : > { %v5350_v5 = vadd.f32 %v6417_v1, %v5335_v58  ;;  %v7628_v28 = vpack.c.bf16 %v5616_v38, %v5615_v27 }
 0x9bb   : > { %v5349_v19 = vadd.f32 %v6417_v1, %v5334_v34  ;;  %v7403_v47 = vpop.f32.mrb[12].mxu0  ;;  %7415 = vmatprep.mubr.msk.f32.mxu1 %vm3537_vm5, %v5355_v42  ;;  %v6427_v42 = vld [vmem:[%s9730_s23] ss:$0 sm:$0xff] }
 0x9bc   : > { %v5337_v48 = vadd.f32 %v7403_v47, %v5189_v22  ;;  %v5313_v32 = vpop.f32.mrb[13].mxu0  ;;  %7416 = vmatmul.mubr.msk.f32.vlgmr.msra.gmra.mrb[8].mxu1 %vm3537_vm5, %v5356_v18  ;;  %v5358_v54 = vmax.f32 %v5350_v5, 0.0  ;;  %v6418_v22 = vld [vmem:[%s9729_s15] ss:$0 sm:$0xff]  ;;  %vm5518_vm4 = vcmp.eq.s32.totalorder %v9335_v43, %v6427_v42 }
 0x9bd   : > { %v5357_v6 = vmax.f32 %v5349_v19, 0.0  ;;  %v5336_v7 = vadd.f32 %v5313_v32, %v5184_v50  ;;  %7611 = vmatpush3.bf16.msra.mxu1 %v7610_v25  ;;  %v6428_v47 = vsel %vm5518_vm4, 1.0, %v8038_v53  ;;  %v5618_v32 = vld [vmem:[%s9728_s1 + $0x78] sm:$0xff] }
 0x9be   : > { %v5352_v55 = vadd.f32 %v6417_v1, %v5337_v48  ;;  %7612 = vmatprep.subr.bf16.mxu1 %v8036_v46  ;;  %v5617_v48 = vld [vmem:[%s9728_s1 + $0x70] sm:$0xff] }
 0x9bf   : > { %v5351_v12 = vadd.f32 %v6417_v1, %v5336_v7  ;;  %v7406_v39 = vpop.f32.mrb[14].mxu0  ;;  %7418 = vmatprep.mubr.msk.f32.mxu1 %vm3537_vm5, %v5357_v6  ;;  %v7631_v6 = vpack.c.bf16 %v5618_v32, %v5617_v48  ;;  %v5598_v7 = vpop.permute.xlu0 %5597 }
 0x9c0   : > { %v5339_v60 = vadd.f32 %v7406_v39, %v5199_v16  ;;  %v5323_v61 = vpop.f32.mrb[15].mxu0  ;;  %7419 = vmatmul.mubr.msk.f32.gmra.mrb[10].mxu1 %vm3537_vm5, %v5358_v54  ;;  %v5360_v20 = vmax.f32 %v5352_v55, 0.0  ;;  %v5601_v39 = vld [vmem:[%s8077_s25] sm:$0xf] }
 0x9c1   : > { %v5359_v13 = vmax.f32 %v5351_v12, 0.0  ;;  %v5338_v17 = vadd.f32 %v5323_v61, %v5194_v3  ;;  %7614 = vmatpush3.bf16.msra.mxu1 %v7613_v23  ;;  %v5602_v12 = vld [vmem:[%s9731_s18] sm:$0xff]  ;;  %v5772_v61 = vld [vmem:[%s9732_s10 + $0x8] sm:$0xff] }
 0x9c2   : > { %v5354_v15 = vadd.f32 %v6417_v1, %v5339_v60  ;;  %7615 = vmatprep.subr.bf16.mxu1 %v8036_v46  ;;  %v5771_v60 = vld [vmem:[%s9732_s10] sm:$0xff] }
 0x9c3   : > { %v5353_v62 = vadd.f32 %v6417_v1, %v5338_v17  ;;  %7421 = vmatprep.mubr.msk.f32.mxu1 %vm3537_vm5, %v5359_v13  ;;  %v7634_v13 = vpack.c.bf16 %v5772_v61, %v5771_v60  ;;  %v5773_v17 = vld [vmem:[%s9732_s10 + $0x10] sm:$0xff] }
 0x9c4   : > { %7422 = vmatmul.mubr.msk.f32.gmra.mrb[12].mxu1 %vm3537_vm5, %v5360_v20  ;;  %v5362_v2 = vmax.f32 %v5354_v15, 0.0  ;;  %v5774_v20 = vld [vmem:[%s9732_s10 + $0x18] sm:$0xff] }
 0x9c5   : > { %v5361_v10 = vmax.f32 %v5353_v62, 0.0  ;;  %7617 = vmatpush3.bf16.msra.mxu1 %v7616_v57  ;;  %v7637_v15 = vpack.c.bf16 %v5774_v20, %v5773_v17 }
 0x9c6   : > { %7618 = vmatprep.subr.bf16.mxu1 %v8036_v46 }
 0x9c7   : > { %7424 = vmatprep.mubr.msk.f32.mxu1 %vm3537_vm5, %v5361_v10 }
 0x9c8   : > { %7425 = vmatmul.mubr.msk.f32.gmra.mrb[14].mxu1 %vm3537_vm5, %v5362_v2 }
 0x9c9   : > { %7478 = vmatprep.mubr.msk.f32.mxu1 %vm8037_vm2, %v8038_v53  ;;  %7620 = vmatpush3.bf16.msra.mxu1 %v7619_v21 }
 0x9ca   : > { %7621 = vmatprep.subr.bf16.mxu1 %v8036_v46 }
 0x9cd   : > { %7623 = vmatpush3.bf16.msra.mxu1 %v7622_v41 }
 0x9ce   : > { %7624 = vmatprep.subr.bf16.mxu1 %v8036_v46 }
 0x9d1   : > { %7626 = vmatpush3.bf16.msra.mxu1 %v7625_v37 }
 0x9d2   : > { %7627 = vmatprep.subr.bf16.mxu1 %v8036_v46 }
 0x9d5   : > { %7629 = vmatpush3.bf16.msra.mxu1 %v7628_v28 }
 0x9d6   : > { %7630 = vmatprep.subr.bf16.mxu1 %v8036_v46 }
 0x9d9   : > { %7632 = vmatpush3.bf16.msra.mxu1 %v7631_v6 }
 0x9da   : > { %7481 = vmatprep.subr.mxu1 %v8038_v53 }
 0xa8f   : > { %v7417_v11 = vpop.f32.mrb[8].mxu1 }
 0xa90   : > { %v5470_v50 = vadd.f32 %v7417_v11, %v6418_v22  ;;  %v5464_v0 = vpop.f32.mrb[9].mxu1 }
 0xa91   : > { %v5465_v16 = vadd.f32 %v6418_v22, %v5464_v0 }
 0xa92   : > { %5504 = vst [vmem:[#allocation7 + $0x8] sm:$0xff] %v5470_v50 }
 0xa93   : > { %5503 = vst [vmem:[#allocation7] sm:$0xff] %v5465_v16  ;;  %v7598_v24 = vpack.c.bf16 %v5470_v50, %v5465_v16  ;;  %v7420_v3 = vpop.f32.mrb[10].mxu1 }
 0xa94   : > { %v5480_v49 = vadd.f32 %v7420_v3, %v6418_v22  ;;  %v5474_v1 = vpop.f32.mrb[11].mxu1 }
 0xa95   : > { %v5475_v44 = vadd.f32 %v6418_v22, %v5474_v1  ;;  %7599 = vmatpush3.bf16.msra.mxu0 %v7598_v24 }
 0xa96   : > { %5506 = vst [vmem:[#allocation7 + $0x18] sm:$0xff] %v5480_v49  ;;  %7600 = vmatprep.subr.bf16.mxu0 %v8036_v46 }
 0xa97   : > { %5505 = vst [vmem:[#allocation7 + $0x10] sm:$0xff] %v5475_v44  ;;  %v7601_v52 = vpack.c.bf16 %v5480_v49, %v5475_v44  ;;  %v7423_v31 = vpop.f32.mrb[12].mxu1 }
 0xa98   : > { %v5490_v29 = vadd.f32 %v7423_v31, %v6418_v22  ;;  %v5484_v14 = vpop.f32.mrb[13].mxu1 }
 0xa99   : > { %v5485_v45 = vadd.f32 %v6418_v22, %v5484_v14  ;;  %7602 = vmatpush3.bf16.msra.mxu0 %v7601_v52 }
 0xa9a   : > { %5508 = vst [vmem:[#allocation7 + $0x28] sm:$0xff] %v5490_v29  ;;  %7603 = vmatprep.subr.bf16.mxu0 %v8036_v46 }
 0xa9b   : > { %5507 = vst [vmem:[#allocation7 + $0x20] sm:$0xff] %v5485_v45  ;;  %v7604_v58 = vpack.c.bf16 %v5490_v29, %v5485_v45  ;;  %v7426_v63 = vpop.f32.mrb[14].mxu1 }
 0xa9c   : > { %v5500_v34 = vadd.f32 %v7426_v63, %v6418_v22  ;;  %v5494_v18 = vpop.f32.mrb[15].mxu1 }
 0xa9d   : > { %v5495_v5 = vadd.f32 %v6418_v22, %v5494_v18  ;;  %7605 = vmatpush3.bf16.msra.mxu0 %v7604_v58 }
 0xa9e   : > { %5510 = vst [vmem:[#allocation7 + $0x38] sm:$0xff] %v5500_v34  ;;  %7606 = vmatprep.subr.bf16.mxu0 %v8036_v46 }
 0xa9f   : > { %5509 = vst [vmem:[#allocation7 + $0x30] sm:$0xff] %v5495_v5  ;;  %v7607_v19 = vpack.c.bf16 %v5500_v34, %v5495_v5 }
 0xaa1   : > { %7608 = vmatpush3.bf16.msra.mxu0 %v7607_v19 }
 0xaa4   : > { %7444 = vmatmul.mubr.msk.f32.vlgmr.msra.gmra.mrb[16].mxu0 %vm2062_vm1, %v6428_v47 }
 0xb77   : > { %v5590_v54 = vpop.f32.mrb[16].mxu0 }
 0xb78   : > { %v5600_v43 = vmul.f32 %v5598_v7, %v5590_v54  ;;  %v7445_v55 = vpop.f32.mrb[17].mxu0 }
 0xb7a   : > { %7479 = vmatmul.mubr.f32.vlgmr.msra.gmra.mrb[16].mxu1 %v5600_v43 }
 0xb7b   : > { %7482 = vmatpush3.msra.mxu1 %v5602_v12  ;;  %7483 = vmatprep.mubr.msk.f32.mxu1 %vm8037_vm2, %v8038_v53 }
 0xb7c   : > { %7633 = vmatprep.subr.bf16.mxu1 %v8036_v46 }
 0xb7e   : > { %7484 = vmatmul.mubr.msk.f32.vlgmr.msra.gmra.mrb[18].mxu1 %vm3209_vm3, %v5601_v39 }
 0xb7f   : > { %7494 = vmatprep.mubr.msk.f32.mxu1 %vm8037_vm2, %v8038_v53  ;;  %7635 = vmatpush3.bf16.msra.mxu1 %v7634_v13  ;;  %v6432_v53 = vld [vmem:[%s8207_s14] ss:$0 sm:$0xff] }
 0xb80   : > { %7636 = vmatprep.subr.bf16.mxu1 %v8036_v46 }
 0xb83   : > { %7638 = vmatpush3.bf16.msra.mxu1 %v7637_v15 }
 0xc4d   : > { %v5685_v62 = vpop.f32.mrb[16].mxu1 }
 0xc4e   : > { %v7480_v10 = vpop.f32.mrb[17].mxu1 }
 0xc51   : > { %v5758_v2 = vpop.f32.mrb[18].mxu1 }
 0xc52   : > { %v5759_v40 = vadd.f32 %v5758_v2, %v5685_v62  ;;  %v7485_v30 = vpop.f32.mrb[19].mxu1 }
 0xc54   : > { %v5769_v25 = vadd.f32 %v6431_v8, %v5759_v40 }
 0xc56   : > { %v5770_v36 = vmax.f32 %v5769_v25, 0.0 }
 0xc58   : > { %7495 = vmatmul.mubr.msk.f32.vlgmr.msra.gmra.mrb[20].mxu1 %vm3537_vm5, %v5770_v36 }
 0xd2b   : > { %v5851_v23 = vpop.f32.mrb[20].mxu1 }
 0xd2c   : > { %v5852_v56 = vadd.f32 %v6432_v53, %v5851_v23  ;;  %v7496_v51 = vpop.f32.mrb[21].mxu1 }
 0xd2e   : > { %5855 = vst [vmem:[#allocation11] sm:$0xf] %v5852_v56 }
 0xd2f PF: > { %s5856_s15 = sand.u32 1, %s8243_s0   ;;  %s6443_s23 = sshll.u32 %s8243_s0, 12 }
 0xd30   : > { %s5883_s18 = sshll.u32 %s8289_s3, 4  ;;  %s9543_s22 = scalar_lea.hbm %s8217_s20, %s6443_s23  ;;  %s9545_s18 = int_to_ptr.vmem [resolvable:$true] %s5883_s18 }
 0xd31   : > { %s9547_s1 = scalar_lea.sflag [#allocation10], %s5856_s15  ;;  %s7871_s2 = scalar_lea.vmem %s9545_s18, 4096 }
 0xd32   : > { %p7872_p0 = scmp.ne.s32.totalorder %s9545_s18, %s7871_s2  ;;  %s8039_s4 = smov [#allocation9]  }
 0xd33   : > { %s7875_s5 = sshll.u32 %s8039_s4, 4  ;;  %s7876_s5 = int_to_ptr.vmem [resolvable:$false] %s7875_s5 }
 0xd34   : > { %p7873_p1 = pnand %p7872_p0, %p8263_p5  ;;  %s7877_s6 = scalar_lea.vmem %s7876_s5, 8192 }
 0xd35   : > { %p7878_p4 = scmp.lt.s32.totalorder %s9545_s18, %s7876_s5  ;;  %p7879_p7 = scmp.lt.s32.totalorder %s7877_s6, %s7871_s2 }
 0xd36   : > { %p7874_p3 = pneg %p7873_p1 }
 0xd37   : > { %p7880_p8 = por %p7879_p7, %p7878_p4 }
 0xd39   : > { %p7881_p9 = pnand %p7880_p8, %p7874_p3 }
 0xd3b   : > { %7884 = shalt.err (!%p7881_p9)
}
 0xd3c   : > { %s7885_s3 = scalar_lea.hbm %s9543_s22, 4096  ;;  %s7889_s4 = scalar_lea.hbm %s8217_s20, 12288 }
 0xd3d   : > { %p7886_p10 = scmp.ne.s32.totalorder %s9543_s22, %s7885_s3  ;;  %p7890_p13 = scmp.lt.u32.totalorder %s9543_s22, %s8217_s20 }
 0xd3e   : > { %p7891_p0 = scmp.lt.u32.totalorder %s7889_s4, %s7885_s3  ;;  %p7893_p2 = scmp.lt.u32.totalorder %s7885_s3, %s9543_s22 }
 0xd3f   : > { %p7887_p11 = pnand %p7886_p10, %p8263_p5 }
 0xd40   : > { %p7892_p1 = por %p7891_p0, %p7890_p13 }
 0xd41   : > { %p7888_p12 = pneg %p7887_p11 }
 0xd42   : > { %p7894_p4 = por %p7893_p2, %p7892_p1 }
 0xd44   : > { %p7895_p3 = pnand %p7894_p4, %p7888_p12 }
 0xd46   : > { %7898 = shalt.err (!%p7895_p3)
}
 0xd47   : > { %s8040_s5 = smov 128   ;;  %s8041_s6 = smov 8  }
 0xd48   : > { %7732 = dma.vmem_to_hbm [thread:$0]  (%p8263_p5), %s9545_s18, 4096, %s9543_s22, %s9547_s1, %s8040_s5, %s8040_s5, %s8041_s6  }
 0xd49   : > { %s8042_s2 = smov [#allocation7]   ;;  %s8043_s23 = smov [#allocation11]  }
 0xd4a   : > { %s5867_s15 = sshll.u32 %s8042_s2, 4  ;;  %s5897_s9 = sshll.u32 %s8043_s23, 4  ;;  %s5868_s15 = int_to_ptr.vmem [resolvable:$true] %s5867_s15  ;;  %s9567_s9 = int_to_ptr.vmem [resolvable:$true] %s5897_s9 }
 0xd4b   : > { %s7899_s3 = scalar_lea.vmem %s5868_s15, 1024  ;;  %p9734_p7 = scmp.eq.s32.totalorder %s8243_s0, 2 }
 0xd4c   : > { %p7900_p2 = scmp.ne.s32.totalorder %s5868_s15, %s7899_s3  ;;  %p7906_p10 = scmp.lt.s32.totalorder %s5868_s15, %s5868_s15 }
 0xd4d   : > { %p7907_p11 = scmp.lt.s32.totalorder %s7899_s3, %s7899_s3 }
 0xd4e   : > { %p7901_p8 = pnand %p7900_p2, %p9734_p7 }
 0xd4f   : > { %p7908_p12 = por %p7907_p11, %p7906_p10 }
 0xd50   : > { %p7902_p9 = pneg %p7901_p8 }
 0xd52   : > { %p7909_p13 = pnand %p7908_p12, %p7902_p9 }
 0xd54   : > { %7912 = shalt.err (!%p7909_p13)
}
 0xd55   : > { %s7913_s7 = scalar_lea.hbm %s8212_s8, 1024  ;;  %p9735_p0 = pmov %p9734_p7 }
 0xd56   : > { %p7914_p5 = scmp.ne.s32.totalorder %s8212_s8, %s7913_s7  ;;  %p7919_p3 = scmp.lt.u32.totalorder %s7913_s7, %s8212_s8 }
 0xd58   : > { %p7915_p1 = pnand %p7914_p5, %p9735_p0 }
 0xd5a   : > { %p7916_p4 = pneg %p7915_p1 }
 0xd5c   : > { %p7921_p6 = pnand %p7919_p3, %p7916_p4 }
 0xd5e   : > { %7924 = shalt.err (!%p7921_p6)
}
 0xd5f   : > { %p9736_p2 = pmov %p9735_p0  ;;  %s7925_s1 = scalar_lea.vmem %s9567_s9, 64 }
 0xd60   : > { %p7926_p7 = scmp.ne.s32.totalorder %s9567_s9, %s7925_s1  ;;  %p9737_p8 = pmov %p9735_p0 }
 0xd61   : > { %7731 = dma.vmem_to_hbm [thread:$0]  (%p9736_p2), %s5868_s15, 1024, %s8212_s8, [#allocation8], %s8040_s5, %s8040_s5, %s8041_s6  }
 0xd62   : > { %p7927_p9 = pnand %p7926_p7, %p9737_p8  ;;  %p7932_p11 = scmp.lt.s32.totalorder %s9567_s9, %s9567_s9 }
 0xd63   : > { %p7933_p12 = scmp.lt.s32.totalorder %s7925_s1, %s7925_s1 }
 0xd64   : > { %p7928_p10 = pneg %p7927_p9 }
 0xd65   : > { %p7934_p13 = por %p7933_p12, %p7932_p11 }
 0xd67   : > { %p7935_p5 = pnand %p7934_p13, %p7928_p10 }
 0xd69   : > { %7938 = shalt.err (!%p7935_p5)
}
 0xd6a   : > { %s9738_s18 = sld [smem:[#allocation36_spill]] }
 0xd70   : > { %s9739_s4 = smov %s9738_s18  ;;  %s7939_s22 = scalar_lea.hbm %s9738_s18, 64 }
 0xd71   : > { %p7940_p6 = scmp.ne.s32.totalorder %s9739_s4, %s7939_s22  ;;  %p7945_p3 = scmp.lt.u32.totalorder %s7939_s22, %s9739_s4 }
 0xd73   : > { %p7941_p1 = pnand %p7940_p6, %p9735_p0 }
 0xd75   : > { %p7942_p4 = pneg %p7941_p1 }
 0xd77   : > { %p7947_p2 = pnand %p7945_p3, %p7942_p4 }
 0xd79   : > { %7950 = shalt.err (!%p7947_p2)
}
 0xd7a   : > { %p9740_p7 = pmov %p9735_p0  ;;  %p9741_p8 = pmov %p9735_p0 }
 0xd7c   : > { %7734 = dma.vmem_to_hbm [thread:$0]  (%p9740_p7), %s9567_s9, 64, %s9739_s4, [#allocation10]  }
 0xd7d   : > { %7968 = dma.done.wait (%p9741_p8), [#allocation8], 1024   ;;  %p9742_p9 = pmov %p9735_p0 }
 0xd7e   : > { %p9743_p10 = pmov %p9735_p0 }
 0xd7f   : > { %7970 = vsyncadd (%p9742_p9), [#allocation8], 4294966272 }
 0xd80   : > { %7972 = dma.done.wait (%p9743_p10), [#allocation10], 64   ;;  %p9744_p11 = pmov %p9735_p0 }
 0xd82   : > { %7974 = vsyncadd (%p9744_p11), [#allocation10], 4294967232 }
 0xd83 PF: > { %s9745_s5 = sld [smem:[#allocation38_spill]]  ;;  %s9746_s6 = sld [smem:[#allocation41_spill]] }
 0xd89   : > { %p7748_p12 = scmp.ge.s32.totalorder %s9745_s5, 2  ;;  %s9747_s2 = sadd.s32 4294967294, %s9745_s5  }
 0xd8a   : > { %s5917_s15 = sand.u32 1, %s9747_s2   ;;  %p9748_p13 = scmp.ne.s32.totalorder %s9746_s6, 0 }
 0xd8b   : > { %s5918_s9 = scalar_lea.sflag [#allocation10], %s5917_s15 }
 0xd8c   : > { %p7741_p5 = pnand %p7748_p12, %p9748_p13 }
 0xd8e   : > { %7976 = dma.done.wait (!%p7741_p5), %s5918_s9, 4096  }
 0xd8f   : > { %7978 = vsyncadd (!%p7741_p5), %s5918_s9, 4294963200  ;;  %s9749_s22 = sld [smem:[#allocation39_spill]]  ;;  %s9750_s23 = sld [smem:[#allocation37_spill]] }
 0xd90   : > { %s9751_s18 = sld [smem:[#allocation40_spill]]  ;;  %s9752_s15 = smov %s7985_s16 }
 0xd95   : > { %p81_p6 = scmp.ge.s32.totalorder %s9749_s22, 5   ;;  %s9753_s16 = smov %s9750_s23 }
 0xd97   :  { %83 = sbr.rel (!%p81_p6) target bundleno = 67 (0x43), region = 251 }
 0xd9e   :  { %5923 = vsyncpa [#allocation8], 1 }
 0xd9f   :  { %5925 = vsyncpa [#allocation8 + $0x1], 1 }
 0xda0   :  { %5926 = vsyncpa [#allocation10], 1 }
 0xda1   :  { %5928 = vsyncpa [#allocation10 + $0x1], 1 }

</bundles_post_ra>
